<compile_context>
chip_gen: v6e
topology: v6e:2x2x1
jax: 0.10.0
libtpu: 0.0.40
codegen_flags: <defaults>
</compile_context>

<pallas_src>
from functools import partial

import jax
import jax.numpy as jnp
from jax.experimental import pallas as pl
from jax.experimental.pallas import tpu as pltpu

LANES = 128
SUBLANES = 8
ROW_ALIGN = 16                 # block-row multiple valid for f32 (8) and bf16 (16) tiling
MAX_ROW_TILE = 8192            # 4 MiB f32 per input block; 2 inputs x 2 buffers = 16 MiB
MAX_CORES = 2                  # leading 'parallel' axis width on multi-TC chips (v7x)
SMALL_FALLBACK_ELEMS = 64 * 1024   # below ~256 KiB of f32 data, fused XLA wins

_TC_COUNT_CACHE = None


def _tensorcores_per_chip(default: int = MAX_CORES) -> int:
    """Best-effort TensorCore count per chip; never raises, defaults to `default`."""
    global _TC_COUNT_CACHE
    if _TC_COUNT_CACHE is not None:
        return _TC_COUNT_CACHE
    result = default
    try:
        info = pltpu.get_tpu_info()
        for name in ("num_cores", "core_count", "num_tensorcores",
                     "tensorcore_count", "cores_per_chip"):
            val = getattr(info, name, None)
            if val is None:
                continue
            val = int(val)
            if val >= 1:
                result = val
                break
    except Exception:
        result = default
    _TC_COUNT_CACHE = result
    return result


def _as_kernel_dtype(x: jax.Array) -> jax.Array:
    """Stream f32/bf16 natively; cast anything else to f32 (rare path)."""
    if x.dtype == jnp.float32 or x.dtype == jnp.bfloat16:
        return x
    return x.astype(jnp.float32)


def _mse_partial_kernel(p_ref, g_ref, out_ref, *, row_tile, rows, steps_per_core):
    """Accumulate per-(sublane, lane) partial sums of (p - g)^2 into out_ref.

    out_ref is an (8, 128) f32 block resident across the reduction (last) grid
    axis: zeroed at i == 0, written back when the core/block index changes.
    The hot path is VPU-only (sub, mul, vreg adds); the OOB-row mask runs only
    for the last (partial) block of a core and for clamped duplicate blocks.
    """
    c = pl.program_id(0)   # core-split axis ('parallel')
    i = pl.program_id(1)   # streaming reduction axis ('arbitrary')

    @pl.when(i == 0)
    def _():
        out_ref[...] = jnp.zeros_like(out_ref)

    base_row = (c * steps_per_core + i) * row_tile
    needs_mask = base_row + row_tile > rows   # partial edge block or clamped duplicate

    def accumulate(masked):
        d = p_ref[...].astype(jnp.float32) - g_ref[...].astype(jnp.float32)
        if masked:
            row_ids = base_row + jax.lax.broadcasted_iota(
                jnp.int32, (row_tile, LANES), 0)
            d = jnp.where(row_ids < rows, d, 0.0)
        sq = d * d
        # (row_tile, 128) -> (row_tile//8, 8, 128) is tile-aligned (layout no-op);
        # the axis-0 sum is row_tile//8 vreg adds on the VPU.
        out_ref[...] += jnp.sum(
            sq.reshape(row_tile // SUBLANES, SUBLANES, LANES), axis=0)

    @pl.when(jnp.logical_not(needs_mask))
    def _():
        accumulate(False)

    @pl.when(needs_mask)
    def _():
        accumulate(True)


def vert_reg_loss(predvert: jax.Array, gtvert: jax.Array) -> jax.Array:
    """MSE loss (mean reduction) over predvert vs gtvert, computed in Pallas."""
    assert predvert.shape == gtvert.shape, "predvert/gtvert shapes must match"
    n_elems = predvert.size

    p = _as_kernel_dtype(predvert)
    g = _as_kernel_dtype(gtvert)

    # Small-input fallback: pallas_call fixed costs dominate below a few tiles.
    if n_elems < SMALL_FALLBACK_ELEMS:
        d = p.astype(jnp.float32) - g.astype(jnp.float32)
        return jnp.mean(d * d)

    p_flat = jnp.ravel(p)
    g_flat = jnp.ravel(g)

    # Lane alignment: the kernel streams a (rows, 128) view.  Any <128-element
    # remainder is reduced in plain JAX instead of padding the whole array.
    rem = n_elems % LANES
    main = n_elems - rem
    if rem:
        dt = (p_flat[main:].astype(jnp.float32)
              - g_flat[main:].astype(jnp.float32))
        tail_sum = jnp.sum(dt * dt)
        p_flat = p_flat[:main]
        g_flat = g_flat[:main]
    else:
        tail_sum = None

    rows = main // LANES
    p2d = p_flat.reshape(rows, LANES)
    g2d = g_flat.reshape(rows, LANES)

    # Big row tiles so per-step overhead is negligible; multiple of 16 keeps
    # both f32 (8,128) and bf16 (16,128) block-tiling constraints satisfied.
    row_tile = min(MAX_ROW_TILE, (rows // ROW_ALIGN) * ROW_ALIGN)
    total_steps = pl.cdiv(rows, row_tile)
    n_cores = max(1, min(MAX_CORES, _tensorcores_per_chip(MAX_CORES), total_steps))
    steps_per_core = pl.cdiv(total_steps, n_cores)

    def in_map(c, i):
        # Clamp so over-provisioned steps never index out of bounds; their
        # contribution is zeroed by the (gated) in-kernel row mask.
        return (jnp.minimum(c * steps_per_core + i, total_steps - 1), 0)

    kernel = partial(_mse_partial_kernel, row_tile=row_tile, rows=rows,
                     steps_per_core=steps_per_core)

    bytes_accessed = (p2d.size * p2d.dtype.itemsize
                      + g2d.size * g2d.dtype.itemsize
                      + n_cores * SUBLANES * LANES * 4)

    partials = pl.pallas_call(
        kernel,
        out_shape=jax.ShapeDtypeStruct((n_cores * SUBLANES, LANES), jnp.float32),
        grid=(n_cores, steps_per_core),
        in_specs=[
            pl.BlockSpec((row_tile, LANES), in_map),
            pl.BlockSpec((row_tile, LANES), in_map),
        ],
        out_specs=pl.BlockSpec((SUBLANES, LANES), lambda c, i: (c, 0)),
        compiler_params=pltpu.CompilerParams(
            dimension_semantics=("parallel", "arbitrary"),
            # 2 inputs x 2 buffers x <=4 MiB plus temporaries fits comfortably;
            # explicit limit also lifts v5e's 16 MiB default scoped limit.
            vmem_limit_bytes=32 * 1024 * 1024,
        ),
        cost_estimate=pl.CostEstimate(
            flops=3 * main, transcendentals=0, bytes_accessed=bytes_accessed),
    )(p2d, g2d)

    # Tiny epilogue in plain JAX: cross-lane reduce of <= 2 vregs of partials,
    # optional tail, then scale by the compile-time constant 1/N.
    total = jnp.sum(partials)
    if tail_sum is not None:
        total = total + tail_sum
    return total * jnp.float32(1.0 / float(n_elems))


if __name__ == "__main__":
    key = jax.random.PRNGKey(0)
    k1, k2, k3, k4, k5, k6, k7, k8 = jax.random.split(key, 8)

    # 1) Module-convention small shape (batch=2, n_verts=37, vert_dim=3):
    #    exercises the fused-XLA small-input fallback.
    p1 = jax.random.normal(k1, (2, 37, 3), dtype=jnp.float32)
    g1 = jax.random.normal(k2, (2, 37, 3), dtype=jnp.float32)
    l1 = vert_reg_loss(p1, g1)
    jax.block_until_ready(l1)
    r1 = jnp.mean((p1 - g1) ** 2)
    assert jnp.allclose(l1, r1, rtol=1e-5, atol=1e-6), (l1, r1)

    # 2) Kernel path, f32: masked partial last block + <128-element JAX tail.
    p2 = jax.random.normal(k3, (8, 11000, 3), dtype=jnp.float32)
    g2 = jax.random.normal(k4, (8, 11000, 3), dtype=jnp.float32)
    l2 = vert_reg_loss(p2, g2)
    jax.block_until_ready(l2)
    r2 = jnp.mean((p2 - g2) ** 2)
    assert jnp.allclose(l2, r2, rtol=1e-4, atol=1e-6), (l2, r2)

    # 3) Kernel path, native bf16 streaming (cast to f32 inside the kernel).
    p3 = jax.random.normal(k5, (4, 9000, 3), dtype=jnp.bfloat16)
    g3 = jax.random.normal(k6, (4, 9000, 3), dtype=jnp.bfloat16)
    l3 = vert_reg_loss(p3, g3)
    jax.block_until_ready(l3)
    r3 = jnp.mean((p3.astype(jnp.float32) - g3.astype(jnp.float32)) ** 2)
    assert jnp.allclose(l3, r3, rtol=1e-4, atol=1e-6), (l3, r3)

    # 4) Larger kernel path: multiple 8192-row tiles, 2-way core split with an
    #    odd step count (clamped duplicate block) and a masked last block.
    p4 = jax.random.normal(k7, (8, 100000, 3), dtype=jnp.float32)
    g4 = jax.random.normal(k8, (8, 100000, 3), dtype=jnp.float32)
    l4 = vert_reg_loss(p4, g4)
    jax.block_until_ready(l4)
    r4 = jnp.mean((p4 - g4) ** 2)
    assert jnp.allclose(l4, r4, rtol=1e-4, atol=1e-6), (l4, r4)

    print("KERNEL_OK")
</pallas_src>

<mosaic_0001>
module attributes {stable_mosaic.version = 11 : i64} {
  func.func @_mse_partial_kernel(%arg0: i32, %arg1: i32, %arg2: memref<2048x128xf32, #tpu.memory_space<vmem>>, %arg3: memref<2048x128xf32, #tpu.memory_space<vmem>>, %arg4: memref<8x128xf32, #tpu.memory_space<vmem>>) attributes {dimension_semantics = [#tpu.dimension_semantics<parallel>, #tpu.dimension_semantics<arbitrary>], iteration_bounds = array<i64: 2, 1>, scalar_prefetch = 0 : i64, scratch_operands = 0 : i64, tpu.core_type = #tpu.core_type<tc>, window_params = [{transform_indices = @transform_0, window_bounds = array<i64: 2048, 128>}, {transform_indices = @transform_1, window_bounds = array<i64: 2048, 128>}, {transform_indices = @transform_2, window_bounds = array<i64: 8, 128>}]} {
    %c0_i32 = arith.constant 0 : i32
    %0 = arith.cmpi eq, %arg1, %c0_i32 : i32
    %1 = arith.extui %0 : i1 to i32
    %c0_i32_0 = arith.constant 0 : i32
    %2 = arith.cmpi ne, %1, %c0_i32_0 : i32
    scf.if %2 {
      %cst = arith.constant 0.000000e+00 : f32
      %13 = vector.broadcast %cst : f32 to vector<8x128xf32>
      %c0 = arith.constant 0 : index
      %c0_4 = arith.constant 0 : index
      %14 = vector.load %arg4[%c0, %c0_4] : memref<8x128xf32, #tpu.memory_space<vmem>>, vector<8x128xf32>
      tpu.vector_store %arg4[%c0, %c0_4], %13 {strides = array<i32>} : memref<8x128xf32, #tpu.memory_space<vmem>>, vector<8x128xf32>,
    } else {
    }
    %c1_i32 = arith.constant 1 : i32
    %3 = arith.muli %arg0, %c1_i32 : i32
    %4 = arith.addi %3, %arg1 : i32
    %c2048_i32 = arith.constant 2048 : i32
    %5 = arith.muli %4, %c2048_i32 : i32
    %c2048_i32_1 = arith.constant 2048 : i32
    %6 = arith.addi %5, %c2048_i32_1 : i32
    %c2062_i32 = arith.constant 2062 : i32
    %7 = arith.cmpi sgt, %6, %c2062_i32 : i32
    %true = arith.constant true
    %8 = arith.xori %7, %true : i1
    %9 = arith.extui %8 : i1 to i32
    %c0_i32_2 = arith.constant 0 : i32
    %10 = arith.cmpi ne, %9, %c0_i32_2 : i32
    scf.if %10 {
      %c0 = arith.constant 0 : index
      %c0_4 = arith.constant 0 : index
      %13 = vector.load %arg2[%c0, %c0_4] : memref<2048x128xf32, #tpu.memory_space<vmem>>, vector<2048x128xf32>
      %c0_5 = arith.constant 0 : index
      %c0_6 = arith.constant 0 : index
      %14 = vector.load %arg3[%c0_5, %c0_6] : memref<2048x128xf32, #tpu.memory_space<vmem>>, vector<2048x128xf32>
      %15 = arith.subf %13, %14 : vector<2048x128xf32>
      %16 = arith.mulf %15, %15 : vector<2048x128xf32>
      %c0_7 = arith.constant 0 : index
      %c0_8 = arith.constant 0 : index
      %17 = vector.load %arg4[%c0_7, %c0_8] : memref<8x128xf32, #tpu.memory_space<vmem>>, vector<8x128xf32>
      %18 = vector.shape_cast %16 : vector<2048x128xf32> to vector<256x8x128xf32>
      %cst = arith.constant dense<0.000000e+00> : vector<8x128xf32>
      %19 = vector.multi_reduction <add>, %18, %cst [0] : vector<256x8x128xf32> to vector<8x128xf32>
      %20 = arith.addf %17, %19 : vector<8x128xf32>
      %c0_9 = arith.constant 0 : index
      %c0_10 = arith.constant 0 : index
      %21 = vector.load %arg4[%c0_9, %c0_10] : memref<8x128xf32, #tpu.memory_space<vmem>>, vector<8x128xf32>
      tpu.vector_store %arg4[%c0_9, %c0_10], %20 {strides = array<i32>} : memref<8x128xf32, #tpu.memory_space<vmem>>, vector<8x128xf32>,
    } else {
    }
    %11 = arith.extui %7 : i1 to i32
    %c0_i32_3 = arith.constant 0 : i32
    %12 = arith.cmpi ne, %11, %c0_i32_3 : i32
    scf.if %12 {
      %c0 = arith.constant 0 : index
      %c0_4 = arith.constant 0 : index
      %13 = vector.load %arg2[%c0, %c0_4] : memref<2048x128xf32, #tpu.memory_space<vmem>>, vector<2048x128xf32>
      %c0_5 = arith.constant 0 : index
      %c0_6 = arith.constant 0 : index
      %14 = vector.load %arg3[%c0_5, %c0_6] : memref<2048x128xf32, #tpu.memory_space<vmem>>, vector<2048x128xf32>
      %15 = arith.subf %13, %14 : vector<2048x128xf32>
      %16 = tpu.iota {dimensions = array<i32: 0>} : vector<2048x128xi32>
      %17 = vector.broadcast %5 : i32 to vector<2048x128xi32>
      %18 = arith.addi %17, %16 : vector<2048x128xi32>
      %c2062_i32_7 = arith.constant 2062 : i32
      %19 = vector.broadcast %c2062_i32_7 : i32 to vector<2048x128xi32>
      %20 = arith.cmpi slt, %18, %19 : vector<2048x128xi32>
      %cst = arith.constant 0.000000e+00 : f32
      %21 = vector.broadcast %cst : f32 to vector<2048x128xf32>
      %22 = arith.select %20, %15, %21 : vector<2048x128xi1>, vector<2048x128xf32>
      %23 = arith.mulf %22, %22 : vector<2048x128xf32>
      %c0_8 = arith.constant 0 : index
      %c0_9 = arith.constant 0 : index
      %24 = vector.load %arg4[%c0_8, %c0_9] : memref<8x128xf32, #tpu.memory_space<vmem>>, vector<8x128xf32>
      %25 = vector.shape_cast %23 : vector<2048x128xf32> to vector<256x8x128xf32>
      %cst_10 = arith.constant dense<0.000000e+00> : vector<8x128xf32>
      %26 = vector.multi_reduction <add>, %25, %cst_10 [0] : vector<256x8x128xf32> to vector<8x128xf32>
      %27 = arith.addf %24, %26 : vector<8x128xf32>
      %c0_11 = arith.constant 0 : index
      %c0_12 = arith.constant 0 : index
      %28 = vector.load %arg4[%c0_11, %c0_12] : memref<8x128xf32, #tpu.memory_space<vmem>>, vector<8x128xf32>
      tpu.vector_store %arg4[%c0_11, %c0_12], %27 {strides = array<i32>} : memref<8x128xf32, #tpu.memory_space<vmem>>, vector<8x128xf32>,
    } else {
    }
    return
  }
  func.func @transform_0(%arg0: i32, %arg1: i32) -> (i32, i32) {
    %c1_i32 = arith.constant 1 : i32
    %0 = arith.muli %arg0, %c1_i32 : i32
    %1 = arith.addi %0, %arg1 : i32
    %c1_i32_0 = arith.constant 1 : i32
    %2 = arith.minsi %1, %c1_i32_0 : i32
    %c0_i32 = arith.constant 0 : i32
    %c0_i32_1 = arith.constant 0 : i32
    return %2, %c0_i32 : i32, i32
  }
  func.func @transform_1(%arg0: i32, %arg1: i32) -> (i32, i32) {
    %c1_i32 = arith.constant 1 : i32
    %0 = arith.muli %arg0, %c1_i32 : i32
    %1 = arith.addi %0, %arg1 : i32
    %c1_i32_0 = arith.constant 1 : i32
    %2 = arith.minsi %1, %c1_i32_0 : i32
    %c0_i32 = arith.constant 0 : i32
    %c0_i32_1 = arith.constant 0 : i32
    return %2, %c0_i32 : i32, i32
  }
  func.func @transform_2(%arg0: i32, %arg1: i32) -> (i32, i32) {
    %c0_i32 = arith.constant 0 : i32
    %c0_i32_0 = arith.constant 0 : i32
    return %arg0, %c0_i32 : i32, i32
  }
}

</mosaic_0001>

<bundles_post_ra>
// kernel: tpu_custom_call.1
= control target key start
LH: loop header
LB: loop body
LE: loop exit
PB: predicated region body
PF: predicated region fallthrough
CT: control target
= control target key end

     0   :  { %s6080_s0 = inlined_call_operand.hbm [shape: f32[2062,128], index: 0, kind: input, shape index: {}]   ;;  %s6081_s1 = inlined_call_operand.hbm [shape: f32[2062,128], index: 1, kind: input, shape index: {}]   ;;  %s6082_s2 = inlined_call_operand.hbm [shape: f32[16,128], index: 2, kind: output, shape index: {}]  }
   0x1   :  { %6084 = sst [smem:[#allocation11_spill]] %s6080_s0 }
   0x2   :  { %7 = vsyncpa [#allocation3], 0 }
   0x3   :  { %9 = vsyncpa [#allocation3 + $0x1], 0 }
   0x4   :  { %10 = vsyncpa [#allocation6], 0 }
   0x5   :  { %12 = vsyncpa [#allocation6 + $0x1], 0 }
   0x6   :  { %13 = vsyncpa [#allocation4], 0 }
   0x7   :  { %15 = vsyncpa [#allocation4 + $0x1], 0  ;;  %s4283_s9 = smov 0   ;;  %s4285_s10 = smov 0  }
   0x8   :  { %s4287_s11 = smov 0   ;;  %s4289_s12 = smov 0  }
   0x9   :  { %s4291_s13 = smov 0   ;;  %s4293_s14 = smov 0  }
   0xa   :  { %s4295_s15 = smov 0   ;;  %s4297_s16 = smov 0  }
   0xb   :  { %s4299_s17 = smov 0  }
   0xc LB: > { %s3981_s18 = sadd.s32 4294967295, %s4258_s17   ;;  %s3982_s19 = sadd.s32 4294967294, %s4258_s17   ;;  %s4258_s17 = sphi %s4299_s17, %s21_s17   ;;  %s4254_s16 = sphi %s4297_s16, %s6099_s16   ;;  %s4250_s15 = sphi %s4295_s15, %s6098_s15   ;;  %s4246_s14 = sphi %s4293_s14, %s6097_s14   ;;  %s4242_s13 = sphi %s4291_s13, %s6096_s13   ;;  %s4238_s12 = sphi %s4289_s12, %s6095_s12   ;;  %s4234_s11 = sphi %s4287_s11, %s6094_s11   ;;  %s4230_s10 = sphi %s4285_s10, %s6093_s10   ;;  %s4226_s9 = sphi %s4283_s9, %s6092_s9  }
   0xd   : > { %s33_s20 = sadd.s32 1, %s4254_s16  ;;  %p38_p0 = scmp.lt.s32.totalorder %s4254_s16, 1 }
   0xe   : > { %p35_p1 = scmp.ge.s32.totalorder %s33_s20, 2  ;;  %s46_s21 = sadd.s32 1, %s4246_s14 }
   0xf   : > { %s4332_s22 = scalar_select %p38_p0, %s4254_s16, 1 }
  0x10   : > { %s6101_s20 = smov (%p35_p1, %s33_s20), 0  ;;  %p53_p2 = scmp.ne.s32.totalorder %s4246_s14, %s4242_s13 }
  0x11   : > { %p54_p3 = scmp.eq.s32.totalorder %s4258_s17, 0  ;;  %p41_p4 = scmp.lt.s32.totalorder %s6101_s20, 1 }
  0x12   : > { %p59_p5 = scmp.ne.s32.totalorder %s4242_s13, %s4238_s12  ;;  %p60_p7 = scmp.eq.s32.totalorder %s3981_s18, 0 }
  0x13   : > { %p4341_p6 = por %p54_p3, %p53_p2  ;;  %s101_s26 = ssub.s32 %s4254_s16, %s6101_s20 }
  0x14   : > { %s42_s24 = scalar_select %p41_p4, %s6101_s20, 1 }
  0x15   : > { %p4346_p8 = por %p60_p7, %p59_p5  ;;  %p102_p9 = scmp.eq.s32.totalorder %s101_s26, 0 }
  0x16   : > { %s43_s27 = ssub.s32 %s4332_s22, %s42_s24  ;;  %s104_s28 = sadd.s32 1, %s4234_s11 }
  0x17   : > { %p44_p10 = scmp.eq.s32.totalorder %s43_s27, 0  ;;  %p114_p11 = scmp.ne.s32.totalorder %s4234_s11, %s4230_s10 }
  0x18   : > { %s4355_s29 = scalar_select %p102_p9, %s4234_s11, %s104_s28  }
  0x19   : > { %s4358_s30 = scalar_select %p44_p10, %s4246_s14, %s46_s21  }
  0x1a   : > { %p115_p12 = scmp.eq.s32.totalorder %s3981_s18, 1  ;;  %p120_p13 = scmp.ne.s32.totalorder %s4230_s10, %s4226_s9 }
  0x1b   : > { %p121_p0 = scmp.eq.s32.totalorder %s3982_s19, 1  ;;  %p6083_p3 = scmp.ge.s32.totalorder %s4258_s17, 2 }
  0x1c   : > { %p4364_p1 = por %p115_p12, %p114_p11 }
  0x1d   : > { %p4368_p2 = por %p121_p0, %p120_p13  ;;  %137 = sbr.rel (%p6083_p3) target bundleno = 104 (0x68), region = 16 }
  0x1f   : > { %s6088_s4 = scalar_select %p4368_p2, 1, 0 }
  0x22   : > { %140 = sbr.rel (!%p4341_p6) target bundleno = 72 (0x48), region = 20  ;;  %s141_s5 = sand.u32 (%p4341_p6), 1, %s4246_s14  }
  0x23   : > { %s3986_s6 = sshll.u32 (%p4341_p6), %s4332_s22, 8  ;;  %s3985_s7 = sshll.u32 (%p4341_p6), %s141_s5, 11 }
  0x24   : > { %s150_s8 = ssub.s32 (%p4341_p6), 258, %s3986_s6  ;;  %s4382_s19 = scalar_lea.sflag (%p4341_p6), [#allocation3], %s141_s5 }
  0x25   : > { %p151_p4 = scmp.lt.s32.totalorder (%p4341_p6), %s150_s8, 256  ;;  %s145_s21 = scalar_lea.vmem (%p4341_p6), [#allocation2], %s3985_s7 }
  0x27   : > { %s6103_s8 = smov (!%p151_p4, %s150_s8), 256 }
  0x28   : > { %s4379_s12 = sshll.u32 %s6103_s8, 7 }
  0x29   : > { %s155_s18 = ssub.s32 32768, %s4379_s12 }
  0x2a   : > { %156 = vsyncadd %s4382_s19, %s155_s18  ;;  %p3988_p5 = scmp.ne.s32.totalorder %s4379_s12, 0  ;;  %s4010_s24 = sshll.u32 %s4332_s22, 15 }
  0x2b   : > { %s6089_s0 = sld [smem:[#allocation11_spill]]  ;;  %s161_s6 = sshll.u32 %s145_s21, 4  ;;  %s4392_s6 = int_to_ptr.vmem [resolvable:$true] %s161_s6 }
  0x31   : > { %s4390_s28 = scalar_lea.hbm %s6089_s0, %s4010_s24  ;;  %s4102_s18 = scalar_lea.hbm %s6089_s0, 33024 }
  0x32   : > { %s4098_s5 = scalar_lea.hbm %s4390_s28, %s4379_s12 }
  0x33   : > { %p4099_p7 = scmp.ne.s32.totalorder %s4390_s28, %s4098_s5  ;;  %p4104_p11 = scmp.lt.s32.totalorder %s4102_s18, %s4098_s5 }
  0x35   : > { %p4100_p9 = pnand %p4099_p7, %p3988_p5 }
  0x37   : > { %p4101_p10 = pneg %p4100_p9 }
  0x39   : > { %p4106_p12 = pnand %p4104_p11, %p4101_p10 }
  0x3b   : > { %4109 = shalt.err (!%p4106_p12)
}
  0x3c   : > { %s4110_s21 = scalar_lea.vmem %s4392_s6, %s4379_s12  ;;  %s4260_s24 = smov [#allocation2]  }
  0x3d   : > { %p4111_p13 = scmp.ne.s32.totalorder %s4392_s6, %s4110_s21  ;;  %s4114_s26 = sshll.u32 %s4260_s24, 4  ;;  %s4115_s26 = int_to_ptr.vmem [resolvable:$false] %s4114_s26 }
  0x3e   : > { %s4116_s27 = scalar_lea.vmem %s4115_s26, 65536  ;;  %p4117_p7 = scmp.lt.s32.totalorder %s4392_s6, %s4115_s26 }
  0x3f   : > { %p4112_p0 = pnand %p4111_p13, %p3988_p5  ;;  %p4118_p9 = scmp.lt.s32.totalorder %s4116_s27, %s4110_s21 }
  0x41   : > { %p4113_p4 = pneg %p4112_p0  ;;  %p4119_p3 = por %p4118_p9, %p4117_p7 }
  0x43   : > { %p4120_p2 = pnand %p4119_p3, %p4113_p4 }
  0x45   : > { %4123 = shalt.err (!%p4120_p2)
}
  0x46   : > { %s4261_s5 = smov 128   ;;  %s4262_s7 = smov 8  }
  0x47   : > { %167 = dma.hbm_to_vmem [thread:$0]  (%p3988_p5), %s4390_s28, %s4379_s12, %s4392_s6, %s4382_s19, %s4261_s5, %s4261_s5, %s4262_s7  }
  0x48 PF: > { %170 = sbr.rel (!%p4341_p6) target bundleno = 104 (0x68), region = 24  ;;  %s171_s8 = sand.u32 (%p4341_p6), 1, %s4246_s14  }
  0x49   : > { %s3993_s18 = sshll.u32 (%p4341_p6), %s4332_s22, 8  ;;  %s3992_s21 = sshll.u32 (%p4341_p6), %s171_s8, 11 }
  0x4a   : > { %s180_s24 = ssub.s32 (%p4341_p6), 258, %s3993_s18  ;;  %s4421_s0 = scalar_lea.sflag (%p4341_p6), [#allocation6], %s171_s8 }
  0x4b   : > { %p181_p2 = scmp.lt.s32.totalorder (%p4341_p6), %s180_s24, 256  ;;  %s175_s12 = scalar_lea.vmem (%p4341_p6), [#allocation5], %s3992_s21 }
  0x4d   : > { %s6105_s24 = smov (!%p181_p2, %s180_s24), 256 }
  0x4e   : > { %s4418_s26 = sshll.u32 %s6105_s24, 7 }
  0x4f   : > { %s185_s27 = ssub.s32 32768, %s4418_s26 }
  0x50   : > { %186 = vsyncadd %s4421_s0, %s185_s27  ;;  %p3995_p6 = scmp.ne.s32.totalorder %s4418_s26, 0  ;;  %s4011_s23 = sshll.u32 %s4332_s22, 15 }
  0x51   : > { %s4429_s6 = scalar_lea.hbm %s6081_s1, %s4011_s23  ;;  %s191_s5 = sshll.u32 %s175_s12, 4  ;;  %s4431_s5 = int_to_ptr.vmem [resolvable:$true] %s191_s5 }
  0x52   : > { %s4124_s7 = scalar_lea.hbm %s4429_s6, %s4418_s26  ;;  %s4128_s21 = scalar_lea.hbm %s6081_s1, 33024 }
  0x53   : > { %p4125_p3 = scmp.ne.s32.totalorder %s4429_s6, %s4124_s7  ;;  %p4130_p11 = scmp.lt.s32.totalorder %s4128_s21, %s4124_s7 }
  0x55   : > { %p4126_p5 = pnand %p4125_p3, %p3995_p6 }
  0x57   : > { %p4127_p10 = pneg %p4126_p5 }
  0x59   : > { %p4132_p12 = pnand %p4130_p11, %p4127_p10 }
  0x5b   : > { %4135 = shalt.err (!%p4132_p12)
}
  0x5c   : > { %s4136_s22 = scalar_lea.vmem %s4431_s5, %s4418_s26  ;;  %s4263_s24 = smov [#allocation5]  }
  0x5d   : > { %p4137_p13 = scmp.ne.s32.totalorder %s4431_s5, %s4136_s22  ;;  %s4140_s27 = sshll.u32 %s4263_s24, 4  ;;  %s4141_s27 = int_to_ptr.vmem [resolvable:$false] %s4140_s27 }
  0x5e   : > { %s4142_s12 = scalar_lea.vmem %s4141_s27, 65536  ;;  %p4143_p7 = scmp.lt.s32.totalorder %s4431_s5, %s4141_s27 }
  0x5f   : > { %p4138_p0 = pnand %p4137_p13, %p3995_p6  ;;  %p4144_p9 = scmp.lt.s32.totalorder %s4142_s12, %s4136_s22 }
  0x61   : > { %p4139_p4 = pneg %p4138_p0  ;;  %p4145_p2 = por %p4144_p9, %p4143_p7 }
  0x63   : > { %p4146_p3 = pnand %p4145_p2, %p4139_p4 }
  0x65   : > { %4149 = shalt.err (!%p4146_p3)
}
  0x66   : > { %s4264_s23 = smov 128   ;;  %s4265_s19 = smov 8  }
  0x67   : > { %197 = dma.hbm_to_vmem [thread:$0]  (%p3995_p6), %s4429_s6, %s4418_s26, %s4431_s5, %s4421_s0, %s4264_s23, %s4264_s23, %s4265_s19  }
  0x68 PF: > { %p3999_p5 = scmp.ge.s32.totalorder %s4258_s17, 1  ;;  %p199_p10 = scmp.lt.s32.totalorder %s4258_s17, 3 }
  0x6a   : > { %p200_p11 = pnand %p3999_p5, %p199_p10 }
  0x6b   : > { %s205_s28 = sand.u32 (!%p200_p11), 1, %s4242_s13  }
  0x6c   : > { %203 = sbr.rel (%p200_p11) target bundleno = 1200 (0x4b0), region = 28  ;;  %s4000_s7 = sshll.u32 (!%p200_p11), %s205_s28, 11 }
  0x6d   : > { %s206_s8 = scalar_lea.sflag (!%p200_p11), [#allocation3], %s205_s28  ;;  %s4456_s18 = scalar_lea.vmem (!%p200_p11), [#allocation2], %s4000_s7 }
  0x71   : > { %4213 = dma.done.wait (%p4346_p8), %s206_s8, 32768  }
  0x72   : > { %4215 = vsyncadd (%p4346_p8), %s206_s8, 4294934528  ;;  %s215_s0 = scalar_lea.sflag [#allocation6], %s205_s28  ;;  %s4462_s26 = scalar_lea.vmem [#allocation5], %s4000_s7 }
  0x73   : > { %4217 = dma.done.wait (%p4346_p8), %s215_s0, 32768  }
  0x74   : > { %4219 = vsyncadd (%p4346_p8), %s215_s0, 4294934528  ;;  %s241_s6 = sand.u32 1, %s4230_s10   ;;  %s4003_s5 = sshll.u32 %s4250_s15, 11  ;;  %v4266_v0 = vmov 0.0  }
  0x75   : > { %s4002_s21 = sshll.u32 %s241_s6, 3  ;;  %s4474_s22 = sadd.s32 2048, %s4003_s5 }
  0x76   : > { %s4476_s24 = scalar_lea.vmem [#allocation7], %s4002_s21  ;;  %p4004_p6 = scmp.gt.s32.totalorder %s4474_s22, 2062 }
  0x77   : > { %264 = vst [vmem:[%s4476_s24] sm:$0xff] %v4266_v0 }
  0x78   : > { %272 = sbr.rel (%p4004_p6) target bundleno = 644 (0x284), region = 44 }
  0x7d   : > { %v273_v1 = vld [vmem:[%s4456_s18] sm:$0xff]  ;;  %v274_v2 = vld [vmem:[%s4456_s18 + $0x8] sm:$0xff]  ;;  %v275_v5 = vld [vmem:[%s4456_s18 + $0x10] sm:$0xff] }
  0x7e   : > { %v529_v3 = vld [vmem:[%s4462_s26] sm:$0xff]  ;;  %v530_v4 = vld [vmem:[%s4462_s26 + $0x8] sm:$0xff]  ;;  %v531_v6 = vld [vmem:[%s4462_s26 + $0x10] sm:$0xff] }
  0x7f   : > { %v785_v7 = vsub.f32 %v273_v1, %v529_v3  ;;  %v786_v8 = vsub.f32 %v274_v2, %v530_v4  ;;  %v276_v9 = vld [vmem:[%s4456_s18 + $0x18] sm:$0xff]  ;;  %v787_v11 = vsub.f32 %v275_v5, %v531_v6  ;;  %v277_v12 = vld [vmem:[%s4456_s18 + $0x20] sm:$0xff]  ;;  %v278_v17 = vld [vmem:[%s4456_s18 + $0x28] sm:$0xff] }
  0x80   : > { %v532_v10 = vld [vmem:[%s4462_s26 + $0x18] sm:$0xff]  ;;  %v533_v13 = vld [vmem:[%s4462_s26 + $0x20] sm:$0xff]  ;;  %v534_v18 = vld [vmem:[%s4462_s26 + $0x28] sm:$0xff] }
  0x81   : > { %v788_v14 = vsub.f32 %v276_v9, %v532_v10  ;;  %v1041_v15 = vmul.f32 %v785_v7, %v785_v7  ;;  %v1042_v16 = vmul.f32 %v786_v8, %v786_v8  ;;  %v789_v19 = vsub.f32 %v277_v12, %v533_v13  ;;  %v279_v21 = vld [vmem:[%s4456_s18 + $0x30] sm:$0xff]  ;;  %v280_v26 = vld [vmem:[%s4456_s18 + $0x38] sm:$0xff]  ;;  %v281_v31 = vld [vmem:[%s4456_s18 + $0x40] sm:$0xff] }
  0x82   : > { %v1043_v20 = vmul.f32 %v787_v11, %v787_v11  ;;  %v535_v22 = vld [vmem:[%s4462_s26 + $0x30] sm:$0xff]  ;;  %v790_v23 = vsub.f32 %v278_v17, %v534_v18  ;;  %v536_v27 = vld [vmem:[%s4462_s26 + $0x38] sm:$0xff]  ;;  %v537_v32 = vld [vmem:[%s4462_s26 + $0x40] sm:$0xff] }
  0x83   : > { %v1044_v24 = vmul.f32 %v788_v14, %v788_v14  ;;  %v1298_v25 = vadd.f32 %v1042_v16, %v1041_v15  ;;  %v791_v28 = vsub.f32 %v279_v21, %v535_v22  ;;  %v1045_v29 = vmul.f32 %v789_v19, %v789_v19  ;;  %v282_v36 = vld [vmem:[%s4456_s18 + $0x48] sm:$0xff]  ;;  %v283_v41 = vld [vmem:[%s4456_s18 + $0x50] sm:$0xff]  ;;  %v284_v46 = vld [vmem:[%s4456_s18 + $0x58] sm:$0xff] }
  0x84   : > { %v792_v33 = vsub.f32 %v280_v26, %v536_v27  ;;  %v1046_v34 = vmul.f32 %v790_v23, %v790_v23  ;;  %v538_v37 = vld [vmem:[%s4462_s26 + $0x48] sm:$0xff]  ;;  %v793_v38 = vsub.f32 %v281_v31, %v537_v32  ;;  %v539_v42 = vld [vmem:[%s4462_s26 + $0x50] sm:$0xff]  ;;  %v540_v47 = vld [vmem:[%s4462_s26 + $0x58] sm:$0xff] }
  0x85   : > { %v1299_v30 = vadd.f32 %v1298_v25, %v1043_v20  ;;  %v1047_v39 = vmul.f32 %v791_v28, %v791_v28  ;;  %v794_v43 = vsub.f32 %v282_v36, %v538_v37  ;;  %v795_v48 = vsub.f32 %v283_v41, %v539_v42  ;;  %v285_v51 = vld [vmem:[%s4456_s18 + $0x60] sm:$0xff]  ;;  %v286_v56 = vld [vmem:[%s4456_s18 + $0x68] sm:$0xff]  ;;  %v287_v61 = vld [vmem:[%s4456_s18 + $0x70] sm:$0xff] }
  0x86   : > { %v1048_v44 = vmul.f32 %v792_v33, %v792_v33  ;;  %v1049_v49 = vmul.f32 %v793_v38, %v793_v38  ;;  %v541_v52 = vld [vmem:[%s4462_s26 + $0x60] sm:$0xff]  ;;  %v796_v53 = vsub.f32 %v284_v46, %v540_v47  ;;  %v542_v57 = vld [vmem:[%s4462_s26 + $0x68] sm:$0xff]  ;;  %v543_v62 = vld [vmem:[%s4462_s26 + $0x70] sm:$0xff] }
  0x87   : > { %v1300_v35 = vadd.f32 %v1299_v30, %v1044_v24  ;;  %v1050_v54 = vmul.f32 %v794_v43, %v794_v43  ;;  %v797_v58 = vsub.f32 %v285_v51, %v541_v52  ;;  %v1051_v59 = vmul.f32 %v795_v48, %v795_v48  ;;  %v288_v2 = vld [vmem:[%s4456_s18 + $0x78] sm:$0xff]  ;;  %v289_v7 = vld [vmem:[%s4456_s18 + $0x80] sm:$0xff]  ;;  %v290_v12 = vld [vmem:[%s4456_s18 + $0x88] sm:$0xff] }
  0x88   : > { %v798_v63 = vsub.f32 %v286_v56, %v542_v57  ;;  %v1052_v0 = vmul.f32 %v796_v53, %v796_v53  ;;  %v544_v3 = vld [vmem:[%s4462_s26 + $0x78] sm:$0xff]  ;;  %v799_v4 = vsub.f32 %v287_v61, %v543_v62  ;;  %v545_v8 = vld [vmem:[%s4462_s26 + $0x80] sm:$0xff]  ;;  %v546_v13 = vld [vmem:[%s4462_s26 + $0x88] sm:$0xff] }
  0x89   : > { %v1301_v40 = vadd.f32 %v1300_v35, %v1045_v29  ;;  %v1053_v5 = vmul.f32 %v797_v58, %v797_v58  ;;  %v800_v9 = vsub.f32 %v288_v2, %v544_v3  ;;  %v801_v14 = vsub.f32 %v289_v7, %v545_v8  ;;  %v291_v17 = vld [vmem:[%s4456_s18 + $0x90] sm:$0xff]  ;;  %v292_v22 = vld [vmem:[%s4456_s18 + $0x98] sm:$0xff]  ;;  %v293_v27 = vld [vmem:[%s4456_s18 + $0xa0] sm:$0xff] }
  0x8a   : > { %v1054_v10 = vmul.f32 %v798_v63, %v798_v63  ;;  %v1055_v15 = vmul.f32 %v799_v4, %v799_v4  ;;  %v547_v18 = vld [vmem:[%s4462_s26 + $0x90] sm:$0xff]  ;;  %v802_v19 = vsub.f32 %v290_v12, %v546_v13  ;;  %v548_v23 = vld [vmem:[%s4462_s26 + $0x98] sm:$0xff]  ;;  %v549_v28 = vld [vmem:[%s4462_s26 + $0xa0] sm:$0xff] }
  0x8b   : > { %v1302_v45 = vadd.f32 %v1301_v40, %v1046_v34  ;;  %v1056_v20 = vmul.f32 %v800_v9, %v800_v9  ;;  %v803_v24 = vsub.f32 %v291_v17, %v547_v18  ;;  %v1057_v25 = vmul.f32 %v801_v14, %v801_v14  ;;  %v294_v32 = vld [vmem:[%s4456_s18 + $0xa8] sm:$0xff]  ;;  %v295_v37 = vld [vmem:[%s4456_s18 + $0xb0] sm:$0xff]  ;;  %v296_v42 = vld [vmem:[%s4456_s18 + $0xb8] sm:$0xff] }
  0x8c   : > { %v804_v29 = vsub.f32 %v292_v22, %v548_v23  ;;  %v1058_v30 = vmul.f32 %v802_v19, %v802_v19  ;;  %v550_v33 = vld [vmem:[%s4462_s26 + $0xa8] sm:$0xff]  ;;  %v805_v34 = vsub.f32 %v293_v27, %v549_v28  ;;  %v551_v38 = vld [vmem:[%s4462_s26 + $0xb0] sm:$0xff]  ;;  %v552_v43 = vld [vmem:[%s4462_s26 + $0xb8] sm:$0xff] }
  0x8d   : > { %v1303_v50 = vadd.f32 %v1302_v45, %v1047_v39  ;;  %v1059_v35 = vmul.f32 %v803_v24, %v803_v24  ;;  %v806_v39 = vsub.f32 %v294_v32, %v550_v33  ;;  %v297_v47 = vld [vmem:[%s4456_s18 + $0xc0] sm:$0xff]  ;;  %v298_v52 = vld [vmem:[%s4456_s18 + $0xc8] sm:$0xff]  ;;  %v299_v57 = vld [vmem:[%s4456_s18 + $0xd0] sm:$0xff] }
  0x8e   : > { %v1060_v40 = vmul.f32 %v804_v29, %v804_v29  ;;  %v1061_v45 = vmul.f32 %v805_v34, %v805_v34  ;;  %v553_v48 = vld [vmem:[%s4462_s26 + $0xc0] sm:$0xff]  ;;  %v554_v53 = vld [vmem:[%s4462_s26 + $0xc8] sm:$0xff]  ;;  %v555_v58 = vld [vmem:[%s4462_s26 + $0xd0] sm:$0xff] }
  0x8f   : > { %v1304_v55 = vadd.f32 %v1303_v50, %v1048_v44  ;;  %v807_v44 = vsub.f32 %v295_v37, %v551_v38  ;;  %v1062_v50 = vmul.f32 %v806_v39, %v806_v39  ;;  %v300_v62 = vld [vmem:[%s4456_s18 + $0xd8] sm:$0xff]  ;;  %v301_v3 = vld [vmem:[%s4456_s18 + $0xe0] sm:$0xff]  ;;  %v302_v8 = vld [vmem:[%s4456_s18 + $0xe8] sm:$0xff] }
  0x90   : > { %v556_v63 = vld [vmem:[%s4462_s26 + $0xd8] sm:$0xff]  ;;  %v557_v4 = vld [vmem:[%s4462_s26 + $0xe0] sm:$0xff]  ;;  %v558_v9 = vld [vmem:[%s4462_s26 + $0xe8] sm:$0xff] }
  0x91   : > { %v1305_v60 = vadd.f32 %v1304_v55, %v1049_v49  ;;  %v808_v49 = vsub.f32 %v296_v42, %v552_v43  ;;  %v1063_v55 = vmul.f32 %v807_v44, %v807_v44  ;;  %v303_v13 = vld [vmem:[%s4456_s18 + $0xf0] sm:$0xff]  ;;  %v304_v18 = vld [vmem:[%s4456_s18 + $0xf8] sm:$0xff]  ;;  %v305_v23 = vld [vmem:[%s4456_s18 + $0x100] sm:$0xff] }
  0x92   : > { %v559_v14 = vld [vmem:[%s4462_s26 + $0xf0] sm:$0xff]  ;;  %v560_v19 = vld [vmem:[%s4462_s26 + $0xf8] sm:$0xff]  ;;  %v561_v24 = vld [vmem:[%s4462_s26 + $0x100] sm:$0xff] }
  0x93   : > { %v1306_v1 = vadd.f32 %v1305_v60, %v1050_v54  ;;  %v809_v54 = vsub.f32 %v297_v47, %v553_v48  ;;  %v1064_v60 = vmul.f32 %v808_v49, %v808_v49  ;;  %v306_v28 = vld [vmem:[%s4456_s18 + $0x108] sm:$0xff]  ;;  %v307_v33 = vld [vmem:[%s4456_s18 + $0x110] sm:$0xff]  ;;  %v308_v38 = vld [vmem:[%s4456_s18 + $0x118] sm:$0xff] }
  0x94   : > { %v562_v29 = vld [vmem:[%s4462_s26 + $0x108] sm:$0xff]  ;;  %v563_v34 = vld [vmem:[%s4462_s26 + $0x110] sm:$0xff]  ;;  %v564_v39 = vld [vmem:[%s4462_s26 + $0x118] sm:$0xff] }
  0x95   : > { %v1307_v6 = vadd.f32 %v1306_v1, %v1051_v59  ;;  %v810_v59 = vsub.f32 %v298_v52, %v554_v53  ;;  %v1065_v1 = vmul.f32 %v809_v54, %v809_v54  ;;  %v309_v43 = vld [vmem:[%s4456_s18 + $0x120] sm:$0xff]  ;;  %v310_v48 = vld [vmem:[%s4456_s18 + $0x128] sm:$0xff]  ;;  %v311_v53 = vld [vmem:[%s4456_s18 + $0x130] sm:$0xff] }
  0x96   : > { %v565_v44 = vld [vmem:[%s4462_s26 + $0x120] sm:$0xff]  ;;  %v566_v49 = vld [vmem:[%s4462_s26 + $0x128] sm:$0xff]  ;;  %v567_v54 = vld [vmem:[%s4462_s26 + $0x130] sm:$0xff] }
  0x97   : > { %v1308_v11 = vadd.f32 %v1307_v6, %v1052_v0  ;;  %v811_v0 = vsub.f32 %v299_v57, %v555_v58  ;;  %v1066_v6 = vmul.f32 %v810_v59, %v810_v59  ;;  %v312_v58 = vld [vmem:[%s4456_s18 + $0x138] sm:$0xff] }
  0x98   : > { %v568_v59 = vld [vmem:[%s4462_s26 + $0x138] sm:$0xff] }
  0x99   : > { %v1309_v16 = vadd.f32 %v1308_v11, %v1053_v5  ;;  %v812_v5 = vsub.f32 %v300_v62, %v556_v63  ;;  %v1067_v11 = vmul.f32 %v811_v0, %v811_v0  ;;  %v313_v63 = vld [vmem:[%s4456_s18 + $0x140] sm:$0xff] }
  0x9a   : > { %v569_v0 = vld [vmem:[%s4462_s26 + $0x140] sm:$0xff] }
  0x9b   : > { %v1310_v21 = vadd.f32 %v1309_v16, %v1054_v10  ;;  %v813_v10 = vsub.f32 %v301_v3, %v557_v4  ;;  %v1068_v16 = vmul.f32 %v812_v5, %v812_v5  ;;  %v314_v4 = vld [vmem:[%s4456_s18 + $0x148] sm:$0xff] }
  0x9c   : > { %v570_v5 = vld [vmem:[%s4462_s26 + $0x148] sm:$0xff] }
  0x9d   : > { %v1311_v26 = vadd.f32 %v1310_v21, %v1055_v15  ;;  %v814_v15 = vsub.f32 %v302_v8, %v558_v9  ;;  %v1069_v21 = vmul.f32 %v813_v10, %v813_v10  ;;  %v315_v9 = vld [vmem:[%s4456_s18 + $0x150] sm:$0xff] }
  0x9e   : > { %v571_v10 = vld [vmem:[%s4462_s26 + $0x150] sm:$0xff] }
  0x9f   : > { %v1312_v31 = vadd.f32 %v1311_v26, %v1056_v20  ;;  %v815_v20 = vsub.f32 %v303_v13, %v559_v14  ;;  %v1070_v26 = vmul.f32 %v814_v15, %v814_v15  ;;  %v316_v14 = vld [vmem:[%s4456_s18 + $0x158] sm:$0xff] }
  0xa0   : > { %v572_v15 = vld [vmem:[%s4462_s26 + $0x158] sm:$0xff] }
  0xa1   : > { %v1313_v36 = vadd.f32 %v1312_v31, %v1057_v25  ;;  %v816_v25 = vsub.f32 %v304_v18, %v560_v19  ;;  %v1071_v31 = vmul.f32 %v815_v20, %v815_v20  ;;  %v317_v19 = vld [vmem:[%s4456_s18 + $0x160] sm:$0xff] }
  0xa2   : > { %v573_v20 = vld [vmem:[%s4462_s26 + $0x160] sm:$0xff] }
  0xa3   : > { %v1314_v41 = vadd.f32 %v1313_v36, %v1058_v30  ;;  %v817_v30 = vsub.f32 %v305_v23, %v561_v24  ;;  %v1072_v36 = vmul.f32 %v816_v25, %v816_v25  ;;  %v318_v24 = vld [vmem:[%s4456_s18 + $0x168] sm:$0xff] }
  0xa4   : > { %v574_v25 = vld [vmem:[%s4462_s26 + $0x168] sm:$0xff] }
  0xa5   : > { %v1315_v46 = vadd.f32 %v1314_v41, %v1059_v35  ;;  %v818_v35 = vsub.f32 %v306_v28, %v562_v29  ;;  %v1073_v41 = vmul.f32 %v817_v30, %v817_v30  ;;  %v319_v29 = vld [vmem:[%s4456_s18 + $0x170] sm:$0xff] }
  0xa6   : > { %v575_v30 = vld [vmem:[%s4462_s26 + $0x170] sm:$0xff] }
  0xa7   : > { %v1316_v51 = vadd.f32 %v1315_v46, %v1060_v40  ;;  %v819_v40 = vsub.f32 %v307_v33, %v563_v34  ;;  %v1074_v46 = vmul.f32 %v818_v35, %v818_v35  ;;  %v320_v34 = vld [vmem:[%s4456_s18 + $0x178] sm:$0xff] }
  0xa8   : > { %v576_v35 = vld [vmem:[%s4462_s26 + $0x178] sm:$0xff] }
  0xa9   : > { %v1317_v56 = vadd.f32 %v1316_v51, %v1061_v45  ;;  %v820_v45 = vsub.f32 %v308_v38, %v564_v39  ;;  %v1075_v51 = vmul.f32 %v819_v40, %v819_v40  ;;  %v321_v39 = vld [vmem:[%s4456_s18 + $0x180] sm:$0xff] }
  0xaa   : > { %v577_v40 = vld [vmem:[%s4462_s26 + $0x180] sm:$0xff] }
  0xab   : > { %v1318_v61 = vadd.f32 %v1317_v56, %v1062_v50  ;;  %v821_v50 = vsub.f32 %v309_v43, %v565_v44  ;;  %v1076_v56 = vmul.f32 %v820_v45, %v820_v45  ;;  %v322_v44 = vld [vmem:[%s4456_s18 + $0x188] sm:$0xff] }
  0xac   : > { %v578_v45 = vld [vmem:[%s4462_s26 + $0x188] sm:$0xff] }
  0xad   : > { %v1319_v2 = vadd.f32 %v1318_v61, %v1063_v55  ;;  %v822_v55 = vsub.f32 %v310_v48, %v566_v49  ;;  %v1077_v61 = vmul.f32 %v821_v50, %v821_v50  ;;  %v323_v49 = vld [vmem:[%s4456_s18 + $0x190] sm:$0xff] }
  0xae   : > { %v579_v50 = vld [vmem:[%s4462_s26 + $0x190] sm:$0xff] }
  0xaf   : > { %v1320_v7 = vadd.f32 %v1319_v2, %v1064_v60  ;;  %v823_v60 = vsub.f32 %v311_v53, %v567_v54  ;;  %v1078_v2 = vmul.f32 %v822_v55, %v822_v55  ;;  %v324_v54 = vld [vmem:[%s4456_s18 + $0x198] sm:$0xff] }
  0xb0   : > { %v580_v55 = vld [vmem:[%s4462_s26 + $0x198] sm:$0xff] }
  0xb1   : > { %v1321_v12 = vadd.f32 %v1320_v7, %v1065_v1  ;;  %v824_v1 = vsub.f32 %v312_v58, %v568_v59  ;;  %v1079_v7 = vmul.f32 %v823_v60, %v823_v60  ;;  %v325_v59 = vld [vmem:[%s4456_s18 + $0x1a0] sm:$0xff] }
  0xb2   : > { %v581_v60 = vld [vmem:[%s4462_s26 + $0x1a0] sm:$0xff] }
  0xb3   : > { %v1322_v17 = vadd.f32 %v1321_v12, %v1066_v6  ;;  %v825_v6 = vsub.f32 %v313_v63, %v569_v0  ;;  %v1080_v12 = vmul.f32 %v824_v1, %v824_v1  ;;  %v326_v0 = vld [vmem:[%s4456_s18 + $0x1a8] sm:$0xff] }
  0xb4   : > { %v582_v1 = vld [vmem:[%s4462_s26 + $0x1a8] sm:$0xff] }
  0xb5   : > { %v1323_v22 = vadd.f32 %v1322_v17, %v1067_v11  ;;  %v826_v11 = vsub.f32 %v314_v4, %v570_v5  ;;  %v1081_v17 = vmul.f32 %v825_v6, %v825_v6  ;;  %v327_v5 = vld [vmem:[%s4456_s18 + $0x1b0] sm:$0xff] }
  0xb6   : > { %v583_v6 = vld [vmem:[%s4462_s26 + $0x1b0] sm:$0xff] }
  0xb7   : > { %v1324_v27 = vadd.f32 %v1323_v22, %v1068_v16  ;;  %v827_v16 = vsub.f32 %v315_v9, %v571_v10  ;;  %v1082_v22 = vmul.f32 %v826_v11, %v826_v11  ;;  %v328_v10 = vld [vmem:[%s4456_s18 + $0x1b8] sm:$0xff] }
  0xb8   : > { %v584_v11 = vld [vmem:[%s4462_s26 + $0x1b8] sm:$0xff] }
  0xb9   : > { %v1325_v32 = vadd.f32 %v1324_v27, %v1069_v21  ;;  %v828_v21 = vsub.f32 %v316_v14, %v572_v15  ;;  %v1083_v27 = vmul.f32 %v827_v16, %v827_v16  ;;  %v329_v15 = vld [vmem:[%s4456_s18 + $0x1c0] sm:$0xff] }
  0xba   : > { %v585_v16 = vld [vmem:[%s4462_s26 + $0x1c0] sm:$0xff] }
  0xbb   : > { %v1326_v37 = vadd.f32 %v1325_v32, %v1070_v26  ;;  %v829_v26 = vsub.f32 %v317_v19, %v573_v20  ;;  %v1084_v32 = vmul.f32 %v828_v21, %v828_v21  ;;  %v330_v20 = vld [vmem:[%s4456_s18 + $0x1c8] sm:$0xff] }
  0xbc   : > { %v586_v21 = vld [vmem:[%s4462_s26 + $0x1c8] sm:$0xff] }
  0xbd   : > { %v1327_v42 = vadd.f32 %v1326_v37, %v1071_v31  ;;  %v830_v31 = vsub.f32 %v318_v24, %v574_v25  ;;  %v1085_v37 = vmul.f32 %v829_v26, %v829_v26  ;;  %v331_v25 = vld [vmem:[%s4456_s18 + $0x1d0] sm:$0xff] }
  0xbe   : > { %v587_v26 = vld [vmem:[%s4462_s26 + $0x1d0] sm:$0xff] }
  0xbf   : > { %v1328_v47 = vadd.f32 %v1327_v42, %v1072_v36  ;;  %v831_v36 = vsub.f32 %v319_v29, %v575_v30  ;;  %v1086_v42 = vmul.f32 %v830_v31, %v830_v31  ;;  %v332_v30 = vld [vmem:[%s4456_s18 + $0x1d8] sm:$0xff] }
  0xc0   : > { %v588_v31 = vld [vmem:[%s4462_s26 + $0x1d8] sm:$0xff] }
  0xc1   : > { %v1329_v52 = vadd.f32 %v1328_v47, %v1073_v41  ;;  %v832_v41 = vsub.f32 %v320_v34, %v576_v35  ;;  %v1087_v47 = vmul.f32 %v831_v36, %v831_v36  ;;  %v333_v35 = vld [vmem:[%s4456_s18 + $0x1e0] sm:$0xff] }
  0xc2   : > { %v589_v36 = vld [vmem:[%s4462_s26 + $0x1e0] sm:$0xff] }
  0xc3   : > { %v1330_v57 = vadd.f32 %v1329_v52, %v1074_v46  ;;  %v833_v46 = vsub.f32 %v321_v39, %v577_v40  ;;  %v1088_v52 = vmul.f32 %v832_v41, %v832_v41  ;;  %v334_v40 = vld [vmem:[%s4456_s18 + $0x1e8] sm:$0xff] }
  0xc4   : > { %v590_v41 = vld [vmem:[%s4462_s26 + $0x1e8] sm:$0xff] }
  0xc5   : > { %v1331_v62 = vadd.f32 %v1330_v57, %v1075_v51  ;;  %v834_v51 = vsub.f32 %v322_v44, %v578_v45  ;;  %v1089_v57 = vmul.f32 %v833_v46, %v833_v46  ;;  %v335_v45 = vld [vmem:[%s4456_s18 + $0x1f0] sm:$0xff] }
  0xc6   : > { %v591_v46 = vld [vmem:[%s4462_s26 + $0x1f0] sm:$0xff] }
  0xc7   : > { %v1332_v3 = vadd.f32 %v1331_v62, %v1076_v56  ;;  %v835_v56 = vsub.f32 %v323_v49, %v579_v50  ;;  %v1090_v62 = vmul.f32 %v834_v51, %v834_v51  ;;  %v336_v50 = vld [vmem:[%s4456_s18 + $0x1f8] sm:$0xff] }
  0xc8   : > { %v592_v51 = vld [vmem:[%s4462_s26 + $0x1f8] sm:$0xff] }
  0xc9   : > { %v1333_v8 = vadd.f32 %v1332_v3, %v1077_v61  ;;  %v836_v61 = vsub.f32 %v324_v54, %v580_v55  ;;  %v1091_v3 = vmul.f32 %v835_v56, %v835_v56  ;;  %v337_v55 = vld [vmem:[%s4456_s18 + $0x200] sm:$0xff] }
  0xca   : > { %v593_v56 = vld [vmem:[%s4462_s26 + $0x200] sm:$0xff] }
  0xcb   : > { %v1334_v13 = vadd.f32 %v1333_v8, %v1078_v2  ;;  %v837_v2 = vsub.f32 %v325_v59, %v581_v60  ;;  %v1092_v8 = vmul.f32 %v836_v61, %v836_v61  ;;  %v338_v60 = vld [vmem:[%s4456_s18 + $0x208] sm:$0xff] }
  0xcc   : > { %v594_v61 = vld [vmem:[%s4462_s26 + $0x208] sm:$0xff] }
  0xcd   : > { %v1335_v18 = vadd.f32 %v1334_v13, %v1079_v7  ;;  %v838_v7 = vsub.f32 %v326_v0, %v582_v1  ;;  %v1093_v13 = vmul.f32 %v837_v2, %v837_v2  ;;  %v339_v1 = vld [vmem:[%s4456_s18 + $0x210] sm:$0xff] }
  0xce   : > { %v595_v2 = vld [vmem:[%s4462_s26 + $0x210] sm:$0xff] }
  0xcf   : > { %v1336_v23 = vadd.f32 %v1335_v18, %v1080_v12  ;;  %v839_v12 = vsub.f32 %v327_v5, %v583_v6  ;;  %v1094_v18 = vmul.f32 %v838_v7, %v838_v7  ;;  %v340_v6 = vld [vmem:[%s4456_s18 + $0x218] sm:$0xff] }
  0xd0   : > { %v596_v7 = vld [vmem:[%s4462_s26 + $0x218] sm:$0xff] }
  0xd1   : > { %v1337_v28 = vadd.f32 %v1336_v23, %v1081_v17  ;;  %v840_v17 = vsub.f32 %v328_v10, %v584_v11  ;;  %v1095_v23 = vmul.f32 %v839_v12, %v839_v12  ;;  %v341_v11 = vld [vmem:[%s4456_s18 + $0x220] sm:$0xff] }
  0xd2   : > { %v597_v12 = vld [vmem:[%s4462_s26 + $0x220] sm:$0xff] }
  0xd3   : > { %v1338_v33 = vadd.f32 %v1337_v28, %v1082_v22  ;;  %v841_v22 = vsub.f32 %v329_v15, %v585_v16  ;;  %v1096_v28 = vmul.f32 %v840_v17, %v840_v17  ;;  %v342_v16 = vld [vmem:[%s4456_s18 + $0x228] sm:$0xff] }
  0xd4   : > { %v598_v17 = vld [vmem:[%s4462_s26 + $0x228] sm:$0xff] }
  0xd5   : > { %v1339_v38 = vadd.f32 %v1338_v33, %v1083_v27  ;;  %v842_v27 = vsub.f32 %v330_v20, %v586_v21  ;;  %v1097_v33 = vmul.f32 %v841_v22, %v841_v22  ;;  %v343_v21 = vld [vmem:[%s4456_s18 + $0x230] sm:$0xff] }
  0xd6   : > { %v599_v22 = vld [vmem:[%s4462_s26 + $0x230] sm:$0xff] }
  0xd7   : > { %v1340_v43 = vadd.f32 %v1339_v38, %v1084_v32  ;;  %v843_v32 = vsub.f32 %v331_v25, %v587_v26  ;;  %v1098_v38 = vmul.f32 %v842_v27, %v842_v27  ;;  %v344_v26 = vld [vmem:[%s4456_s18 + $0x238] sm:$0xff] }
  0xd8   : > { %v600_v27 = vld [vmem:[%s4462_s26 + $0x238] sm:$0xff] }
  0xd9   : > { %v1341_v48 = vadd.f32 %v1340_v43, %v1085_v37  ;;  %v844_v37 = vsub.f32 %v332_v30, %v588_v31  ;;  %v1099_v43 = vmul.f32 %v843_v32, %v843_v32  ;;  %v345_v31 = vld [vmem:[%s4456_s18 + $0x240] sm:$0xff] }
  0xda   : > { %v601_v32 = vld [vmem:[%s4462_s26 + $0x240] sm:$0xff] }
  0xdb   : > { %v1342_v53 = vadd.f32 %v1341_v48, %v1086_v42  ;;  %v845_v42 = vsub.f32 %v333_v35, %v589_v36  ;;  %v1100_v48 = vmul.f32 %v844_v37, %v844_v37  ;;  %v346_v36 = vld [vmem:[%s4456_s18 + $0x248] sm:$0xff] }
  0xdc   : > { %v602_v37 = vld [vmem:[%s4462_s26 + $0x248] sm:$0xff] }
  0xdd   : > { %v1343_v58 = vadd.f32 %v1342_v53, %v1087_v47  ;;  %v846_v47 = vsub.f32 %v334_v40, %v590_v41  ;;  %v1101_v53 = vmul.f32 %v845_v42, %v845_v42  ;;  %v347_v41 = vld [vmem:[%s4456_s18 + $0x250] sm:$0xff] }
  0xde   : > { %v603_v42 = vld [vmem:[%s4462_s26 + $0x250] sm:$0xff] }
  0xdf   : > { %v1344_v63 = vadd.f32 %v1343_v58, %v1088_v52  ;;  %v847_v52 = vsub.f32 %v335_v45, %v591_v46  ;;  %v1102_v58 = vmul.f32 %v846_v47, %v846_v47  ;;  %v348_v46 = vld [vmem:[%s4456_s18 + $0x258] sm:$0xff] }
  0xe0   : > { %v604_v47 = vld [vmem:[%s4462_s26 + $0x258] sm:$0xff] }
  0xe1   : > { %v1345_v4 = vadd.f32 %v1344_v63, %v1089_v57  ;;  %v848_v57 = vsub.f32 %v336_v50, %v592_v51  ;;  %v1103_v63 = vmul.f32 %v847_v52, %v847_v52  ;;  %v349_v51 = vld [vmem:[%s4456_s18 + $0x260] sm:$0xff] }
  0xe2   : > { %v605_v52 = vld [vmem:[%s4462_s26 + $0x260] sm:$0xff] }
  0xe3   : > { %v1346_v9 = vadd.f32 %v1345_v4, %v1090_v62  ;;  %v849_v62 = vsub.f32 %v337_v55, %v593_v56  ;;  %v1104_v4 = vmul.f32 %v848_v57, %v848_v57  ;;  %v350_v56 = vld [vmem:[%s4456_s18 + $0x268] sm:$0xff] }
  0xe4   : > { %v606_v57 = vld [vmem:[%s4462_s26 + $0x268] sm:$0xff] }
  0xe5   : > { %v1347_v14 = vadd.f32 %v1346_v9, %v1091_v3  ;;  %v850_v3 = vsub.f32 %v338_v60, %v594_v61  ;;  %v1105_v9 = vmul.f32 %v849_v62, %v849_v62  ;;  %v351_v61 = vld [vmem:[%s4456_s18 + $0x270] sm:$0xff] }
  0xe6   : > { %v607_v62 = vld [vmem:[%s4462_s26 + $0x270] sm:$0xff] }
  0xe7   : > { %v1348_v19 = vadd.f32 %v1347_v14, %v1092_v8  ;;  %v851_v8 = vsub.f32 %v339_v1, %v595_v2  ;;  %v1106_v14 = vmul.f32 %v850_v3, %v850_v3  ;;  %v352_v2 = vld [vmem:[%s4456_s18 + $0x278] sm:$0xff] }
  0xe8   : > { %v608_v3 = vld [vmem:[%s4462_s26 + $0x278] sm:$0xff] }
  0xe9   : > { %v1349_v24 = vadd.f32 %v1348_v19, %v1093_v13  ;;  %v852_v13 = vsub.f32 %v340_v6, %v596_v7  ;;  %v1107_v19 = vmul.f32 %v851_v8, %v851_v8  ;;  %v353_v7 = vld [vmem:[%s4456_s18 + $0x280] sm:$0xff] }
  0xea   : > { %v609_v8 = vld [vmem:[%s4462_s26 + $0x280] sm:$0xff] }
  0xeb   : > { %v1350_v29 = vadd.f32 %v1349_v24, %v1094_v18  ;;  %v853_v18 = vsub.f32 %v341_v11, %v597_v12  ;;  %v1108_v24 = vmul.f32 %v852_v13, %v852_v13  ;;  %v354_v12 = vld [vmem:[%s4456_s18 + $0x288] sm:$0xff] }
  0xec   : > { %v610_v13 = vld [vmem:[%s4462_s26 + $0x288] sm:$0xff] }
  0xed   : > { %v1351_v34 = vadd.f32 %v1350_v29, %v1095_v23  ;;  %v854_v23 = vsub.f32 %v342_v16, %v598_v17  ;;  %v1109_v29 = vmul.f32 %v853_v18, %v853_v18  ;;  %v355_v17 = vld [vmem:[%s4456_s18 + $0x290] sm:$0xff] }
  0xee   : > { %v611_v18 = vld [vmem:[%s4462_s26 + $0x290] sm:$0xff] }
  0xef   : > { %v1352_v39 = vadd.f32 %v1351_v34, %v1096_v28  ;;  %v855_v28 = vsub.f32 %v343_v21, %v599_v22  ;;  %v1110_v34 = vmul.f32 %v854_v23, %v854_v23  ;;  %v356_v22 = vld [vmem:[%s4456_s18 + $0x298] sm:$0xff] }
  0xf0   : > { %v612_v23 = vld [vmem:[%s4462_s26 + $0x298] sm:$0xff] }
  0xf1   : > { %v1353_v44 = vadd.f32 %v1352_v39, %v1097_v33  ;;  %v856_v33 = vsub.f32 %v344_v26, %v600_v27  ;;  %v1111_v39 = vmul.f32 %v855_v28, %v855_v28  ;;  %v357_v27 = vld [vmem:[%s4456_s18 + $0x2a0] sm:$0xff] }
  0xf2   : > { %v613_v28 = vld [vmem:[%s4462_s26 + $0x2a0] sm:$0xff] }
  0xf3   : > { %v1354_v49 = vadd.f32 %v1353_v44, %v1098_v38  ;;  %v857_v38 = vsub.f32 %v345_v31, %v601_v32  ;;  %v1112_v44 = vmul.f32 %v856_v33, %v856_v33  ;;  %v358_v32 = vld [vmem:[%s4456_s18 + $0x2a8] sm:$0xff] }
  0xf4   : > { %v614_v33 = vld [vmem:[%s4462_s26 + $0x2a8] sm:$0xff] }
  0xf5   : > { %v1355_v54 = vadd.f32 %v1354_v49, %v1099_v43  ;;  %v858_v43 = vsub.f32 %v346_v36, %v602_v37  ;;  %v1113_v49 = vmul.f32 %v857_v38, %v857_v38  ;;  %v359_v37 = vld [vmem:[%s4456_s18 + $0x2b0] sm:$0xff] }
  0xf6   : > { %v615_v38 = vld [vmem:[%s4462_s26 + $0x2b0] sm:$0xff] }
  0xf7   : > { %v1356_v59 = vadd.f32 %v1355_v54, %v1100_v48  ;;  %v859_v48 = vsub.f32 %v347_v41, %v603_v42  ;;  %v1114_v54 = vmul.f32 %v858_v43, %v858_v43  ;;  %v360_v42 = vld [vmem:[%s4456_s18 + $0x2b8] sm:$0xff] }
  0xf8   : > { %v616_v43 = vld [vmem:[%s4462_s26 + $0x2b8] sm:$0xff] }
  0xf9   : > { %v1357_v0 = vadd.f32 %v1356_v59, %v1101_v53  ;;  %v860_v53 = vsub.f32 %v348_v46, %v604_v47  ;;  %v1115_v59 = vmul.f32 %v859_v48, %v859_v48  ;;  %v361_v47 = vld [vmem:[%s4456_s18 + $0x2c0] sm:$0xff] }
  0xfa   : > { %v617_v48 = vld [vmem:[%s4462_s26 + $0x2c0] sm:$0xff] }
  0xfb   : > { %v1358_v5 = vadd.f32 %v1357_v0, %v1102_v58  ;;  %v861_v58 = vsub.f32 %v349_v51, %v605_v52  ;;  %v1116_v0 = vmul.f32 %v860_v53, %v860_v53  ;;  %v362_v52 = vld [vmem:[%s4456_s18 + $0x2c8] sm:$0xff] }
  0xfc   : > { %v618_v53 = vld [vmem:[%s4462_s26 + $0x2c8] sm:$0xff] }
  0xfd   : > { %v1359_v10 = vadd.f32 %v1358_v5, %v1103_v63  ;;  %v862_v63 = vsub.f32 %v350_v56, %v606_v57  ;;  %v1117_v5 = vmul.f32 %v861_v58, %v861_v58  ;;  %v363_v57 = vld [vmem:[%s4456_s18 + $0x2d0] sm:$0xff] }
  0xfe   : > { %v619_v58 = vld [vmem:[%s4462_s26 + $0x2d0] sm:$0xff] }
  0xff   : > { %v1360_v15 = vadd.f32 %v1359_v10, %v1104_v4  ;;  %v863_v4 = vsub.f32 %v351_v61, %v607_v62  ;;  %v1118_v10 = vmul.f32 %v862_v63, %v862_v63  ;;  %v364_v62 = vld [vmem:[%s4456_s18 + $0x2d8] sm:$0xff] }
 0x100   : > { %v620_v63 = vld [vmem:[%s4462_s26 + $0x2d8] sm:$0xff] }
 0x101   : > { %v1361_v20 = vadd.f32 %v1360_v15, %v1105_v9  ;;  %v864_v9 = vsub.f32 %v352_v2, %v608_v3  ;;  %v1119_v15 = vmul.f32 %v863_v4, %v863_v4  ;;  %v365_v3 = vld [vmem:[%s4456_s18 + $0x2e0] sm:$0xff] }
 0x102   : > { %v621_v4 = vld [vmem:[%s4462_s26 + $0x2e0] sm:$0xff] }
 0x103   : > { %v1362_v25 = vadd.f32 %v1361_v20, %v1106_v14  ;;  %v865_v14 = vsub.f32 %v353_v7, %v609_v8  ;;  %v1120_v20 = vmul.f32 %v864_v9, %v864_v9  ;;  %v366_v8 = vld [vmem:[%s4456_s18 + $0x2e8] sm:$0xff] }
 0x104   : > { %v622_v9 = vld [vmem:[%s4462_s26 + $0x2e8] sm:$0xff] }
 0x105   : > { %v1363_v30 = vadd.f32 %v1362_v25, %v1107_v19  ;;  %v866_v19 = vsub.f32 %v354_v12, %v610_v13  ;;  %v1121_v25 = vmul.f32 %v865_v14, %v865_v14  ;;  %v367_v13 = vld [vmem:[%s4456_s18 + $0x2f0] sm:$0xff] }
 0x106   : > { %v623_v14 = vld [vmem:[%s4462_s26 + $0x2f0] sm:$0xff] }
 0x107   : > { %v1364_v35 = vadd.f32 %v1363_v30, %v1108_v24  ;;  %v867_v24 = vsub.f32 %v355_v17, %v611_v18  ;;  %v1122_v30 = vmul.f32 %v866_v19, %v866_v19  ;;  %v368_v18 = vld [vmem:[%s4456_s18 + $0x2f8] sm:$0xff] }
 0x108   : > { %v624_v19 = vld [vmem:[%s4462_s26 + $0x2f8] sm:$0xff] }
 0x109   : > { %v1365_v40 = vadd.f32 %v1364_v35, %v1109_v29  ;;  %v868_v29 = vsub.f32 %v356_v22, %v612_v23  ;;  %v1123_v35 = vmul.f32 %v867_v24, %v867_v24  ;;  %v369_v23 = vld [vmem:[%s4456_s18 + $0x300] sm:$0xff] }
 0x10a   : > { %v625_v24 = vld [vmem:[%s4462_s26 + $0x300] sm:$0xff] }
 0x10b   : > { %v1366_v45 = vadd.f32 %v1365_v40, %v1110_v34  ;;  %v869_v34 = vsub.f32 %v357_v27, %v613_v28  ;;  %v1124_v40 = vmul.f32 %v868_v29, %v868_v29  ;;  %v370_v28 = vld [vmem:[%s4456_s18 + $0x308] sm:$0xff] }
 0x10c   : > { %v626_v29 = vld [vmem:[%s4462_s26 + $0x308] sm:$0xff] }
 0x10d   : > { %v1367_v50 = vadd.f32 %v1366_v45, %v1111_v39  ;;  %v870_v39 = vsub.f32 %v358_v32, %v614_v33  ;;  %v1125_v45 = vmul.f32 %v869_v34, %v869_v34  ;;  %v371_v33 = vld [vmem:[%s4456_s18 + $0x310] sm:$0xff] }
 0x10e   : > { %v627_v34 = vld [vmem:[%s4462_s26 + $0x310] sm:$0xff] }
 0x10f   : > { %v1368_v55 = vadd.f32 %v1367_v50, %v1112_v44  ;;  %v871_v44 = vsub.f32 %v359_v37, %v615_v38  ;;  %v1126_v50 = vmul.f32 %v870_v39, %v870_v39  ;;  %v372_v38 = vld [vmem:[%s4456_s18 + $0x318] sm:$0xff] }
 0x110   : > { %v628_v39 = vld [vmem:[%s4462_s26 + $0x318] sm:$0xff] }
 0x111   : > { %v1369_v60 = vadd.f32 %v1368_v55, %v1113_v49  ;;  %v872_v49 = vsub.f32 %v360_v42, %v616_v43  ;;  %v1127_v55 = vmul.f32 %v871_v44, %v871_v44  ;;  %v373_v43 = vld [vmem:[%s4456_s18 + $0x320] sm:$0xff] }
 0x112   : > { %v629_v44 = vld [vmem:[%s4462_s26 + $0x320] sm:$0xff] }
 0x113   : > { %v1370_v1 = vadd.f32 %v1369_v60, %v1114_v54  ;;  %v873_v54 = vsub.f32 %v361_v47, %v617_v48  ;;  %v1128_v60 = vmul.f32 %v872_v49, %v872_v49  ;;  %v374_v48 = vld [vmem:[%s4456_s18 + $0x328] sm:$0xff] }
 0x114   : > { %v630_v49 = vld [vmem:[%s4462_s26 + $0x328] sm:$0xff] }
 0x115   : > { %v1371_v6 = vadd.f32 %v1370_v1, %v1115_v59  ;;  %v874_v59 = vsub.f32 %v362_v52, %v618_v53  ;;  %v1129_v1 = vmul.f32 %v873_v54, %v873_v54  ;;  %v375_v53 = vld [vmem:[%s4456_s18 + $0x330] sm:$0xff] }
 0x116   : > { %v631_v54 = vld [vmem:[%s4462_s26 + $0x330] sm:$0xff] }
 0x117   : > { %v1372_v11 = vadd.f32 %v1371_v6, %v1116_v0  ;;  %v875_v0 = vsub.f32 %v363_v57, %v619_v58  ;;  %v1130_v6 = vmul.f32 %v874_v59, %v874_v59  ;;  %v376_v58 = vld [vmem:[%s4456_s18 + $0x338] sm:$0xff] }
 0x118   : > { %v632_v59 = vld [vmem:[%s4462_s26 + $0x338] sm:$0xff] }
 0x119   : > { %v1373_v16 = vadd.f32 %v1372_v11, %v1117_v5  ;;  %v876_v5 = vsub.f32 %v364_v62, %v620_v63  ;;  %v1131_v11 = vmul.f32 %v875_v0, %v875_v0  ;;  %v377_v63 = vld [vmem:[%s4456_s18 + $0x340] sm:$0xff] }
 0x11a   : > { %v633_v0 = vld [vmem:[%s4462_s26 + $0x340] sm:$0xff] }
 0x11b   : > { %v1374_v21 = vadd.f32 %v1373_v16, %v1118_v10  ;;  %v877_v10 = vsub.f32 %v365_v3, %v621_v4  ;;  %v1132_v16 = vmul.f32 %v876_v5, %v876_v5  ;;  %v378_v4 = vld [vmem:[%s4456_s18 + $0x348] sm:$0xff] }
 0x11c   : > { %v634_v5 = vld [vmem:[%s4462_s26 + $0x348] sm:$0xff] }
 0x11d   : > { %v1375_v26 = vadd.f32 %v1374_v21, %v1119_v15  ;;  %v878_v15 = vsub.f32 %v366_v8, %v622_v9  ;;  %v1133_v21 = vmul.f32 %v877_v10, %v877_v10  ;;  %v379_v9 = vld [vmem:[%s4456_s18 + $0x350] sm:$0xff] }
 0x11e   : > { %v635_v10 = vld [vmem:[%s4462_s26 + $0x350] sm:$0xff] }
 0x11f   : > { %v1376_v31 = vadd.f32 %v1375_v26, %v1120_v20  ;;  %v879_v20 = vsub.f32 %v367_v13, %v623_v14  ;;  %v1134_v26 = vmul.f32 %v878_v15, %v878_v15  ;;  %v380_v14 = vld [vmem:[%s4456_s18 + $0x358] sm:$0xff] }
 0x120   : > { %v636_v15 = vld [vmem:[%s4462_s26 + $0x358] sm:$0xff] }
 0x121   : > { %v1377_v36 = vadd.f32 %v1376_v31, %v1121_v25  ;;  %v880_v25 = vsub.f32 %v368_v18, %v624_v19  ;;  %v1135_v31 = vmul.f32 %v879_v20, %v879_v20  ;;  %v381_v19 = vld [vmem:[%s4456_s18 + $0x360] sm:$0xff] }
 0x122   : > { %v637_v20 = vld [vmem:[%s4462_s26 + $0x360] sm:$0xff] }
 0x123   : > { %v1378_v41 = vadd.f32 %v1377_v36, %v1122_v30  ;;  %v881_v30 = vsub.f32 %v369_v23, %v625_v24  ;;  %v1136_v36 = vmul.f32 %v880_v25, %v880_v25  ;;  %v382_v24 = vld [vmem:[%s4456_s18 + $0x368] sm:$0xff] }
 0x124   : > { %v638_v25 = vld [vmem:[%s4462_s26 + $0x368] sm:$0xff] }
 0x125   : > { %v1379_v46 = vadd.f32 %v1378_v41, %v1123_v35  ;;  %v882_v35 = vsub.f32 %v370_v28, %v626_v29  ;;  %v1137_v41 = vmul.f32 %v881_v30, %v881_v30  ;;  %v383_v29 = vld [vmem:[%s4456_s18 + $0x370] sm:$0xff] }
 0x126   : > { %v639_v30 = vld [vmem:[%s4462_s26 + $0x370] sm:$0xff] }
 0x127   : > { %v1380_v51 = vadd.f32 %v1379_v46, %v1124_v40  ;;  %v883_v40 = vsub.f32 %v371_v33, %v627_v34  ;;  %v1138_v46 = vmul.f32 %v882_v35, %v882_v35  ;;  %v384_v34 = vld [vmem:[%s4456_s18 + $0x378] sm:$0xff] }
 0x128   : > { %v640_v35 = vld [vmem:[%s4462_s26 + $0x378] sm:$0xff] }
 0x129   : > { %v1381_v56 = vadd.f32 %v1380_v51, %v1125_v45  ;;  %v884_v45 = vsub.f32 %v372_v38, %v628_v39  ;;  %v1139_v51 = vmul.f32 %v883_v40, %v883_v40  ;;  %v385_v39 = vld [vmem:[%s4456_s18 + $0x380] sm:$0xff] }
 0x12a   : > { %v641_v40 = vld [vmem:[%s4462_s26 + $0x380] sm:$0xff] }
 0x12b   : > { %v1382_v61 = vadd.f32 %v1381_v56, %v1126_v50  ;;  %v885_v50 = vsub.f32 %v373_v43, %v629_v44  ;;  %v1140_v56 = vmul.f32 %v884_v45, %v884_v45  ;;  %v386_v44 = vld [vmem:[%s4456_s18 + $0x388] sm:$0xff] }
 0x12c   : > { %v642_v45 = vld [vmem:[%s4462_s26 + $0x388] sm:$0xff] }
 0x12d   : > { %v1383_v2 = vadd.f32 %v1382_v61, %v1127_v55  ;;  %v886_v55 = vsub.f32 %v374_v48, %v630_v49  ;;  %v1141_v61 = vmul.f32 %v885_v50, %v885_v50  ;;  %v387_v49 = vld [vmem:[%s4456_s18 + $0x390] sm:$0xff] }
 0x12e   : > { %v643_v50 = vld [vmem:[%s4462_s26 + $0x390] sm:$0xff] }
 0x12f   : > { %v1384_v7 = vadd.f32 %v1383_v2, %v1128_v60  ;;  %v887_v60 = vsub.f32 %v375_v53, %v631_v54  ;;  %v1142_v2 = vmul.f32 %v886_v55, %v886_v55  ;;  %v388_v54 = vld [vmem:[%s4456_s18 + $0x398] sm:$0xff] }
 0x130   : > { %v644_v55 = vld [vmem:[%s4462_s26 + $0x398] sm:$0xff] }
 0x131   : > { %v1385_v12 = vadd.f32 %v1384_v7, %v1129_v1  ;;  %v888_v1 = vsub.f32 %v376_v58, %v632_v59  ;;  %v1143_v7 = vmul.f32 %v887_v60, %v887_v60  ;;  %v389_v59 = vld [vmem:[%s4456_s18 + $0x3a0] sm:$0xff] }
 0x132   : > { %v645_v60 = vld [vmem:[%s4462_s26 + $0x3a0] sm:$0xff] }
 0x133   : > { %v1386_v17 = vadd.f32 %v1385_v12, %v1130_v6  ;;  %v889_v6 = vsub.f32 %v377_v63, %v633_v0  ;;  %v1144_v12 = vmul.f32 %v888_v1, %v888_v1  ;;  %v390_v0 = vld [vmem:[%s4456_s18 + $0x3a8] sm:$0xff] }
 0x134   : > { %v646_v1 = vld [vmem:[%s4462_s26 + $0x3a8] sm:$0xff] }
 0x135   : > { %v1387_v22 = vadd.f32 %v1386_v17, %v1131_v11  ;;  %v890_v11 = vsub.f32 %v378_v4, %v634_v5  ;;  %v1145_v17 = vmul.f32 %v889_v6, %v889_v6  ;;  %v391_v5 = vld [vmem:[%s4456_s18 + $0x3b0] sm:$0xff] }
 0x136   : > { %v647_v6 = vld [vmem:[%s4462_s26 + $0x3b0] sm:$0xff] }
 0x137   : > { %v1388_v27 = vadd.f32 %v1387_v22, %v1132_v16  ;;  %v891_v16 = vsub.f32 %v379_v9, %v635_v10  ;;  %v1146_v22 = vmul.f32 %v890_v11, %v890_v11  ;;  %v392_v10 = vld [vmem:[%s4456_s18 + $0x3b8] sm:$0xff] }
 0x138   : > { %v648_v11 = vld [vmem:[%s4462_s26 + $0x3b8] sm:$0xff] }
 0x139   : > { %v1389_v32 = vadd.f32 %v1388_v27, %v1133_v21  ;;  %v892_v21 = vsub.f32 %v380_v14, %v636_v15  ;;  %v1147_v27 = vmul.f32 %v891_v16, %v891_v16  ;;  %v393_v15 = vld [vmem:[%s4456_s18 + $0x3c0] sm:$0xff] }
 0x13a   : > { %v649_v16 = vld [vmem:[%s4462_s26 + $0x3c0] sm:$0xff] }
 0x13b   : > { %v1390_v37 = vadd.f32 %v1389_v32, %v1134_v26  ;;  %v893_v26 = vsub.f32 %v381_v19, %v637_v20  ;;  %v1148_v32 = vmul.f32 %v892_v21, %v892_v21  ;;  %v394_v20 = vld [vmem:[%s4456_s18 + $0x3c8] sm:$0xff] }
 0x13c   : > { %v650_v21 = vld [vmem:[%s4462_s26 + $0x3c8] sm:$0xff] }
 0x13d   : > { %v1391_v42 = vadd.f32 %v1390_v37, %v1135_v31  ;;  %v894_v31 = vsub.f32 %v382_v24, %v638_v25  ;;  %v1149_v37 = vmul.f32 %v893_v26, %v893_v26  ;;  %v395_v25 = vld [vmem:[%s4456_s18 + $0x3d0] sm:$0xff] }
 0x13e   : > { %v651_v26 = vld [vmem:[%s4462_s26 + $0x3d0] sm:$0xff] }
 0x13f   : > { %v1392_v47 = vadd.f32 %v1391_v42, %v1136_v36  ;;  %v895_v36 = vsub.f32 %v383_v29, %v639_v30  ;;  %v1150_v42 = vmul.f32 %v894_v31, %v894_v31  ;;  %v396_v30 = vld [vmem:[%s4456_s18 + $0x3d8] sm:$0xff] }
 0x140   : > { %v652_v31 = vld [vmem:[%s4462_s26 + $0x3d8] sm:$0xff] }
 0x141   : > { %v1393_v52 = vadd.f32 %v1392_v47, %v1137_v41  ;;  %v896_v41 = vsub.f32 %v384_v34, %v640_v35  ;;  %v1151_v47 = vmul.f32 %v895_v36, %v895_v36  ;;  %v397_v35 = vld [vmem:[%s4456_s18 + $0x3e0] sm:$0xff] }
 0x142   : > { %v653_v36 = vld [vmem:[%s4462_s26 + $0x3e0] sm:$0xff] }
 0x143   : > { %v1394_v57 = vadd.f32 %v1393_v52, %v1138_v46  ;;  %v897_v46 = vsub.f32 %v385_v39, %v641_v40  ;;  %v1152_v52 = vmul.f32 %v896_v41, %v896_v41  ;;  %v398_v40 = vld [vmem:[%s4456_s18 + $0x3e8] sm:$0xff] }
 0x144   : > { %v654_v41 = vld [vmem:[%s4462_s26 + $0x3e8] sm:$0xff] }
 0x145   : > { %v1395_v62 = vadd.f32 %v1394_v57, %v1139_v51  ;;  %v898_v51 = vsub.f32 %v386_v44, %v642_v45  ;;  %v1153_v57 = vmul.f32 %v897_v46, %v897_v46  ;;  %v399_v45 = vld [vmem:[%s4456_s18 + $0x3f0] sm:$0xff] }
 0x146   : > { %v655_v46 = vld [vmem:[%s4462_s26 + $0x3f0] sm:$0xff] }
 0x147   : > { %v1396_v3 = vadd.f32 %v1395_v62, %v1140_v56  ;;  %v899_v56 = vsub.f32 %v387_v49, %v643_v50  ;;  %v1154_v62 = vmul.f32 %v898_v51, %v898_v51  ;;  %v400_v50 = vld [vmem:[%s4456_s18 + $0x3f8] sm:$0xff] }
 0x148   : > { %v656_v51 = vld [vmem:[%s4462_s26 + $0x3f8] sm:$0xff] }
 0x149   : > { %v1397_v8 = vadd.f32 %v1396_v3, %v1141_v61  ;;  %v900_v61 = vsub.f32 %v388_v54, %v644_v55  ;;  %v1155_v3 = vmul.f32 %v899_v56, %v899_v56  ;;  %v401_v55 = vld [vmem:[%s4456_s18 + $0x400] sm:$0xff] }
 0x14a   : > { %v657_v56 = vld [vmem:[%s4462_s26 + $0x400] sm:$0xff] }
 0x14b   : > { %v1398_v13 = vadd.f32 %v1397_v8, %v1142_v2  ;;  %v901_v2 = vsub.f32 %v389_v59, %v645_v60  ;;  %v1156_v8 = vmul.f32 %v900_v61, %v900_v61  ;;  %v402_v60 = vld [vmem:[%s4456_s18 + $0x408] sm:$0xff] }
 0x14c   : > { %v658_v61 = vld [vmem:[%s4462_s26 + $0x408] sm:$0xff] }
 0x14d   : > { %v1399_v18 = vadd.f32 %v1398_v13, %v1143_v7  ;;  %v902_v7 = vsub.f32 %v390_v0, %v646_v1  ;;  %v1157_v13 = vmul.f32 %v901_v2, %v901_v2  ;;  %v403_v1 = vld [vmem:[%s4456_s18 + $0x410] sm:$0xff] }
 0x14e   : > { %v659_v2 = vld [vmem:[%s4462_s26 + $0x410] sm:$0xff] }
 0x14f   : > { %v1400_v23 = vadd.f32 %v1399_v18, %v1144_v12  ;;  %v903_v12 = vsub.f32 %v391_v5, %v647_v6  ;;  %v1158_v18 = vmul.f32 %v902_v7, %v902_v7  ;;  %v404_v6 = vld [vmem:[%s4456_s18 + $0x418] sm:$0xff] }
 0x150   : > { %v660_v7 = vld [vmem:[%s4462_s26 + $0x418] sm:$0xff] }
 0x151   : > { %v1401_v28 = vadd.f32 %v1400_v23, %v1145_v17  ;;  %v904_v17 = vsub.f32 %v392_v10, %v648_v11  ;;  %v1159_v23 = vmul.f32 %v903_v12, %v903_v12  ;;  %v405_v11 = vld [vmem:[%s4456_s18 + $0x420] sm:$0xff] }
 0x152   : > { %v661_v12 = vld [vmem:[%s4462_s26 + $0x420] sm:$0xff] }
 0x153   : > { %v1402_v33 = vadd.f32 %v1401_v28, %v1146_v22  ;;  %v905_v22 = vsub.f32 %v393_v15, %v649_v16  ;;  %v1160_v28 = vmul.f32 %v904_v17, %v904_v17  ;;  %v406_v16 = vld [vmem:[%s4456_s18 + $0x428] sm:$0xff] }
 0x154   : > { %v662_v17 = vld [vmem:[%s4462_s26 + $0x428] sm:$0xff] }
 0x155   : > { %v1403_v38 = vadd.f32 %v1402_v33, %v1147_v27  ;;  %v906_v27 = vsub.f32 %v394_v20, %v650_v21  ;;  %v1161_v33 = vmul.f32 %v905_v22, %v905_v22  ;;  %v407_v21 = vld [vmem:[%s4456_s18 + $0x430] sm:$0xff] }
 0x156   : > { %v663_v22 = vld [vmem:[%s4462_s26 + $0x430] sm:$0xff] }
 0x157   : > { %v1404_v43 = vadd.f32 %v1403_v38, %v1148_v32  ;;  %v907_v32 = vsub.f32 %v395_v25, %v651_v26  ;;  %v1162_v38 = vmul.f32 %v906_v27, %v906_v27  ;;  %v408_v26 = vld [vmem:[%s4456_s18 + $0x438] sm:$0xff] }
 0x158   : > { %v664_v27 = vld [vmem:[%s4462_s26 + $0x438] sm:$0xff] }
 0x159   : > { %v1405_v48 = vadd.f32 %v1404_v43, %v1149_v37  ;;  %v908_v37 = vsub.f32 %v396_v30, %v652_v31  ;;  %v1163_v43 = vmul.f32 %v907_v32, %v907_v32  ;;  %v409_v31 = vld [vmem:[%s4456_s18 + $0x440] sm:$0xff] }
 0x15a   : > { %v665_v32 = vld [vmem:[%s4462_s26 + $0x440] sm:$0xff] }
 0x15b   : > { %v1406_v53 = vadd.f32 %v1405_v48, %v1150_v42  ;;  %v909_v42 = vsub.f32 %v397_v35, %v653_v36  ;;  %v1164_v48 = vmul.f32 %v908_v37, %v908_v37  ;;  %v410_v36 = vld [vmem:[%s4456_s18 + $0x448] sm:$0xff] }
 0x15c   : > { %v666_v37 = vld [vmem:[%s4462_s26 + $0x448] sm:$0xff] }
 0x15d   : > { %v1407_v58 = vadd.f32 %v1406_v53, %v1151_v47  ;;  %v910_v47 = vsub.f32 %v398_v40, %v654_v41  ;;  %v1165_v53 = vmul.f32 %v909_v42, %v909_v42  ;;  %v411_v41 = vld [vmem:[%s4456_s18 + $0x450] sm:$0xff] }
 0x15e   : > { %v667_v42 = vld [vmem:[%s4462_s26 + $0x450] sm:$0xff] }
 0x15f   : > { %v1408_v63 = vadd.f32 %v1407_v58, %v1152_v52  ;;  %v911_v52 = vsub.f32 %v399_v45, %v655_v46  ;;  %v1166_v58 = vmul.f32 %v910_v47, %v910_v47  ;;  %v412_v46 = vld [vmem:[%s4456_s18 + $0x458] sm:$0xff] }
 0x160   : > { %v668_v47 = vld [vmem:[%s4462_s26 + $0x458] sm:$0xff] }
 0x161   : > { %v1409_v4 = vadd.f32 %v1408_v63, %v1153_v57  ;;  %v912_v57 = vsub.f32 %v400_v50, %v656_v51  ;;  %v1167_v63 = vmul.f32 %v911_v52, %v911_v52  ;;  %v413_v51 = vld [vmem:[%s4456_s18 + $0x460] sm:$0xff] }
 0x162   : > { %v669_v52 = vld [vmem:[%s4462_s26 + $0x460] sm:$0xff] }
 0x163   : > { %v1410_v9 = vadd.f32 %v1409_v4, %v1154_v62  ;;  %v913_v62 = vsub.f32 %v401_v55, %v657_v56  ;;  %v1168_v4 = vmul.f32 %v912_v57, %v912_v57  ;;  %v414_v56 = vld [vmem:[%s4456_s18 + $0x468] sm:$0xff] }
 0x164   : > { %v670_v57 = vld [vmem:[%s4462_s26 + $0x468] sm:$0xff] }
 0x165   : > { %v1411_v14 = vadd.f32 %v1410_v9, %v1155_v3  ;;  %v914_v3 = vsub.f32 %v402_v60, %v658_v61  ;;  %v1169_v9 = vmul.f32 %v913_v62, %v913_v62  ;;  %v415_v61 = vld [vmem:[%s4456_s18 + $0x470] sm:$0xff] }
 0x166   : > { %v671_v62 = vld [vmem:[%s4462_s26 + $0x470] sm:$0xff] }
 0x167   : > { %v1412_v19 = vadd.f32 %v1411_v14, %v1156_v8  ;;  %v915_v8 = vsub.f32 %v403_v1, %v659_v2  ;;  %v1170_v14 = vmul.f32 %v914_v3, %v914_v3  ;;  %v416_v2 = vld [vmem:[%s4456_s18 + $0x478] sm:$0xff] }
 0x168   : > { %v672_v3 = vld [vmem:[%s4462_s26 + $0x478] sm:$0xff] }
 0x169   : > { %v1413_v24 = vadd.f32 %v1412_v19, %v1157_v13  ;;  %v916_v13 = vsub.f32 %v404_v6, %v660_v7  ;;  %v1171_v19 = vmul.f32 %v915_v8, %v915_v8  ;;  %v417_v7 = vld [vmem:[%s4456_s18 + $0x480] sm:$0xff] }
 0x16a   : > { %v673_v8 = vld [vmem:[%s4462_s26 + $0x480] sm:$0xff] }
 0x16b   : > { %v1414_v29 = vadd.f32 %v1413_v24, %v1158_v18  ;;  %v917_v18 = vsub.f32 %v405_v11, %v661_v12  ;;  %v1172_v24 = vmul.f32 %v916_v13, %v916_v13  ;;  %v418_v12 = vld [vmem:[%s4456_s18 + $0x488] sm:$0xff] }
 0x16c   : > { %v674_v13 = vld [vmem:[%s4462_s26 + $0x488] sm:$0xff] }
 0x16d   : > { %v1415_v34 = vadd.f32 %v1414_v29, %v1159_v23  ;;  %v918_v23 = vsub.f32 %v406_v16, %v662_v17  ;;  %v1173_v29 = vmul.f32 %v917_v18, %v917_v18  ;;  %v419_v17 = vld [vmem:[%s4456_s18 + $0x490] sm:$0xff] }
 0x16e   : > { %v675_v18 = vld [vmem:[%s4462_s26 + $0x490] sm:$0xff] }
 0x16f   : > { %v1416_v39 = vadd.f32 %v1415_v34, %v1160_v28  ;;  %v919_v28 = vsub.f32 %v407_v21, %v663_v22  ;;  %v1174_v34 = vmul.f32 %v918_v23, %v918_v23  ;;  %v420_v22 = vld [vmem:[%s4456_s18 + $0x498] sm:$0xff] }
 0x170   : > { %v676_v23 = vld [vmem:[%s4462_s26 + $0x498] sm:$0xff] }
 0x171   : > { %v1417_v44 = vadd.f32 %v1416_v39, %v1161_v33  ;;  %v920_v33 = vsub.f32 %v408_v26, %v664_v27  ;;  %v1175_v39 = vmul.f32 %v919_v28, %v919_v28  ;;  %v421_v27 = vld [vmem:[%s4456_s18 + $0x4a0] sm:$0xff] }
 0x172   : > { %v677_v28 = vld [vmem:[%s4462_s26 + $0x4a0] sm:$0xff] }
 0x173   : > { %v1418_v49 = vadd.f32 %v1417_v44, %v1162_v38  ;;  %v921_v38 = vsub.f32 %v409_v31, %v665_v32  ;;  %v1176_v44 = vmul.f32 %v920_v33, %v920_v33  ;;  %v422_v32 = vld [vmem:[%s4456_s18 + $0x4a8] sm:$0xff] }
 0x174   : > { %v678_v33 = vld [vmem:[%s4462_s26 + $0x4a8] sm:$0xff] }
 0x175   : > { %v1419_v54 = vadd.f32 %v1418_v49, %v1163_v43  ;;  %v922_v43 = vsub.f32 %v410_v36, %v666_v37  ;;  %v1177_v49 = vmul.f32 %v921_v38, %v921_v38  ;;  %v423_v37 = vld [vmem:[%s4456_s18 + $0x4b0] sm:$0xff] }
 0x176   : > { %v679_v38 = vld [vmem:[%s4462_s26 + $0x4b0] sm:$0xff] }
 0x177   : > { %v1420_v59 = vadd.f32 %v1419_v54, %v1164_v48  ;;  %v923_v48 = vsub.f32 %v411_v41, %v667_v42  ;;  %v1178_v54 = vmul.f32 %v922_v43, %v922_v43  ;;  %v424_v42 = vld [vmem:[%s4456_s18 + $0x4b8] sm:$0xff] }
 0x178   : > { %v680_v43 = vld [vmem:[%s4462_s26 + $0x4b8] sm:$0xff] }
 0x179   : > { %v1421_v0 = vadd.f32 %v1420_v59, %v1165_v53  ;;  %v924_v53 = vsub.f32 %v412_v46, %v668_v47  ;;  %v1179_v59 = vmul.f32 %v923_v48, %v923_v48  ;;  %v425_v47 = vld [vmem:[%s4456_s18 + $0x4c0] sm:$0xff] }
 0x17a   : > { %v681_v48 = vld [vmem:[%s4462_s26 + $0x4c0] sm:$0xff] }
 0x17b   : > { %v1422_v5 = vadd.f32 %v1421_v0, %v1166_v58  ;;  %v925_v58 = vsub.f32 %v413_v51, %v669_v52  ;;  %v1180_v0 = vmul.f32 %v924_v53, %v924_v53  ;;  %v426_v52 = vld [vmem:[%s4456_s18 + $0x4c8] sm:$0xff] }
 0x17c   : > { %v682_v53 = vld [vmem:[%s4462_s26 + $0x4c8] sm:$0xff] }
 0x17d   : > { %v1423_v10 = vadd.f32 %v1422_v5, %v1167_v63  ;;  %v926_v63 = vsub.f32 %v414_v56, %v670_v57  ;;  %v1181_v5 = vmul.f32 %v925_v58, %v925_v58  ;;  %v427_v57 = vld [vmem:[%s4456_s18 + $0x4d0] sm:$0xff] }
 0x17e   : > { %v683_v58 = vld [vmem:[%s4462_s26 + $0x4d0] sm:$0xff] }
 0x17f   : > { %v1424_v15 = vadd.f32 %v1423_v10, %v1168_v4  ;;  %v927_v4 = vsub.f32 %v415_v61, %v671_v62  ;;  %v1182_v10 = vmul.f32 %v926_v63, %v926_v63  ;;  %v428_v62 = vld [vmem:[%s4456_s18 + $0x4d8] sm:$0xff] }
 0x180   : > { %v684_v63 = vld [vmem:[%s4462_s26 + $0x4d8] sm:$0xff] }
 0x181   : > { %v1425_v20 = vadd.f32 %v1424_v15, %v1169_v9  ;;  %v928_v9 = vsub.f32 %v416_v2, %v672_v3  ;;  %v1183_v15 = vmul.f32 %v927_v4, %v927_v4  ;;  %v429_v3 = vld [vmem:[%s4456_s18 + $0x4e0] sm:$0xff] }
 0x182   : > { %v685_v4 = vld [vmem:[%s4462_s26 + $0x4e0] sm:$0xff] }
 0x183   : > { %v1426_v25 = vadd.f32 %v1425_v20, %v1170_v14  ;;  %v929_v14 = vsub.f32 %v417_v7, %v673_v8  ;;  %v1184_v20 = vmul.f32 %v928_v9, %v928_v9  ;;  %v430_v8 = vld [vmem:[%s4456_s18 + $0x4e8] sm:$0xff] }
 0x184   : > { %v686_v9 = vld [vmem:[%s4462_s26 + $0x4e8] sm:$0xff] }
 0x185   : > { %v1427_v30 = vadd.f32 %v1426_v25, %v1171_v19  ;;  %v930_v19 = vsub.f32 %v418_v12, %v674_v13  ;;  %v1185_v25 = vmul.f32 %v929_v14, %v929_v14  ;;  %v431_v13 = vld [vmem:[%s4456_s18 + $0x4f0] sm:$0xff] }
 0x186   : > { %v687_v14 = vld [vmem:[%s4462_s26 + $0x4f0] sm:$0xff] }
 0x187   : > { %v1428_v35 = vadd.f32 %v1427_v30, %v1172_v24  ;;  %v931_v24 = vsub.f32 %v419_v17, %v675_v18  ;;  %v1186_v30 = vmul.f32 %v930_v19, %v930_v19  ;;  %v432_v18 = vld [vmem:[%s4456_s18 + $0x4f8] sm:$0xff] }
 0x188   : > { %v688_v19 = vld [vmem:[%s4462_s26 + $0x4f8] sm:$0xff] }
 0x189   : > { %v1429_v40 = vadd.f32 %v1428_v35, %v1173_v29  ;;  %v932_v29 = vsub.f32 %v420_v22, %v676_v23  ;;  %v1187_v35 = vmul.f32 %v931_v24, %v931_v24  ;;  %v433_v23 = vld [vmem:[%s4456_s18 + $0x500] sm:$0xff] }
 0x18a   : > { %v689_v24 = vld [vmem:[%s4462_s26 + $0x500] sm:$0xff] }
 0x18b   : > { %v1430_v45 = vadd.f32 %v1429_v40, %v1174_v34  ;;  %v933_v34 = vsub.f32 %v421_v27, %v677_v28  ;;  %v1188_v40 = vmul.f32 %v932_v29, %v932_v29  ;;  %v434_v28 = vld [vmem:[%s4456_s18 + $0x508] sm:$0xff] }
 0x18c   : > { %v690_v29 = vld [vmem:[%s4462_s26 + $0x508] sm:$0xff] }
 0x18d   : > { %v1431_v50 = vadd.f32 %v1430_v45, %v1175_v39  ;;  %v934_v39 = vsub.f32 %v422_v32, %v678_v33  ;;  %v1189_v45 = vmul.f32 %v933_v34, %v933_v34  ;;  %v435_v33 = vld [vmem:[%s4456_s18 + $0x510] sm:$0xff] }
 0x18e   : > { %v691_v34 = vld [vmem:[%s4462_s26 + $0x510] sm:$0xff] }
 0x18f   : > { %v1432_v55 = vadd.f32 %v1431_v50, %v1176_v44  ;;  %v935_v44 = vsub.f32 %v423_v37, %v679_v38  ;;  %v1190_v50 = vmul.f32 %v934_v39, %v934_v39  ;;  %v436_v38 = vld [vmem:[%s4456_s18 + $0x518] sm:$0xff] }
 0x190   : > { %v692_v39 = vld [vmem:[%s4462_s26 + $0x518] sm:$0xff] }
 0x191   : > { %v1433_v60 = vadd.f32 %v1432_v55, %v1177_v49  ;;  %v936_v49 = vsub.f32 %v424_v42, %v680_v43  ;;  %v1191_v55 = vmul.f32 %v935_v44, %v935_v44  ;;  %v437_v43 = vld [vmem:[%s4456_s18 + $0x520] sm:$0xff] }
 0x192   : > { %v693_v44 = vld [vmem:[%s4462_s26 + $0x520] sm:$0xff] }
 0x193   : > { %v1434_v1 = vadd.f32 %v1433_v60, %v1178_v54  ;;  %v937_v54 = vsub.f32 %v425_v47, %v681_v48  ;;  %v1192_v60 = vmul.f32 %v936_v49, %v936_v49  ;;  %v438_v48 = vld [vmem:[%s4456_s18 + $0x528] sm:$0xff] }
 0x194   : > { %v694_v49 = vld [vmem:[%s4462_s26 + $0x528] sm:$0xff] }
 0x195   : > { %v1435_v6 = vadd.f32 %v1434_v1, %v1179_v59  ;;  %v938_v59 = vsub.f32 %v426_v52, %v682_v53  ;;  %v1193_v1 = vmul.f32 %v937_v54, %v937_v54  ;;  %v439_v53 = vld [vmem:[%s4456_s18 + $0x530] sm:$0xff] }
 0x196   : > { %v695_v54 = vld [vmem:[%s4462_s26 + $0x530] sm:$0xff] }
 0x197   : > { %v1436_v11 = vadd.f32 %v1435_v6, %v1180_v0  ;;  %v939_v0 = vsub.f32 %v427_v57, %v683_v58  ;;  %v1194_v6 = vmul.f32 %v938_v59, %v938_v59  ;;  %v440_v58 = vld [vmem:[%s4456_s18 + $0x538] sm:$0xff] }
 0x198   : > { %v696_v59 = vld [vmem:[%s4462_s26 + $0x538] sm:$0xff] }
 0x199   : > { %v1437_v16 = vadd.f32 %v1436_v11, %v1181_v5  ;;  %v940_v5 = vsub.f32 %v428_v62, %v684_v63  ;;  %v1195_v11 = vmul.f32 %v939_v0, %v939_v0  ;;  %v441_v63 = vld [vmem:[%s4456_s18 + $0x540] sm:$0xff] }
 0x19a   : > { %v697_v0 = vld [vmem:[%s4462_s26 + $0x540] sm:$0xff] }
 0x19b   : > { %v1438_v21 = vadd.f32 %v1437_v16, %v1182_v10  ;;  %v941_v10 = vsub.f32 %v429_v3, %v685_v4  ;;  %v1196_v16 = vmul.f32 %v940_v5, %v940_v5  ;;  %v442_v4 = vld [vmem:[%s4456_s18 + $0x548] sm:$0xff] }
 0x19c   : > { %v698_v5 = vld [vmem:[%s4462_s26 + $0x548] sm:$0xff] }
 0x19d   : > { %v1439_v26 = vadd.f32 %v1438_v21, %v1183_v15  ;;  %v942_v15 = vsub.f32 %v430_v8, %v686_v9  ;;  %v1197_v21 = vmul.f32 %v941_v10, %v941_v10  ;;  %v443_v9 = vld [vmem:[%s4456_s18 + $0x550] sm:$0xff] }
 0x19e   : > { %v699_v10 = vld [vmem:[%s4462_s26 + $0x550] sm:$0xff] }
 0x19f   : > { %v1440_v31 = vadd.f32 %v1439_v26, %v1184_v20  ;;  %v943_v20 = vsub.f32 %v431_v13, %v687_v14  ;;  %v1198_v26 = vmul.f32 %v942_v15, %v942_v15  ;;  %v444_v14 = vld [vmem:[%s4456_s18 + $0x558] sm:$0xff] }
 0x1a0   : > { %v700_v15 = vld [vmem:[%s4462_s26 + $0x558] sm:$0xff] }
 0x1a1   : > { %v1441_v36 = vadd.f32 %v1440_v31, %v1185_v25  ;;  %v944_v25 = vsub.f32 %v432_v18, %v688_v19  ;;  %v1199_v31 = vmul.f32 %v943_v20, %v943_v20  ;;  %v445_v19 = vld [vmem:[%s4456_s18 + $0x560] sm:$0xff] }
 0x1a2   : > { %v701_v20 = vld [vmem:[%s4462_s26 + $0x560] sm:$0xff] }
 0x1a3   : > { %v1442_v41 = vadd.f32 %v1441_v36, %v1186_v30  ;;  %v945_v30 = vsub.f32 %v433_v23, %v689_v24  ;;  %v1200_v36 = vmul.f32 %v944_v25, %v944_v25  ;;  %v446_v24 = vld [vmem:[%s4456_s18 + $0x568] sm:$0xff] }
 0x1a4   : > { %v702_v25 = vld [vmem:[%s4462_s26 + $0x568] sm:$0xff] }
 0x1a5   : > { %v1443_v46 = vadd.f32 %v1442_v41, %v1187_v35  ;;  %v946_v35 = vsub.f32 %v434_v28, %v690_v29  ;;  %v1201_v41 = vmul.f32 %v945_v30, %v945_v30  ;;  %v447_v29 = vld [vmem:[%s4456_s18 + $0x570] sm:$0xff] }
 0x1a6   : > { %v703_v30 = vld [vmem:[%s4462_s26 + $0x570] sm:$0xff] }
 0x1a7   : > { %v1444_v51 = vadd.f32 %v1443_v46, %v1188_v40  ;;  %v947_v40 = vsub.f32 %v435_v33, %v691_v34  ;;  %v1202_v46 = vmul.f32 %v946_v35, %v946_v35  ;;  %v448_v34 = vld [vmem:[%s4456_s18 + $0x578] sm:$0xff] }
 0x1a8   : > { %v704_v35 = vld [vmem:[%s4462_s26 + $0x578] sm:$0xff] }
 0x1a9   : > { %v1445_v56 = vadd.f32 %v1444_v51, %v1189_v45  ;;  %v948_v45 = vsub.f32 %v436_v38, %v692_v39  ;;  %v1203_v51 = vmul.f32 %v947_v40, %v947_v40  ;;  %v449_v39 = vld [vmem:[%s4456_s18 + $0x580] sm:$0xff] }
 0x1aa   : > { %v705_v40 = vld [vmem:[%s4462_s26 + $0x580] sm:$0xff] }
 0x1ab   : > { %v1446_v61 = vadd.f32 %v1445_v56, %v1190_v50  ;;  %v949_v50 = vsub.f32 %v437_v43, %v693_v44  ;;  %v1204_v56 = vmul.f32 %v948_v45, %v948_v45  ;;  %v450_v44 = vld [vmem:[%s4456_s18 + $0x588] sm:$0xff] }
 0x1ac   : > { %v706_v45 = vld [vmem:[%s4462_s26 + $0x588] sm:$0xff] }
 0x1ad   : > { %v1447_v2 = vadd.f32 %v1446_v61, %v1191_v55  ;;  %v950_v55 = vsub.f32 %v438_v48, %v694_v49  ;;  %v1205_v61 = vmul.f32 %v949_v50, %v949_v50  ;;  %v451_v49 = vld [vmem:[%s4456_s18 + $0x590] sm:$0xff] }
 0x1ae   : > { %v707_v50 = vld [vmem:[%s4462_s26 + $0x590] sm:$0xff] }
 0x1af   : > { %v1448_v7 = vadd.f32 %v1447_v2, %v1192_v60  ;;  %v951_v60 = vsub.f32 %v439_v53, %v695_v54  ;;  %v1206_v2 = vmul.f32 %v950_v55, %v950_v55  ;;  %v452_v54 = vld [vmem:[%s4456_s18 + $0x598] sm:$0xff] }
 0x1b0   : > { %v708_v55 = vld [vmem:[%s4462_s26 + $0x598] sm:$0xff] }
 0x1b1   : > { %v1449_v12 = vadd.f32 %v1448_v7, %v1193_v1  ;;  %v952_v1 = vsub.f32 %v440_v58, %v696_v59  ;;  %v1207_v7 = vmul.f32 %v951_v60, %v951_v60  ;;  %v453_v59 = vld [vmem:[%s4456_s18 + $0x5a0] sm:$0xff] }
 0x1b2   : > { %v709_v60 = vld [vmem:[%s4462_s26 + $0x5a0] sm:$0xff] }
 0x1b3   : > { %v1450_v17 = vadd.f32 %v1449_v12, %v1194_v6  ;;  %v953_v6 = vsub.f32 %v441_v63, %v697_v0  ;;  %v1208_v12 = vmul.f32 %v952_v1, %v952_v1  ;;  %v454_v0 = vld [vmem:[%s4456_s18 + $0x5a8] sm:$0xff] }
 0x1b4   : > { %v710_v1 = vld [vmem:[%s4462_s26 + $0x5a8] sm:$0xff] }
 0x1b5   : > { %v1451_v22 = vadd.f32 %v1450_v17, %v1195_v11  ;;  %v954_v11 = vsub.f32 %v442_v4, %v698_v5  ;;  %v1209_v17 = vmul.f32 %v953_v6, %v953_v6  ;;  %v455_v5 = vld [vmem:[%s4456_s18 + $0x5b0] sm:$0xff] }
 0x1b6   : > { %v711_v6 = vld [vmem:[%s4462_s26 + $0x5b0] sm:$0xff] }
 0x1b7   : > { %v1452_v27 = vadd.f32 %v1451_v22, %v1196_v16  ;;  %v955_v16 = vsub.f32 %v443_v9, %v699_v10  ;;  %v1210_v22 = vmul.f32 %v954_v11, %v954_v11  ;;  %v456_v10 = vld [vmem:[%s4456_s18 + $0x5b8] sm:$0xff] }
 0x1b8   : > { %v712_v11 = vld [vmem:[%s4462_s26 + $0x5b8] sm:$0xff] }
 0x1b9   : > { %v1453_v32 = vadd.f32 %v1452_v27, %v1197_v21  ;;  %v956_v21 = vsub.f32 %v444_v14, %v700_v15  ;;  %v1211_v27 = vmul.f32 %v955_v16, %v955_v16  ;;  %v457_v15 = vld [vmem:[%s4456_s18 + $0x5c0] sm:$0xff] }
 0x1ba   : > { %v713_v16 = vld [vmem:[%s4462_s26 + $0x5c0] sm:$0xff] }
 0x1bb   : > { %v1454_v37 = vadd.f32 %v1453_v32, %v1198_v26  ;;  %v957_v26 = vsub.f32 %v445_v19, %v701_v20  ;;  %v1212_v32 = vmul.f32 %v956_v21, %v956_v21  ;;  %v458_v20 = vld [vmem:[%s4456_s18 + $0x5c8] sm:$0xff] }
 0x1bc   : > { %v714_v21 = vld [vmem:[%s4462_s26 + $0x5c8] sm:$0xff] }
 0x1bd   : > { %v1455_v42 = vadd.f32 %v1454_v37, %v1199_v31  ;;  %v958_v31 = vsub.f32 %v446_v24, %v702_v25  ;;  %v1213_v37 = vmul.f32 %v957_v26, %v957_v26  ;;  %v459_v25 = vld [vmem:[%s4456_s18 + $0x5d0] sm:$0xff] }
 0x1be   : > { %v715_v26 = vld [vmem:[%s4462_s26 + $0x5d0] sm:$0xff] }
 0x1bf   : > { %v1456_v47 = vadd.f32 %v1455_v42, %v1200_v36  ;;  %v959_v36 = vsub.f32 %v447_v29, %v703_v30  ;;  %v1214_v42 = vmul.f32 %v958_v31, %v958_v31  ;;  %v460_v30 = vld [vmem:[%s4456_s18 + $0x5d8] sm:$0xff] }
 0x1c0   : > { %v716_v31 = vld [vmem:[%s4462_s26 + $0x5d8] sm:$0xff] }
 0x1c1   : > { %v1457_v52 = vadd.f32 %v1456_v47, %v1201_v41  ;;  %v960_v41 = vsub.f32 %v448_v34, %v704_v35  ;;  %v1215_v47 = vmul.f32 %v959_v36, %v959_v36  ;;  %v461_v35 = vld [vmem:[%s4456_s18 + $0x5e0] sm:$0xff] }
 0x1c2   : > { %v717_v36 = vld [vmem:[%s4462_s26 + $0x5e0] sm:$0xff] }
 0x1c3   : > { %v1458_v57 = vadd.f32 %v1457_v52, %v1202_v46  ;;  %v961_v46 = vsub.f32 %v449_v39, %v705_v40  ;;  %v1216_v52 = vmul.f32 %v960_v41, %v960_v41  ;;  %v462_v40 = vld [vmem:[%s4456_s18 + $0x5e8] sm:$0xff] }
 0x1c4   : > { %v718_v41 = vld [vmem:[%s4462_s26 + $0x5e8] sm:$0xff] }
 0x1c5   : > { %v1459_v62 = vadd.f32 %v1458_v57, %v1203_v51  ;;  %v962_v51 = vsub.f32 %v450_v44, %v706_v45  ;;  %v1217_v57 = vmul.f32 %v961_v46, %v961_v46  ;;  %v463_v45 = vld [vmem:[%s4456_s18 + $0x5f0] sm:$0xff] }
 0x1c6   : > { %v719_v46 = vld [vmem:[%s4462_s26 + $0x5f0] sm:$0xff] }
 0x1c7   : > { %v1460_v3 = vadd.f32 %v1459_v62, %v1204_v56  ;;  %v963_v56 = vsub.f32 %v451_v49, %v707_v50  ;;  %v1218_v62 = vmul.f32 %v962_v51, %v962_v51  ;;  %v464_v50 = vld [vmem:[%s4456_s18 + $0x5f8] sm:$0xff] }
 0x1c8   : > { %v720_v51 = vld [vmem:[%s4462_s26 + $0x5f8] sm:$0xff] }
 0x1c9   : > { %v1461_v8 = vadd.f32 %v1460_v3, %v1205_v61  ;;  %v964_v61 = vsub.f32 %v452_v54, %v708_v55  ;;  %v1219_v3 = vmul.f32 %v963_v56, %v963_v56  ;;  %v465_v55 = vld [vmem:[%s4456_s18 + $0x600] sm:$0xff] }
 0x1ca   : > { %v721_v56 = vld [vmem:[%s4462_s26 + $0x600] sm:$0xff] }
 0x1cb   : > { %v1462_v13 = vadd.f32 %v1461_v8, %v1206_v2  ;;  %v965_v2 = vsub.f32 %v453_v59, %v709_v60  ;;  %v1220_v8 = vmul.f32 %v964_v61, %v964_v61  ;;  %v466_v60 = vld [vmem:[%s4456_s18 + $0x608] sm:$0xff] }
 0x1cc   : > { %v722_v61 = vld [vmem:[%s4462_s26 + $0x608] sm:$0xff] }
 0x1cd   : > { %v1463_v18 = vadd.f32 %v1462_v13, %v1207_v7  ;;  %v966_v7 = vsub.f32 %v454_v0, %v710_v1  ;;  %v1221_v13 = vmul.f32 %v965_v2, %v965_v2  ;;  %v467_v1 = vld [vmem:[%s4456_s18 + $0x610] sm:$0xff] }
 0x1ce   : > { %v723_v2 = vld [vmem:[%s4462_s26 + $0x610] sm:$0xff] }
 0x1cf   : > { %v1464_v23 = vadd.f32 %v1463_v18, %v1208_v12  ;;  %v967_v12 = vsub.f32 %v455_v5, %v711_v6  ;;  %v1222_v18 = vmul.f32 %v966_v7, %v966_v7  ;;  %v468_v6 = vld [vmem:[%s4456_s18 + $0x618] sm:$0xff] }
 0x1d0   : > { %v724_v7 = vld [vmem:[%s4462_s26 + $0x618] sm:$0xff] }
 0x1d1   : > { %v1465_v28 = vadd.f32 %v1464_v23, %v1209_v17  ;;  %v968_v17 = vsub.f32 %v456_v10, %v712_v11  ;;  %v1223_v23 = vmul.f32 %v967_v12, %v967_v12  ;;  %v469_v11 = vld [vmem:[%s4456_s18 + $0x620] sm:$0xff] }
 0x1d2   : > { %v725_v12 = vld [vmem:[%s4462_s26 + $0x620] sm:$0xff] }
 0x1d3   : > { %v1466_v33 = vadd.f32 %v1465_v28, %v1210_v22  ;;  %v969_v22 = vsub.f32 %v457_v15, %v713_v16  ;;  %v1224_v28 = vmul.f32 %v968_v17, %v968_v17  ;;  %v470_v16 = vld [vmem:[%s4456_s18 + $0x628] sm:$0xff] }
 0x1d4   : > { %v726_v17 = vld [vmem:[%s4462_s26 + $0x628] sm:$0xff] }
 0x1d5   : > { %v1467_v38 = vadd.f32 %v1466_v33, %v1211_v27  ;;  %v970_v27 = vsub.f32 %v458_v20, %v714_v21  ;;  %v1225_v33 = vmul.f32 %v969_v22, %v969_v22  ;;  %v471_v21 = vld [vmem:[%s4456_s18 + $0x630] sm:$0xff] }
 0x1d6   : > { %v727_v22 = vld [vmem:[%s4462_s26 + $0x630] sm:$0xff] }
 0x1d7   : > { %v1468_v43 = vadd.f32 %v1467_v38, %v1212_v32  ;;  %v971_v32 = vsub.f32 %v459_v25, %v715_v26  ;;  %v1226_v38 = vmul.f32 %v970_v27, %v970_v27  ;;  %v472_v26 = vld [vmem:[%s4456_s18 + $0x638] sm:$0xff] }
 0x1d8   : > { %v728_v27 = vld [vmem:[%s4462_s26 + $0x638] sm:$0xff] }
 0x1d9   : > { %v1469_v48 = vadd.f32 %v1468_v43, %v1213_v37  ;;  %v972_v37 = vsub.f32 %v460_v30, %v716_v31  ;;  %v1227_v43 = vmul.f32 %v971_v32, %v971_v32  ;;  %v473_v31 = vld [vmem:[%s4456_s18 + $0x640] sm:$0xff] }
 0x1da   : > { %v729_v32 = vld [vmem:[%s4462_s26 + $0x640] sm:$0xff] }
 0x1db   : > { %v1470_v53 = vadd.f32 %v1469_v48, %v1214_v42  ;;  %v973_v42 = vsub.f32 %v461_v35, %v717_v36  ;;  %v1228_v48 = vmul.f32 %v972_v37, %v972_v37  ;;  %v474_v36 = vld [vmem:[%s4456_s18 + $0x648] sm:$0xff] }
 0x1dc   : > { %v730_v37 = vld [vmem:[%s4462_s26 + $0x648] sm:$0xff] }
 0x1dd   : > { %v1471_v58 = vadd.f32 %v1470_v53, %v1215_v47  ;;  %v974_v47 = vsub.f32 %v462_v40, %v718_v41  ;;  %v1229_v53 = vmul.f32 %v973_v42, %v973_v42  ;;  %v475_v41 = vld [vmem:[%s4456_s18 + $0x650] sm:$0xff] }
 0x1de   : > { %v731_v42 = vld [vmem:[%s4462_s26 + $0x650] sm:$0xff] }
 0x1df   : > { %v1472_v63 = vadd.f32 %v1471_v58, %v1216_v52  ;;  %v975_v52 = vsub.f32 %v463_v45, %v719_v46  ;;  %v1230_v58 = vmul.f32 %v974_v47, %v974_v47  ;;  %v476_v46 = vld [vmem:[%s4456_s18 + $0x658] sm:$0xff] }
 0x1e0   : > { %v732_v47 = vld [vmem:[%s4462_s26 + $0x658] sm:$0xff] }
 0x1e1   : > { %v1473_v4 = vadd.f32 %v1472_v63, %v1217_v57  ;;  %v976_v57 = vsub.f32 %v464_v50, %v720_v51  ;;  %v1231_v63 = vmul.f32 %v975_v52, %v975_v52  ;;  %v477_v51 = vld [vmem:[%s4456_s18 + $0x660] sm:$0xff] }
 0x1e2   : > { %v733_v52 = vld [vmem:[%s4462_s26 + $0x660] sm:$0xff] }
 0x1e3   : > { %v1474_v9 = vadd.f32 %v1473_v4, %v1218_v62  ;;  %v977_v62 = vsub.f32 %v465_v55, %v721_v56  ;;  %v1232_v4 = vmul.f32 %v976_v57, %v976_v57  ;;  %v478_v56 = vld [vmem:[%s4456_s18 + $0x668] sm:$0xff] }
 0x1e4   : > { %v734_v57 = vld [vmem:[%s4462_s26 + $0x668] sm:$0xff] }
 0x1e5   : > { %v1475_v14 = vadd.f32 %v1474_v9, %v1219_v3  ;;  %v978_v3 = vsub.f32 %v466_v60, %v722_v61  ;;  %v1233_v9 = vmul.f32 %v977_v62, %v977_v62  ;;  %v479_v61 = vld [vmem:[%s4456_s18 + $0x670] sm:$0xff] }
 0x1e6   : > { %v735_v62 = vld [vmem:[%s4462_s26 + $0x670] sm:$0xff] }
 0x1e7   : > { %v1476_v19 = vadd.f32 %v1475_v14, %v1220_v8  ;;  %v979_v8 = vsub.f32 %v467_v1, %v723_v2  ;;  %v1234_v14 = vmul.f32 %v978_v3, %v978_v3  ;;  %v480_v2 = vld [vmem:[%s4456_s18 + $0x678] sm:$0xff] }
 0x1e8   : > { %v736_v3 = vld [vmem:[%s4462_s26 + $0x678] sm:$0xff] }
 0x1e9   : > { %v1477_v24 = vadd.f32 %v1476_v19, %v1221_v13  ;;  %v980_v13 = vsub.f32 %v468_v6, %v724_v7  ;;  %v1235_v19 = vmul.f32 %v979_v8, %v979_v8  ;;  %v481_v7 = vld [vmem:[%s4456_s18 + $0x680] sm:$0xff] }
 0x1ea   : > { %v737_v8 = vld [vmem:[%s4462_s26 + $0x680] sm:$0xff] }
 0x1eb   : > { %v1478_v29 = vadd.f32 %v1477_v24, %v1222_v18  ;;  %v981_v18 = vsub.f32 %v469_v11, %v725_v12  ;;  %v1236_v24 = vmul.f32 %v980_v13, %v980_v13  ;;  %v482_v12 = vld [vmem:[%s4456_s18 + $0x688] sm:$0xff] }
 0x1ec   : > { %v738_v13 = vld [vmem:[%s4462_s26 + $0x688] sm:$0xff] }
 0x1ed   : > { %v1479_v34 = vadd.f32 %v1478_v29, %v1223_v23  ;;  %v982_v23 = vsub.f32 %v470_v16, %v726_v17  ;;  %v1237_v29 = vmul.f32 %v981_v18, %v981_v18  ;;  %v483_v17 = vld [vmem:[%s4456_s18 + $0x690] sm:$0xff] }
 0x1ee   : > { %v739_v18 = vld [vmem:[%s4462_s26 + $0x690] sm:$0xff] }
 0x1ef   : > { %v1480_v39 = vadd.f32 %v1479_v34, %v1224_v28  ;;  %v983_v28 = vsub.f32 %v471_v21, %v727_v22  ;;  %v1238_v34 = vmul.f32 %v982_v23, %v982_v23  ;;  %v484_v22 = vld [vmem:[%s4456_s18 + $0x698] sm:$0xff] }
 0x1f0   : > { %v740_v23 = vld [vmem:[%s4462_s26 + $0x698] sm:$0xff] }
 0x1f1   : > { %v1481_v44 = vadd.f32 %v1480_v39, %v1225_v33  ;;  %v984_v33 = vsub.f32 %v472_v26, %v728_v27  ;;  %v1239_v39 = vmul.f32 %v983_v28, %v983_v28  ;;  %v485_v27 = vld [vmem:[%s4456_s18 + $0x6a0] sm:$0xff] }
 0x1f2   : > { %v741_v28 = vld [vmem:[%s4462_s26 + $0x6a0] sm:$0xff] }
 0x1f3   : > { %v1482_v49 = vadd.f32 %v1481_v44, %v1226_v38  ;;  %v985_v38 = vsub.f32 %v473_v31, %v729_v32  ;;  %v1240_v44 = vmul.f32 %v984_v33, %v984_v33  ;;  %v486_v32 = vld [vmem:[%s4456_s18 + $0x6a8] sm:$0xff] }
 0x1f4   : > { %v742_v33 = vld [vmem:[%s4462_s26 + $0x6a8] sm:$0xff] }
 0x1f5   : > { %v1483_v54 = vadd.f32 %v1482_v49, %v1227_v43  ;;  %v986_v43 = vsub.f32 %v474_v36, %v730_v37  ;;  %v1241_v49 = vmul.f32 %v985_v38, %v985_v38  ;;  %v487_v37 = vld [vmem:[%s4456_s18 + $0x6b0] sm:$0xff] }
 0x1f6   : > { %v743_v38 = vld [vmem:[%s4462_s26 + $0x6b0] sm:$0xff] }
 0x1f7   : > { %v1484_v59 = vadd.f32 %v1483_v54, %v1228_v48  ;;  %v987_v48 = vsub.f32 %v475_v41, %v731_v42  ;;  %v1242_v54 = vmul.f32 %v986_v43, %v986_v43  ;;  %v488_v42 = vld [vmem:[%s4456_s18 + $0x6b8] sm:$0xff] }
 0x1f8   : > { %v744_v43 = vld [vmem:[%s4462_s26 + $0x6b8] sm:$0xff] }
 0x1f9   : > { %v1485_v0 = vadd.f32 %v1484_v59, %v1229_v53  ;;  %v988_v53 = vsub.f32 %v476_v46, %v732_v47  ;;  %v1243_v59 = vmul.f32 %v987_v48, %v987_v48  ;;  %v489_v47 = vld [vmem:[%s4456_s18 + $0x6c0] sm:$0xff] }
 0x1fa   : > { %v745_v48 = vld [vmem:[%s4462_s26 + $0x6c0] sm:$0xff] }
 0x1fb   : > { %v1486_v5 = vadd.f32 %v1485_v0, %v1230_v58  ;;  %v989_v58 = vsub.f32 %v477_v51, %v733_v52  ;;  %v1244_v0 = vmul.f32 %v988_v53, %v988_v53  ;;  %v490_v52 = vld [vmem:[%s4456_s18 + $0x6c8] sm:$0xff] }
 0x1fc   : > { %v746_v53 = vld [vmem:[%s4462_s26 + $0x6c8] sm:$0xff] }
 0x1fd   : > { %v1487_v10 = vadd.f32 %v1486_v5, %v1231_v63  ;;  %v990_v63 = vsub.f32 %v478_v56, %v734_v57  ;;  %v1245_v5 = vmul.f32 %v989_v58, %v989_v58  ;;  %v491_v57 = vld [vmem:[%s4456_s18 + $0x6d0] sm:$0xff] }
 0x1fe   : > { %v747_v58 = vld [vmem:[%s4462_s26 + $0x6d0] sm:$0xff] }
 0x1ff   : > { %v1488_v15 = vadd.f32 %v1487_v10, %v1232_v4  ;;  %v991_v4 = vsub.f32 %v479_v61, %v735_v62  ;;  %v1246_v10 = vmul.f32 %v990_v63, %v990_v63  ;;  %v492_v62 = vld [vmem:[%s4456_s18 + $0x6d8] sm:$0xff] }
 0x200   : > { %v748_v63 = vld [vmem:[%s4462_s26 + $0x6d8] sm:$0xff] }
 0x201   : > { %v1489_v20 = vadd.f32 %v1488_v15, %v1233_v9  ;;  %v992_v9 = vsub.f32 %v480_v2, %v736_v3  ;;  %v1247_v15 = vmul.f32 %v991_v4, %v991_v4  ;;  %v493_v3 = vld [vmem:[%s4456_s18 + $0x6e0] sm:$0xff] }
 0x202   : > { %v749_v4 = vld [vmem:[%s4462_s26 + $0x6e0] sm:$0xff] }
 0x203   : > { %v1490_v25 = vadd.f32 %v1489_v20, %v1234_v14  ;;  %v993_v14 = vsub.f32 %v481_v7, %v737_v8  ;;  %v1248_v20 = vmul.f32 %v992_v9, %v992_v9  ;;  %v494_v8 = vld [vmem:[%s4456_s18 + $0x6e8] sm:$0xff] }
 0x204   : > { %v750_v9 = vld [vmem:[%s4462_s26 + $0x6e8] sm:$0xff] }
 0x205   : > { %v1491_v30 = vadd.f32 %v1490_v25, %v1235_v19  ;;  %v994_v19 = vsub.f32 %v482_v12, %v738_v13  ;;  %v1249_v25 = vmul.f32 %v993_v14, %v993_v14  ;;  %v495_v13 = vld [vmem:[%s4456_s18 + $0x6f0] sm:$0xff] }
 0x206   : > { %v751_v14 = vld [vmem:[%s4462_s26 + $0x6f0] sm:$0xff] }
 0x207   : > { %v1492_v35 = vadd.f32 %v1491_v30, %v1236_v24  ;;  %v995_v24 = vsub.f32 %v483_v17, %v739_v18  ;;  %v1250_v30 = vmul.f32 %v994_v19, %v994_v19  ;;  %v496_v18 = vld [vmem:[%s4456_s18 + $0x6f8] sm:$0xff] }
 0x208   : > { %v752_v19 = vld [vmem:[%s4462_s26 + $0x6f8] sm:$0xff] }
 0x209   : > { %v1493_v40 = vadd.f32 %v1492_v35, %v1237_v29  ;;  %v996_v29 = vsub.f32 %v484_v22, %v740_v23  ;;  %v1251_v35 = vmul.f32 %v995_v24, %v995_v24  ;;  %v497_v23 = vld [vmem:[%s4456_s18 + $0x700] sm:$0xff] }
 0x20a   : > { %v753_v24 = vld [vmem:[%s4462_s26 + $0x700] sm:$0xff] }
 0x20b   : > { %v1494_v45 = vadd.f32 %v1493_v40, %v1238_v34  ;;  %v997_v34 = vsub.f32 %v485_v27, %v741_v28  ;;  %v1252_v40 = vmul.f32 %v996_v29, %v996_v29  ;;  %v498_v28 = vld [vmem:[%s4456_s18 + $0x708] sm:$0xff] }
 0x20c   : > { %v754_v29 = vld [vmem:[%s4462_s26 + $0x708] sm:$0xff] }
 0x20d   : > { %v1495_v50 = vadd.f32 %v1494_v45, %v1239_v39  ;;  %v998_v39 = vsub.f32 %v486_v32, %v742_v33  ;;  %v1253_v45 = vmul.f32 %v997_v34, %v997_v34  ;;  %v499_v33 = vld [vmem:[%s4456_s18 + $0x710] sm:$0xff] }
 0x20e   : > { %v755_v34 = vld [vmem:[%s4462_s26 + $0x710] sm:$0xff] }
 0x20f   : > { %v1496_v55 = vadd.f32 %v1495_v50, %v1240_v44  ;;  %v999_v44 = vsub.f32 %v487_v37, %v743_v38  ;;  %v1254_v50 = vmul.f32 %v998_v39, %v998_v39  ;;  %v500_v38 = vld [vmem:[%s4456_s18 + $0x718] sm:$0xff] }
 0x210   : > { %v756_v39 = vld [vmem:[%s4462_s26 + $0x718] sm:$0xff] }
 0x211   : > { %v1497_v60 = vadd.f32 %v1496_v55, %v1241_v49  ;;  %v1000_v49 = vsub.f32 %v488_v42, %v744_v43  ;;  %v1255_v55 = vmul.f32 %v999_v44, %v999_v44  ;;  %v501_v43 = vld [vmem:[%s4456_s18 + $0x720] sm:$0xff] }
 0x212   : > { %v757_v44 = vld [vmem:[%s4462_s26 + $0x720] sm:$0xff] }
 0x213   : > { %v1498_v1 = vadd.f32 %v1497_v60, %v1242_v54  ;;  %v1001_v54 = vsub.f32 %v489_v47, %v745_v48  ;;  %v1256_v60 = vmul.f32 %v1000_v49, %v1000_v49  ;;  %v502_v48 = vld [vmem:[%s4456_s18 + $0x728] sm:$0xff] }
 0x214   : > { %v758_v49 = vld [vmem:[%s4462_s26 + $0x728] sm:$0xff] }
 0x215   : > { %v1499_v6 = vadd.f32 %v1498_v1, %v1243_v59  ;;  %v1002_v59 = vsub.f32 %v490_v52, %v746_v53  ;;  %v1257_v1 = vmul.f32 %v1001_v54, %v1001_v54  ;;  %v503_v53 = vld [vmem:[%s4456_s18 + $0x730] sm:$0xff] }
 0x216   : > { %v759_v54 = vld [vmem:[%s4462_s26 + $0x730] sm:$0xff] }
 0x217   : > { %v1500_v11 = vadd.f32 %v1499_v6, %v1244_v0  ;;  %v1003_v0 = vsub.f32 %v491_v57, %v747_v58  ;;  %v1258_v6 = vmul.f32 %v1002_v59, %v1002_v59  ;;  %v504_v58 = vld [vmem:[%s4456_s18 + $0x738] sm:$0xff] }
 0x218   : > { %v760_v59 = vld [vmem:[%s4462_s26 + $0x738] sm:$0xff] }
 0x219   : > { %v1501_v16 = vadd.f32 %v1500_v11, %v1245_v5  ;;  %v1004_v5 = vsub.f32 %v492_v62, %v748_v63  ;;  %v1259_v11 = vmul.f32 %v1003_v0, %v1003_v0  ;;  %v505_v63 = vld [vmem:[%s4456_s18 + $0x740] sm:$0xff] }
 0x21a   : > { %v761_v0 = vld [vmem:[%s4462_s26 + $0x740] sm:$0xff] }
 0x21b   : > { %v1502_v21 = vadd.f32 %v1501_v16, %v1246_v10  ;;  %v1005_v10 = vsub.f32 %v493_v3, %v749_v4  ;;  %v1260_v16 = vmul.f32 %v1004_v5, %v1004_v5  ;;  %v506_v4 = vld [vmem:[%s4456_s18 + $0x748] sm:$0xff] }
 0x21c   : > { %v762_v5 = vld [vmem:[%s4462_s26 + $0x748] sm:$0xff] }
 0x21d   : > { %v1503_v26 = vadd.f32 %v1502_v21, %v1247_v15  ;;  %v1006_v15 = vsub.f32 %v494_v8, %v750_v9  ;;  %v1261_v21 = vmul.f32 %v1005_v10, %v1005_v10  ;;  %v507_v9 = vld [vmem:[%s4456_s18 + $0x750] sm:$0xff] }
 0x21e   : > { %v763_v10 = vld [vmem:[%s4462_s26 + $0x750] sm:$0xff] }
 0x21f   : > { %v1504_v31 = vadd.f32 %v1503_v26, %v1248_v20  ;;  %v1007_v20 = vsub.f32 %v495_v13, %v751_v14  ;;  %v1262_v26 = vmul.f32 %v1006_v15, %v1006_v15  ;;  %v508_v14 = vld [vmem:[%s4456_s18 + $0x758] sm:$0xff] }
 0x220   : > { %v764_v15 = vld [vmem:[%s4462_s26 + $0x758] sm:$0xff] }
 0x221   : > { %v1505_v36 = vadd.f32 %v1504_v31, %v1249_v25  ;;  %v1008_v25 = vsub.f32 %v496_v18, %v752_v19  ;;  %v1263_v31 = vmul.f32 %v1007_v20, %v1007_v20  ;;  %v509_v19 = vld [vmem:[%s4456_s18 + $0x760] sm:$0xff] }
 0x222   : > { %v765_v20 = vld [vmem:[%s4462_s26 + $0x760] sm:$0xff] }
 0x223   : > { %v1506_v41 = vadd.f32 %v1505_v36, %v1250_v30  ;;  %v1009_v30 = vsub.f32 %v497_v23, %v753_v24  ;;  %v1264_v36 = vmul.f32 %v1008_v25, %v1008_v25  ;;  %v510_v24 = vld [vmem:[%s4456_s18 + $0x768] sm:$0xff] }
 0x224   : > { %v766_v25 = vld [vmem:[%s4462_s26 + $0x768] sm:$0xff] }
 0x225   : > { %v1507_v46 = vadd.f32 %v1506_v41, %v1251_v35  ;;  %v1010_v35 = vsub.f32 %v498_v28, %v754_v29  ;;  %v1265_v41 = vmul.f32 %v1009_v30, %v1009_v30  ;;  %v511_v29 = vld [vmem:[%s4456_s18 + $0x770] sm:$0xff] }
 0x226   : > { %v767_v30 = vld [vmem:[%s4462_s26 + $0x770] sm:$0xff] }
 0x227   : > { %v1508_v51 = vadd.f32 %v1507_v46, %v1252_v40  ;;  %v1011_v40 = vsub.f32 %v499_v33, %v755_v34  ;;  %v1266_v46 = vmul.f32 %v1010_v35, %v1010_v35  ;;  %v512_v34 = vld [vmem:[%s4456_s18 + $0x778] sm:$0xff] }
 0x228   : > { %v768_v35 = vld [vmem:[%s4462_s26 + $0x778] sm:$0xff] }
 0x229   : > { %v1509_v56 = vadd.f32 %v1508_v51, %v1253_v45  ;;  %v1012_v45 = vsub.f32 %v500_v38, %v756_v39  ;;  %v1267_v51 = vmul.f32 %v1011_v40, %v1011_v40  ;;  %v513_v39 = vld [vmem:[%s4456_s18 + $0x780] sm:$0xff] }
 0x22a   : > { %v769_v40 = vld [vmem:[%s4462_s26 + $0x780] sm:$0xff] }
 0x22b   : > { %v1510_v61 = vadd.f32 %v1509_v56, %v1254_v50  ;;  %v1013_v50 = vsub.f32 %v501_v43, %v757_v44  ;;  %v1268_v56 = vmul.f32 %v1012_v45, %v1012_v45  ;;  %v514_v44 = vld [vmem:[%s4456_s18 + $0x788] sm:$0xff] }
 0x22c   : > { %v770_v45 = vld [vmem:[%s4462_s26 + $0x788] sm:$0xff] }
 0x22d   : > { %v1511_v2 = vadd.f32 %v1510_v61, %v1255_v55  ;;  %v1014_v55 = vsub.f32 %v502_v48, %v758_v49  ;;  %v1269_v61 = vmul.f32 %v1013_v50, %v1013_v50  ;;  %v515_v49 = vld [vmem:[%s4456_s18 + $0x790] sm:$0xff] }
 0x22e   : > { %v771_v50 = vld [vmem:[%s4462_s26 + $0x790] sm:$0xff] }
 0x22f   : > { %v1512_v7 = vadd.f32 %v1511_v2, %v1256_v60  ;;  %v1015_v60 = vsub.f32 %v503_v53, %v759_v54  ;;  %v1270_v2 = vmul.f32 %v1014_v55, %v1014_v55  ;;  %v516_v54 = vld [vmem:[%s4456_s18 + $0x798] sm:$0xff] }
 0x230   : > { %v772_v55 = vld [vmem:[%s4462_s26 + $0x798] sm:$0xff] }
 0x231   : > { %v1513_v12 = vadd.f32 %v1512_v7, %v1257_v1  ;;  %v1016_v1 = vsub.f32 %v504_v58, %v760_v59  ;;  %v1271_v7 = vmul.f32 %v1015_v60, %v1015_v60  ;;  %v517_v59 = vld [vmem:[%s4456_s18 + $0x7a0] sm:$0xff] }
 0x232   : > { %v773_v60 = vld [vmem:[%s4462_s26 + $0x7a0] sm:$0xff] }
 0x233   : > { %v1514_v17 = vadd.f32 %v1513_v12, %v1258_v6  ;;  %v1017_v6 = vsub.f32 %v505_v63, %v761_v0  ;;  %v1272_v12 = vmul.f32 %v1016_v1, %v1016_v1  ;;  %v518_v0 = vld [vmem:[%s4456_s18 + $0x7a8] sm:$0xff] }
 0x234   : > { %v774_v1 = vld [vmem:[%s4462_s26 + $0x7a8] sm:$0xff] }
 0x235   : > { %v1515_v22 = vadd.f32 %v1514_v17, %v1259_v11  ;;  %v1018_v11 = vsub.f32 %v506_v4, %v762_v5  ;;  %v1273_v17 = vmul.f32 %v1017_v6, %v1017_v6  ;;  %v519_v5 = vld [vmem:[%s4456_s18 + $0x7b0] sm:$0xff] }
 0x236   : > { %v775_v6 = vld [vmem:[%s4462_s26 + $0x7b0] sm:$0xff] }
 0x237   : > { %v1516_v27 = vadd.f32 %v1515_v22, %v1260_v16  ;;  %v1019_v16 = vsub.f32 %v507_v9, %v763_v10  ;;  %v1274_v22 = vmul.f32 %v1018_v11, %v1018_v11  ;;  %v520_v10 = vld [vmem:[%s4456_s18 + $0x7b8] sm:$0xff] }
 0x238   : > { %v776_v11 = vld [vmem:[%s4462_s26 + $0x7b8] sm:$0xff] }
 0x239   : > { %v1517_v32 = vadd.f32 %v1516_v27, %v1261_v21  ;;  %v1020_v21 = vsub.f32 %v508_v14, %v764_v15  ;;  %v1275_v27 = vmul.f32 %v1019_v16, %v1019_v16  ;;  %v521_v15 = vld [vmem:[%s4456_s18 + $0x7c0] sm:$0xff] }
 0x23a   : > { %v777_v16 = vld [vmem:[%s4462_s26 + $0x7c0] sm:$0xff] }
 0x23b   : > { %v1518_v37 = vadd.f32 %v1517_v32, %v1262_v26  ;;  %v1021_v26 = vsub.f32 %v509_v19, %v765_v20  ;;  %v1276_v32 = vmul.f32 %v1020_v21, %v1020_v21  ;;  %v522_v20 = vld [vmem:[%s4456_s18 + $0x7c8] sm:$0xff] }
 0x23c   : > { %v778_v21 = vld [vmem:[%s4462_s26 + $0x7c8] sm:$0xff] }
 0x23d   : > { %v1519_v42 = vadd.f32 %v1518_v37, %v1263_v31  ;;  %v1022_v31 = vsub.f32 %v510_v24, %v766_v25  ;;  %v1277_v37 = vmul.f32 %v1021_v26, %v1021_v26  ;;  %v523_v25 = vld [vmem:[%s4456_s18 + $0x7d0] sm:$0xff] }
 0x23e   : > { %v779_v26 = vld [vmem:[%s4462_s26 + $0x7d0] sm:$0xff] }
 0x23f   : > { %v1520_v47 = vadd.f32 %v1519_v42, %v1264_v36  ;;  %v1023_v36 = vsub.f32 %v511_v29, %v767_v30  ;;  %v1278_v42 = vmul.f32 %v1022_v31, %v1022_v31  ;;  %v524_v30 = vld [vmem:[%s4456_s18 + $0x7d8] sm:$0xff] }
 0x240   : > { %v780_v31 = vld [vmem:[%s4462_s26 + $0x7d8] sm:$0xff] }
 0x241   : > { %v1521_v52 = vadd.f32 %v1520_v47, %v1265_v41  ;;  %v1024_v41 = vsub.f32 %v512_v34, %v768_v35  ;;  %v1279_v47 = vmul.f32 %v1023_v36, %v1023_v36  ;;  %v525_v35 = vld [vmem:[%s4456_s18 + $0x7e0] sm:$0xff] }
 0x242   : > { %v781_v36 = vld [vmem:[%s4462_s26 + $0x7e0] sm:$0xff] }
 0x243   : > { %v1522_v57 = vadd.f32 %v1521_v52, %v1266_v46  ;;  %v1025_v46 = vsub.f32 %v513_v39, %v769_v40  ;;  %v1280_v52 = vmul.f32 %v1024_v41, %v1024_v41  ;;  %v526_v40 = vld [vmem:[%s4456_s18 + $0x7e8] sm:$0xff] }
 0x244   : > { %v782_v41 = vld [vmem:[%s4462_s26 + $0x7e8] sm:$0xff] }
 0x245   : > { %v1523_v62 = vadd.f32 %v1522_v57, %v1267_v51  ;;  %v1026_v51 = vsub.f32 %v514_v44, %v770_v45  ;;  %v1281_v57 = vmul.f32 %v1025_v46, %v1025_v46  ;;  %v527_v45 = vld [vmem:[%s4456_s18 + $0x7f0] sm:$0xff] }
 0x246   : > { %v783_v46 = vld [vmem:[%s4462_s26 + $0x7f0] sm:$0xff] }
 0x247   : > { %v1524_v3 = vadd.f32 %v1523_v62, %v1268_v56  ;;  %v1027_v56 = vsub.f32 %v515_v49, %v771_v50  ;;  %v1282_v62 = vmul.f32 %v1026_v51, %v1026_v51  ;;  %v528_v50 = vld [vmem:[%s4456_s18 + $0x7f8] sm:$0xff] }
 0x248   : > { %v784_v51 = vld [vmem:[%s4462_s26 + $0x7f8] sm:$0xff] }
 0x249   : > { %v1525_v8 = vadd.f32 %v1524_v3, %v1269_v61  ;;  %v1028_v61 = vsub.f32 %v516_v54, %v772_v55  ;;  %v1283_v3 = vmul.f32 %v1027_v56, %v1027_v56  ;;  %v1040_v55 = vsub.f32 %v528_v50, %v784_v51 }
 0x24b   : > { %v1526_v13 = vadd.f32 %v1525_v8, %v1270_v2  ;;  %v1029_v2 = vsub.f32 %v517_v59, %v773_v60  ;;  %v1284_v8 = vmul.f32 %v1028_v61, %v1028_v61  ;;  %v1296_v60 = vmul.f32 %v1040_v55, %v1040_v55 }
 0x24d   : > { %v1527_v18 = vadd.f32 %v1526_v13, %v1271_v7  ;;  %v1030_v7 = vsub.f32 %v518_v0, %v774_v1  ;;  %v1285_v13 = vmul.f32 %v1029_v2, %v1029_v2 }
 0x24f   : > { %v1528_v23 = vadd.f32 %v1527_v18, %v1272_v12  ;;  %v1031_v12 = vsub.f32 %v519_v5, %v775_v6  ;;  %v1286_v18 = vmul.f32 %v1030_v7, %v1030_v7 }
 0x251   : > { %v1529_v28 = vadd.f32 %v1528_v23, %v1273_v17  ;;  %v1032_v17 = vsub.f32 %v520_v10, %v776_v11  ;;  %v1287_v23 = vmul.f32 %v1031_v12, %v1031_v12 }
 0x253   : > { %v1530_v33 = vadd.f32 %v1529_v28, %v1274_v22  ;;  %v1033_v22 = vsub.f32 %v521_v15, %v777_v16  ;;  %v1288_v28 = vmul.f32 %v1032_v17, %v1032_v17 }
 0x255   : > { %v1531_v38 = vadd.f32 %v1530_v33, %v1275_v27  ;;  %v1034_v27 = vsub.f32 %v522_v20, %v778_v21  ;;  %v1289_v33 = vmul.f32 %v1033_v22, %v1033_v22 }
 0x257   : > { %v1532_v43 = vadd.f32 %v1531_v38, %v1276_v32  ;;  %v1035_v32 = vsub.f32 %v523_v25, %v779_v26  ;;  %v1290_v38 = vmul.f32 %v1034_v27, %v1034_v27 }
 0x259   : > { %v1533_v48 = vadd.f32 %v1532_v43, %v1277_v37  ;;  %v1036_v37 = vsub.f32 %v524_v30, %v780_v31  ;;  %v1291_v43 = vmul.f32 %v1035_v32, %v1035_v32 }
 0x25b   : > { %v1534_v53 = vadd.f32 %v1533_v48, %v1278_v42  ;;  %v1037_v42 = vsub.f32 %v525_v35, %v781_v36  ;;  %v1292_v48 = vmul.f32 %v1036_v37, %v1036_v37 }
 0x25d   : > { %v1535_v58 = vadd.f32 %v1534_v53, %v1279_v47  ;;  %v1038_v47 = vsub.f32 %v526_v40, %v782_v41  ;;  %v1293_v53 = vmul.f32 %v1037_v42, %v1037_v42 }
 0x25f   : > { %v1536_v63 = vadd.f32 %v1535_v58, %v1280_v52  ;;  %v1039_v52 = vsub.f32 %v527_v45, %v783_v46  ;;  %v1294_v56 = vmul.f32 %v1038_v47, %v1038_v47 }
 0x261   : > { %v1537_v4 = vadd.f32 %v1536_v63, %v1281_v57  ;;  %v1295_v58 = vmul.f32 %v1039_v52, %v1039_v52  ;;  %v1297_v63 = vld [vmem:[%s4476_s24] sm:$0xff] }
 0x263   : > { %v1538_v9 = vadd.f32 %v1537_v4, %v1282_v62 }
 0x265   : > { %v1539_v14 = vadd.f32 %v1538_v9, %v1283_v3 }
 0x267   : > { %v1540_v19 = vadd.f32 %v1539_v14, %v1284_v8 }
 0x269   : > { %v1541_v24 = vadd.f32 %v1540_v19, %v1285_v13 }
 0x26b   : > { %v1542_v29 = vadd.f32 %v1541_v24, %v1286_v18 }
 0x26d   : > { %v1543_v34 = vadd.f32 %v1542_v29, %v1287_v23 }
 0x26f   : > { %v1544_v39 = vadd.f32 %v1543_v34, %v1288_v28 }
 0x271   : > { %v1545_v44 = vadd.f32 %v1544_v39, %v1289_v33 }
 0x273   : > { %v1546_v49 = vadd.f32 %v1545_v44, %v1290_v38 }
 0x275   : > { %v1547_v54 = vadd.f32 %v1546_v49, %v1291_v43 }
 0x277   : > { %v1548_v57 = vadd.f32 %v1547_v54, %v1292_v48 }
 0x279   : > { %v1549_v59 = vadd.f32 %v1548_v57, %v1293_v53 }
 0x27b   : > { %v1550_v61 = vadd.f32 %v1549_v59, %v1294_v56 }
 0x27d   : > { %v1551_v62 = vadd.f32 %v1550_v61, %v1295_v58 }
 0x27f   : > { %v1552_v0 = vadd.f32 %v1551_v62, %v1296_v60 }
 0x281   : > { %v1553_v1 = vadd.f32 %v1552_v0, %v1297_v63 }
 0x283   : > { %1554 = vst [vmem:[%s4476_s24] sm:$0xff] %v1553_v1 }
 0x284 PF: > { %p4005_p8 = scmp.le.s32.totalorder %s4474_s22, 2062 }
 0x286   : > { %1557 = sbr.rel (%p4005_p8) target bundleno = 1177 (0x499), region = 48 }
 0x28b   : > { %v2326_v2 = vlaneseq  ;;  %v5000_v5 = vstv %s4003_s5  ;;  %v1558_v7 = vld [vmem:[%s4456_s18] sm:$0xff]  ;;  %v1559_v8 = vld [vmem:[%s4456_s18 + $0x8] sm:$0xff]  ;;  %v1560_v14 = vld [vmem:[%s4456_s18 + $0x10] sm:$0xff] }
 0x28c   : > { %v1814_v9 = vld [vmem:[%s4462_s26] sm:$0xff]  ;;  %v1815_v10 = vld [vmem:[%s4462_s26 + $0x8] sm:$0xff]  ;;  %v1816_v15 = vld [vmem:[%s4462_s26 + $0x10] sm:$0xff] }
 0x28d   : > { %v4995_v3 = vshrl.u32 %v2326_v2, 7  ;;  %v2070_v18 = vsub.f32 %v1558_v7, %v1814_v9  ;;  %v2071_v19 = vsub.f32 %v1559_v8, %v1815_v10  ;;  %v1561_v20 = vld [vmem:[%s4456_s18 + $0x18] sm:$0xff]  ;;  %v2072_v24 = vsub.f32 %v1560_v14, %v1816_v15  ;;  %v1562_v25 = vld [vmem:[%s4456_s18 + $0x20] sm:$0xff]  ;;  %v1563_v32 = vld [vmem:[%s4456_s18 + $0x28] sm:$0xff] }
 0x28e   : > { %v1817_v21 = vld [vmem:[%s4462_s26 + $0x18] sm:$0xff]  ;;  %v1818_v26 = vld [vmem:[%s4462_s26 + $0x20] sm:$0xff]  ;;  %v1819_v33 = vld [vmem:[%s4462_s26 + $0x28] sm:$0xff] }
 0x28f   : > { %v2328_v4 = vadd.s32 8, %v4995_v3  ;;  %v2329_v6 = vadd.s32 16, %v4995_v3  ;;  %v2330_v11 = vadd.s32 24, %v4995_v3  ;;  %v2584_v12 = vadd.s32 %v5000_v5, %v4995_v3  ;;  %v1564_v39 = vld [vmem:[%s4456_s18 + $0x30] sm:$0xff]  ;;  %v1565_v46 = vld [vmem:[%s4456_s18 + $0x38] sm:$0xff]  ;;  %v1566_v54 = vld [vmem:[%s4456_s18 + $0x40] sm:$0xff] }
 0x290   : > { %v2331_v16 = vadd.s32 32, %v4995_v3  ;;  %v2332_v22 = vadd.s32 40, %v4995_v3  ;;  %v2333_v27 = vadd.s32 48, %v4995_v3  ;;  %v2073_v29 = vsub.f32 %v1561_v20, %v1817_v21  ;;  %v1820_v40 = vld [vmem:[%s4462_s26 + $0x30] sm:$0xff]  ;;  %v1821_v47 = vld [vmem:[%s4462_s26 + $0x38] sm:$0xff]  ;;  %v1822_v55 = vld [vmem:[%s4462_s26 + $0x40] sm:$0xff] }
 0x291   : > { %v2585_v13 = vadd.s32 %v5000_v5, %v2328_v4  ;;  %v2586_v17 = vadd.s32 %v5000_v5, %v2329_v6  ;;  %v2587_v23 = vadd.s32 %v5000_v5, %v2330_v11  ;;  %vm2840_vm0 = vcmp.lt.s32.totalorder %v2584_v12, 2062  ;;  %v1567_v62 = vld [vmem:[%s4456_s18 + $0x48] sm:$0xff]  ;;  %v1568_v8 = vld [vmem:[%s4456_s18 + $0x50] sm:$0xff] }
 0x292   : > { %v2588_v28 = vadd.s32 %v5000_v5, %v2331_v16  ;;  %v3096_v30 = vsel %vm2840_vm0, %v2070_v18, 0.0  ;;  %v2334_v34 = vadd.s32 56, %v4995_v3  ;;  %v2589_v35 = vadd.s32 %v5000_v5, %v2332_v22  ;;  %v1823_v63 = vld [vmem:[%s4462_s26 + $0x48] sm:$0xff]  ;;  %v1824_v9 = vld [vmem:[%s4462_s26 + $0x50] sm:$0xff]  ;;  %v1569_v16 = vld [vmem:[%s4456_s18 + $0x58] sm:$0xff] }
 0x293   : > { %vm2841_vm1 = vcmp.lt.s32.totalorder %v2585_v13, 2062  ;;  %vm2842_vm2 = vcmp.lt.s32.totalorder %v2586_v17, 2062  ;;  %vm2843_vm3 = vcmp.lt.s32.totalorder %v2587_v23, 2062  ;;  %v2074_v36 = vsub.f32 %v1562_v25, %v1818_v26  ;;  %v1825_v17 = vld [vmem:[%s4462_s26 + $0x58] sm:$0xff]  ;;  %v1826_v25 = vld [vmem:[%s4462_s26 + $0x60] sm:$0xff] }
 0x294   : > { %v3097_v31 = vsel %vm2841_vm1, %v2071_v19, 0.0  ;;  %v2335_v37 = vadd.s32 64, %v4995_v3  ;;  %v3098_v38 = vsel %vm2842_vm2, %v2072_v24, 0.0  ;;  %v2590_v41 = vadd.s32 %v5000_v5, %v2333_v27  ;;  %v1570_v24 = vld [vmem:[%s4456_s18 + $0x60] sm:$0xff] }
 0x295   : > { %vm2844_vm4 = vcmp.lt.s32.totalorder %v2588_v28, 2062  ;;  %v3352_v42 = vmul.f32 %v3096_v30, %v3096_v30  ;;  %v3353_v43 = vmul.f32 %v3097_v31, %v3097_v31  ;;  %v2075_v44 = vsub.f32 %v1563_v32, %v1819_v33  ;;  %v1571_v32 = vld [vmem:[%s4456_s18 + $0x68] sm:$0xff] }
 0x296   : > { %v3099_v45 = vsel %vm2843_vm3, %v2073_v29, 0.0  ;;  %v2336_v48 = vadd.s32 72, %v4995_v3  ;;  %v2591_v49 = vadd.s32 %v5000_v5, %v2334_v34  ;;  %vm2845_vm5 = vcmp.lt.s32.totalorder %v2589_v35, 2062  ;;  %v1827_v33 = vld [vmem:[%s4462_s26 + $0x68] sm:$0xff] }
 0x297   : > { %v3354_v50 = vmul.f32 %v3098_v38, %v3098_v38  ;;  %v2076_v51 = vsub.f32 %v1564_v39, %v1820_v40  ;;  %v2337_v52 = vadd.s32 80, %v4995_v3  ;;  %v3100_v53 = vsel %vm2844_vm4, %v2074_v36, 0.0  ;;  %v1572_v40 = vld [vmem:[%s4456_s18 + $0x70] sm:$0xff] }
 0x298   : > { %v2592_v56 = vadd.s32 %v5000_v5, %v2335_v37  ;;  %vm2846_vm6 = vcmp.lt.s32.totalorder %v2590_v41, 2062  ;;  %v3355_v57 = vmul.f32 %v3099_v45, %v3099_v45  ;;  %v3609_v58 = vadd.f32 %v3353_v43, %v3352_v42  ;;  %v1828_v41 = vld [vmem:[%s4462_s26 + $0x70] sm:$0xff] }
 0x299   : > { %v2077_v59 = vsub.f32 %v1565_v46, %v1821_v47  ;;  %v2338_v60 = vadd.s32 88, %v4995_v3  ;;  %v3101_v61 = vsel %vm2845_vm5, %v2075_v44, 0.0  ;;  %v2593_v0 = vadd.s32 %v5000_v5, %v2336_v48  ;;  %v1573_v48 = vld [vmem:[%s4456_s18 + $0x78] sm:$0xff] }
 0x29a   : > { %vm2847_vm7 = vcmp.lt.s32.totalorder %v2591_v49, 2062  ;;  %v3356_v1 = vmul.f32 %v3100_v53, %v3100_v53  ;;  %v3610_v2 = vadd.f32 %v3609_v58, %v3354_v50  ;;  %v2078_v4 = vsub.f32 %v1566_v54, %v1822_v55  ;;  %v1829_v49 = vld [vmem:[%s4462_s26 + $0x78] sm:$0xff] }
 0x29b   : > { %v2339_v6 = vadd.s32 96, %v4995_v3  ;;  %v3102_v7 = vsel %vm2846_vm6, %v2076_v51, 0.0  ;;  %v2594_v10 = vadd.s32 %v5000_v5, %v2337_v52  ;;  %vm2848_vm8 = vcmp.lt.s32.totalorder %v2592_v56, 2062  ;;  %v1574_v56 = vld [vmem:[%s4456_s18 + $0x80] sm:$0xff] }
 0x29c   : > { %v3357_v11 = vmul.f32 %v3101_v61, %v3101_v61  ;;  %v3611_v12 = vadd.f32 %v3610_v2, %v3355_v57  ;;  %v2079_v13 = vsub.f32 %v1567_v62, %v1823_v63  ;;  %v2340_v14 = vadd.s32 104, %v4995_v3  ;;  %v1830_v57 = vld [vmem:[%s4462_s26 + $0x80] sm:$0xff] }
 0x29d   : > { %v3103_v15 = vsel %vm2847_vm7, %v2077_v59, 0.0  ;;  %v2595_v18 = vadd.s32 %v5000_v5, %v2338_v60  ;;  %vm2849_vm9 = vcmp.lt.s32.totalorder %v2593_v0, 2062  ;;  %v3358_v19 = vmul.f32 %v3102_v7, %v3102_v7  ;;  %v1575_v0 = vld [vmem:[%s4456_s18 + $0x88] sm:$0xff] }
 0x29e   : > { %v3612_v20 = vadd.f32 %v3611_v12, %v3356_v1  ;;  %v2080_v21 = vsub.f32 %v1568_v8, %v1824_v9  ;;  %v2341_v22 = vadd.s32 112, %v4995_v3  ;;  %v3104_v23 = vsel %vm2848_vm8, %v2078_v4, 0.0  ;;  %v1831_v1 = vld [vmem:[%s4462_s26 + $0x88] sm:$0xff] }
 0x29f   : > { %v2596_v26 = vadd.s32 %v5000_v5, %v2339_v6  ;;  %vm2850_vm10 = vcmp.lt.s32.totalorder %v2594_v10, 2062  ;;  %v3359_v27 = vmul.f32 %v3103_v15, %v3103_v15  ;;  %v2081_v29 = vsub.f32 %v1569_v16, %v1825_v17  ;;  %v1576_v10 = vld [vmem:[%s4456_s18 + $0x90] sm:$0xff] }
 0x2a0   : > { %v3613_v28 = vadd.f32 %v3612_v20, %v3357_v11  ;;  %v2342_v30 = vadd.s32 120, %v4995_v3  ;;  %v3105_v31 = vsel %vm2849_vm9, %v2079_v13, 0.0  ;;  %v2597_v34 = vadd.s32 %v5000_v5, %v2340_v14  ;;  %v1832_v11 = vld [vmem:[%s4462_s26 + $0x90] sm:$0xff] }
 0x2a1   : > { %vm2851_vm11 = vcmp.lt.s32.totalorder %v2595_v18, 2062  ;;  %v3360_v35 = vmul.f32 %v3104_v23, %v3104_v23  ;;  %v2082_v37 = vsub.f32 %v1570_v24, %v1826_v25  ;;  %v2343_v38 = vadd.s32 128, %v4995_v3  ;;  %v1577_v18 = vld [vmem:[%s4456_s18 + $0x98] sm:$0xff] }
 0x2a2   : > { %v3614_v36 = vadd.f32 %v3613_v28, %v3358_v19  ;;  %v3106_v39 = vsel %vm2850_vm10, %v2080_v21, 0.0  ;;  %v2598_v42 = vadd.s32 %v5000_v5, %v2341_v22  ;;  %vm2852_vm12 = vcmp.lt.s32.totalorder %v2596_v26, 2062  ;;  %v1833_v19 = vld [vmem:[%s4462_s26 + $0x98] sm:$0xff]  ;;  %v1578_v26 = vld [vmem:[%s4456_s18 + $0xa0] sm:$0xff] }
 0x2a3   : > { %v3361_v43 = vmul.f32 %v3105_v31, %v3105_v31  ;;  %v2083_v45 = vsub.f32 %v1571_v32, %v1827_v33  ;;  %v2344_v46 = vadd.s32 136, %v4995_v3  ;;  %v3107_v47 = vsel %vm2851_vm11, %v2081_v29, 0.0 }
 0x2a4   : > { %v3615_v44 = vadd.f32 %v3614_v36, %v3359_v27  ;;  %v2599_v50 = vadd.s32 %v5000_v5, %v2342_v30  ;;  %vm2853_vm13 = vcmp.lt.s32.totalorder %v2597_v34, 2062  ;;  %v3362_v51 = vmul.f32 %v3106_v39, %v3106_v39  ;;  %v1834_v27 = vld [vmem:[%s4462_s26 + $0xa0] sm:$0xff]  ;;  %v1579_v34 = vld [vmem:[%s4456_s18 + $0xa8] sm:$0xff] }
 0x2a5   : > { %v2084_v53 = vsub.f32 %v1572_v40, %v1828_v41  ;;  %v2345_v54 = vadd.s32 144, %v4995_v3  ;;  %v3108_v55 = vsel %vm2852_vm12, %v2082_v37, 0.0  ;;  %v2600_v58 = vadd.s32 %v5000_v5, %v2343_v38 }
 0x2a6   : > { %v3616_v52 = vadd.f32 %v3615_v44, %v3360_v35  ;;  %vm2854_vm14 = vcmp.lt.s32.totalorder %v2598_v42, 2062  ;;  %v3363_v59 = vmul.f32 %v3107_v47, %v3107_v47  ;;  %v2085_v61 = vsub.f32 %v1573_v48, %v1829_v49  ;;  %v1835_v35 = vld [vmem:[%s4462_s26 + $0xa8] sm:$0xff]  ;;  %v1580_v42 = vld [vmem:[%s4456_s18 + $0xb0] sm:$0xff] }
 0x2a7   : > { %v2346_v62 = vadd.s32 152, %v4995_v3  ;;  %v3109_v63 = vsel %vm2853_vm13, %v2083_v45, 0.0  ;;  %v2601_v2 = vadd.s32 %v5000_v5, %v2344_v46  ;;  %vm2855_vm15 = vcmp.lt.s32.totalorder %v2599_v50, 2062  ;;  %v1581_v50 = vld [vmem:[%s4456_s18 + $0xb8] sm:$0xff] }
 0x2a8   : > { %v3617_v60 = vadd.f32 %v3616_v52, %v3361_v43  ;;  %v3364_v4 = vmul.f32 %v3108_v55, %v3108_v55  ;;  %v2086_v7 = vsub.f32 %v1574_v56, %v1830_v57  ;;  %v2347_v8 = vadd.s32 160, %v4995_v3  ;;  %v1836_v43 = vld [vmem:[%s4462_s26 + $0xb0] sm:$0xff] }
 0x2a9   : > { %v3110_v9 = vsel %vm2854_vm14, %v2084_v53, 0.0  ;;  %v2602_v12 = vadd.s32 %v5000_v5, %v2345_v54  ;;  %vm2856_vm0 = vcmp.lt.s32.totalorder %v2600_v58, 2062  ;;  %v3365_v13 = vmul.f32 %v3109_v63, %v3109_v63  ;;  %v1582_v58 = vld [vmem:[%s4456_s18 + $0xc0] sm:$0xff] }
 0x2aa   : > { %v3618_v6 = vadd.f32 %v3617_v60, %v3362_v51  ;;  %v2087_v15 = vsub.f32 %v1575_v0, %v1831_v1  ;;  %v2348_v16 = vadd.s32 168, %v4995_v3  ;;  %v3111_v17 = vsel %vm2855_vm15, %v2085_v61, 0.0  ;;  %v1837_v51 = vld [vmem:[%s4462_s26 + $0xb8] sm:$0xff] }
 0x2ab   : > { %v2603_v20 = vadd.s32 %v5000_v5, %v2346_v62  ;;  %vm2857_vm1 = vcmp.lt.s32.totalorder %v2601_v2, 2062  ;;  %v3366_v21 = vmul.f32 %v3110_v9, %v3110_v9  ;;  %v2088_v23 = vsub.f32 %v1576_v10, %v1832_v11  ;;  %v1583_v2 = vld [vmem:[%s4456_s18 + $0xc8] sm:$0xff] }
 0x2ac   : > { %v3619_v14 = vadd.f32 %v3618_v6, %v3363_v59  ;;  %v2349_v24 = vadd.s32 176, %v4995_v3  ;;  %v3112_v25 = vsel %vm2856_vm0, %v2086_v7, 0.0  ;;  %v2604_v28 = vadd.s32 %v5000_v5, %v2347_v8  ;;  %v1838_v59 = vld [vmem:[%s4462_s26 + $0xc0] sm:$0xff] }
 0x2ad   : > { %vm2858_vm2 = vcmp.lt.s32.totalorder %v2602_v12, 2062  ;;  %v3367_v29 = vmul.f32 %v3111_v17, %v3111_v17  ;;  %v2089_v31 = vsub.f32 %v1577_v18, %v1833_v19  ;;  %v2350_v32 = vadd.s32 184, %v4995_v3  ;;  %v1584_v12 = vld [vmem:[%s4456_s18 + $0xd0] sm:$0xff] }
 0x2ae   : > { %v3620_v22 = vadd.f32 %v3619_v14, %v3364_v4  ;;  %v3113_v33 = vsel %vm2857_vm1, %v2087_v15, 0.0  ;;  %v2605_v36 = vadd.s32 %v5000_v5, %v2348_v16  ;;  %vm2859_vm3 = vcmp.lt.s32.totalorder %v2603_v20, 2062  ;;  %v1839_v4 = vld [vmem:[%s4462_s26 + $0xc8] sm:$0xff]  ;;  %v1585_v20 = vld [vmem:[%s4456_s18 + $0xd8] sm:$0xff] }
 0x2af   : > { %v3368_v37 = vmul.f32 %v3112_v25, %v3112_v25  ;;  %v2090_v39 = vsub.f32 %v1578_v26, %v1834_v27  ;;  %v2351_v40 = vadd.s32 192, %v4995_v3  ;;  %v3114_v41 = vsel %vm2858_vm2, %v2088_v23, 0.0 }
 0x2b0   : > { %v3621_v30 = vadd.f32 %v3620_v22, %v3365_v13  ;;  %v2606_v44 = vadd.s32 %v5000_v5, %v2349_v24  ;;  %vm2860_vm4 = vcmp.lt.s32.totalorder %v2604_v28, 2062  ;;  %v3369_v45 = vmul.f32 %v3113_v33, %v3113_v33  ;;  %v1840_v13 = vld [vmem:[%s4462_s26 + $0xd0] sm:$0xff]  ;;  %v1586_v28 = vld [vmem:[%s4456_s18 + $0xe0] sm:$0xff] }
 0x2b1   : > { %v2091_v47 = vsub.f32 %v1579_v34, %v1835_v35  ;;  %v2352_v48 = vadd.s32 200, %v4995_v3  ;;  %v3115_v49 = vsel %vm2859_vm3, %v2089_v31, 0.0  ;;  %v2607_v52 = vadd.s32 %v5000_v5, %v2350_v32 }
 0x2b2   : > { %v3622_v38 = vadd.f32 %v3621_v30, %v3366_v21  ;;  %vm2861_vm5 = vcmp.lt.s32.totalorder %v2605_v36, 2062  ;;  %v3370_v53 = vmul.f32 %v3114_v41, %v3114_v41  ;;  %v2092_v55 = vsub.f32 %v1580_v42, %v1836_v43  ;;  %v1841_v21 = vld [vmem:[%s4462_s26 + $0xd8] sm:$0xff]  ;;  %v1587_v36 = vld [vmem:[%s4456_s18 + $0xe8] sm:$0xff] }
 0x2b3   : > { %v2353_v56 = vadd.s32 208, %v4995_v3  ;;  %v3116_v57 = vsel %vm2860_vm4, %v2090_v39, 0.0  ;;  %v2608_v60 = vadd.s32 %v5000_v5, %v2351_v40  ;;  %vm2862_vm6 = vcmp.lt.s32.totalorder %v2606_v44, 2062  ;;  %v1588_v44 = vld [vmem:[%s4456_s18 + $0xf0] sm:$0xff] }
 0x2b4   : > { %v3623_v46 = vadd.f32 %v3622_v38, %v3367_v29  ;;  %v3371_v61 = vmul.f32 %v3115_v49, %v3115_v49  ;;  %v2093_v63 = vsub.f32 %v1581_v50, %v1837_v51  ;;  %v2354_v0 = vadd.s32 216, %v4995_v3  ;;  %v1842_v29 = vld [vmem:[%s4462_s26 + $0xe0] sm:$0xff] }
 0x2b5   : > { %v3117_v1 = vsel %vm2861_vm5, %v2091_v47, 0.0  ;;  %v2609_v6 = vadd.s32 %v5000_v5, %v2352_v48  ;;  %vm2863_vm7 = vcmp.lt.s32.totalorder %v2607_v52, 2062  ;;  %v3372_v7 = vmul.f32 %v3116_v57, %v3116_v57  ;;  %v1589_v52 = vld [vmem:[%s4456_s18 + $0xf8] sm:$0xff] }
 0x2b6   : > { %v3624_v54 = vadd.f32 %v3623_v46, %v3368_v37  ;;  %v2094_v9 = vsub.f32 %v1582_v58, %v1838_v59  ;;  %v2355_v10 = vadd.s32 224, %v4995_v3  ;;  %v3118_v11 = vsel %vm2862_vm6, %v2092_v55, 0.0  ;;  %v1843_v37 = vld [vmem:[%s4462_s26 + $0xe8] sm:$0xff] }
 0x2b7   : > { %v2610_v14 = vadd.s32 %v5000_v5, %v2353_v56  ;;  %vm2864_vm8 = vcmp.lt.s32.totalorder %v2608_v60, 2062  ;;  %v3373_v15 = vmul.f32 %v3117_v1, %v3117_v1  ;;  %v2095_v17 = vsub.f32 %v1583_v2, %v1839_v4  ;;  %v1590_v60 = vld [vmem:[%s4456_s18 + $0x100] sm:$0xff] }
 0x2b8   : > { %v3625_v62 = vadd.f32 %v3624_v54, %v3369_v45  ;;  %v2356_v18 = vadd.s32 232, %v4995_v3  ;;  %v3119_v19 = vsel %vm2863_vm7, %v2093_v63, 0.0  ;;  %v2611_v22 = vadd.s32 %v5000_v5, %v2354_v0  ;;  %v1844_v45 = vld [vmem:[%s4462_s26 + $0xf0] sm:$0xff] }
 0x2b9   : > { %vm2865_vm9 = vcmp.lt.s32.totalorder %v2609_v6, 2062  ;;  %v3374_v23 = vmul.f32 %v3118_v11, %v3118_v11  ;;  %v2096_v25 = vsub.f32 %v1584_v12, %v1840_v13  ;;  %v2357_v26 = vadd.s32 240, %v4995_v3  ;;  %v1591_v6 = vld [vmem:[%s4456_s18 + $0x108] sm:$0xff] }
 0x2ba   : > { %v3626_v8 = vadd.f32 %v3625_v62, %v3370_v53  ;;  %v3120_v27 = vsel %vm2864_vm8, %v2094_v9, 0.0  ;;  %v2612_v30 = vadd.s32 %v5000_v5, %v2355_v10  ;;  %vm2866_vm10 = vcmp.lt.s32.totalorder %v2610_v14, 2062  ;;  %v1845_v53 = vld [vmem:[%s4462_s26 + $0xf8] sm:$0xff]  ;;  %v1592_v14 = vld [vmem:[%s4456_s18 + $0x110] sm:$0xff] }
 0x2bb   : > { %v3375_v31 = vmul.f32 %v3119_v19, %v3119_v19  ;;  %v2097_v33 = vsub.f32 %v1585_v20, %v1841_v21  ;;  %v2358_v34 = vadd.s32 248, %v4995_v3  ;;  %v3121_v35 = vsel %vm2865_vm9, %v2095_v17, 0.0 }
 0x2bc   : > { %v3627_v16 = vadd.f32 %v3626_v8, %v3371_v61  ;;  %v2613_v38 = vadd.s32 %v5000_v5, %v2356_v18  ;;  %vm2867_vm11 = vcmp.lt.s32.totalorder %v2611_v22, 2062  ;;  %v3376_v39 = vmul.f32 %v3120_v27, %v3120_v27  ;;  %v1846_v61 = vld [vmem:[%s4462_s26 + $0x100] sm:$0xff]  ;;  %v1593_v22 = vld [vmem:[%s4456_s18 + $0x118] sm:$0xff] }
 0x2bd   : > { %v2098_v41 = vsub.f32 %v1586_v28, %v1842_v29  ;;  %v2359_v42 = vadd.s32 256, %v4995_v3  ;;  %v3122_v43 = vsel %vm2866_vm10, %v2096_v25, 0.0  ;;  %v2614_v46 = vadd.s32 %v5000_v5, %v2357_v26 }
 0x2be   : > { %v3628_v24 = vadd.f32 %v3627_v16, %v3372_v7  ;;  %vm2868_vm12 = vcmp.lt.s32.totalorder %v2612_v30, 2062  ;;  %v3377_v47 = vmul.f32 %v3121_v35, %v3121_v35  ;;  %v2099_v49 = vsub.f32 %v1587_v36, %v1843_v37  ;;  %v1847_v7 = vld [vmem:[%s4462_s26 + $0x108] sm:$0xff]  ;;  %v1594_v30 = vld [vmem:[%s4456_s18 + $0x120] sm:$0xff] }
 0x2bf   : > { %v2360_v50 = vadd.s32 264, %v4995_v3  ;;  %v3123_v51 = vsel %vm2867_vm11, %v2097_v33, 0.0  ;;  %v2615_v54 = vadd.s32 %v5000_v5, %v2358_v34  ;;  %vm2869_vm13 = vcmp.lt.s32.totalorder %v2613_v38, 2062  ;;  %v1595_v38 = vld [vmem:[%s4456_s18 + $0x128] sm:$0xff] }
 0x2c0   : > { %v3629_v32 = vadd.f32 %v3628_v24, %v3373_v15  ;;  %v3378_v55 = vmul.f32 %v3122_v43, %v3122_v43  ;;  %v2100_v57 = vsub.f32 %v1588_v44, %v1844_v45  ;;  %v2361_v58 = vadd.s32 272, %v4995_v3  ;;  %v1848_v15 = vld [vmem:[%s4462_s26 + $0x110] sm:$0xff] }
 0x2c1   : > { %v3124_v59 = vsel %vm2868_vm12, %v2098_v41, 0.0  ;;  %v2616_v62 = vadd.s32 %v5000_v5, %v2359_v42  ;;  %vm2870_vm14 = vcmp.lt.s32.totalorder %v2614_v46, 2062  ;;  %v3379_v63 = vmul.f32 %v3123_v51, %v3123_v51  ;;  %v1596_v46 = vld [vmem:[%s4456_s18 + $0x130] sm:$0xff] }
 0x2c2   : > { %v3630_v40 = vadd.f32 %v3629_v32, %v3374_v23  ;;  %v2101_v1 = vsub.f32 %v1589_v52, %v1845_v53  ;;  %v2617_v2 = vadd.s32 %v5000_v5, %v2360_v50  ;;  %v3125_v4 = vsel %vm2869_vm13, %v2099_v49, 0.0  ;;  %v1849_v23 = vld [vmem:[%s4462_s26 + $0x118] sm:$0xff] }
 0x2c3   : > { %v2362_v8 = vadd.s32 280, %v4995_v3  ;;  %vm2871_vm15 = vcmp.lt.s32.totalorder %v2615_v54, 2062  ;;  %v3380_v9 = vmul.f32 %v3124_v59, %v3124_v59  ;;  %v2102_v11 = vsub.f32 %v1590_v60, %v1846_v61  ;;  %v1597_v54 = vld [vmem:[%s4456_s18 + $0x138] sm:$0xff] }
 0x2c4   : > { %v3631_v48 = vadd.f32 %v3630_v40, %v3375_v31  ;;  %v2618_v12 = vadd.s32 %v5000_v5, %v2361_v58  ;;  %v3126_v13 = vsel %vm2870_vm14, %v2100_v57, 0.0  ;;  %v2363_v16 = vadd.s32 288, %v4995_v3  ;;  %v1850_v31 = vld [vmem:[%s4462_s26 + $0x120] sm:$0xff] }
 0x2c5   : > { %vm2872_vm0 = vcmp.lt.s32.totalorder %v2616_v62, 2062  ;;  %v3381_v17 = vmul.f32 %v3125_v4, %v3125_v4  ;;  %v2103_v19 = vsub.f32 %v1591_v6, %v1847_v7  ;;  %v2364_v20 = vadd.s32 296, %v4995_v3  ;;  %v1598_v62 = vld [vmem:[%s4456_s18 + $0x140] sm:$0xff] }
 0x2c6   : > { %v3632_v56 = vadd.f32 %v3631_v48, %v3376_v39  ;;  %v3127_v21 = vsel %vm2871_vm15, %v2101_v1, 0.0  ;;  %v2619_v24 = vadd.s32 %v5000_v5, %v2362_v8  ;;  %vm2873_vm1 = vcmp.lt.s32.totalorder %v2617_v2, 2062  ;;  %v1851_v39 = vld [vmem:[%s4462_s26 + $0x128] sm:$0xff] }
 0x2c7   : > { %v3382_v25 = vmul.f32 %v3126_v13, %v3126_v13  ;;  %v2104_v27 = vsub.f32 %v1592_v14, %v1848_v15  ;;  %v2365_v28 = vadd.s32 304, %v4995_v3  ;;  %v3128_v29 = vsel %vm2872_vm0, %v2102_v11, 0.0  ;;  %v1599_v8 = vld [vmem:[%s4456_s18 + $0x148] sm:$0xff] }
 0x2c8   : > { %v3633_v0 = vadd.f32 %v3632_v56, %v3377_v47  ;;  %v2620_v32 = vadd.s32 %v5000_v5, %v2363_v16  ;;  %vm2874_vm2 = vcmp.lt.s32.totalorder %v2618_v12, 2062  ;;  %v3383_v33 = vmul.f32 %v3127_v21, %v3127_v21  ;;  %v1852_v47 = vld [vmem:[%s4462_s26 + $0x130] sm:$0xff] }
 0x2c9   : > { %v2105_v35 = vsub.f32 %v1593_v22, %v1849_v23  ;;  %v2621_v36 = vadd.s32 %v5000_v5, %v2364_v20  ;;  %v3129_v37 = vsel %vm2873_vm1, %v2103_v19, 0.0  ;;  %v2366_v40 = vadd.s32 312, %v4995_v3  ;;  %v1600_v16 = vld [vmem:[%s4456_s18 + $0x150] sm:$0xff]  ;;  %v1601_v23 = vld [vmem:[%s4456_s18 + $0x158] sm:$0xff] }
 0x2ca   : > { %v3634_v10 = vadd.f32 %v3633_v0, %v3378_v55  ;;  %vm2875_vm3 = vcmp.lt.s32.totalorder %v2619_v24, 2062  ;;  %v3384_v41 = vmul.f32 %v3128_v29, %v3128_v29  ;;  %v2106_v43 = vsub.f32 %v1594_v30, %v1850_v31  ;;  %v1853_v55 = vld [vmem:[%s4462_s26 + $0x138] sm:$0xff]  ;;  %v1602_v31 = vld [vmem:[%s4456_s18 + $0x160] sm:$0xff] }
 0x2cb   : > { %v2622_v44 = vadd.s32 %v5000_v5, %v2365_v28  ;;  %v3130_v45 = vsel %vm2874_vm2, %v2104_v27, 0.0  ;;  %v2367_v48 = vadd.s32 320, %v4995_v3  ;;  %vm2876_vm4 = vcmp.lt.s32.totalorder %v2620_v32, 2062  ;;  %v1857_v24 = vld [vmem:[%s4462_s26 + $0x158] sm:$0xff]  ;;  %v1858_v32 = vld [vmem:[%s4462_s26 + $0x160] sm:$0xff] }
 0x2cc   : > { %v3635_v18 = vadd.f32 %v3634_v10, %v3379_v63  ;;  %v3385_v49 = vmul.f32 %v3129_v37, %v3129_v37  ;;  %v2107_v51 = vsub.f32 %v1595_v38, %v1851_v39  ;;  %v2368_v52 = vadd.s32 328, %v4995_v3  ;;  %v1854_v63 = vld [vmem:[%s4462_s26 + $0x140] sm:$0xff] }
 0x2cd   : > { %v3131_v53 = vsel %vm2875_vm3, %v2105_v35, 0.0  ;;  %v2623_v56 = vadd.s32 %v5000_v5, %v2366_v40  ;;  %vm2877_vm5 = vcmp.lt.s32.totalorder %v2621_v36, 2062  ;;  %v3386_v57 = vmul.f32 %v3130_v45, %v3130_v45  ;;  %v1603_v40 = vld [vmem:[%s4456_s18 + $0x168] sm:$0xff] }
 0x2ce   : > { %v3636_v26 = vadd.f32 %v3635_v18, %v3380_v9  ;;  %v2108_v59 = vsub.f32 %v1596_v46, %v1852_v47  ;;  %v2369_v60 = vadd.s32 336, %v4995_v3  ;;  %v3132_v61 = vsel %vm2876_vm4, %v2106_v43, 0.0  ;;  %v1855_v9 = vld [vmem:[%s4462_s26 + $0x148] sm:$0xff] }
 0x2cf   : > { %v2624_v0 = vadd.s32 %v5000_v5, %v2367_v48  ;;  %vm2878_vm6 = vcmp.lt.s32.totalorder %v2622_v44, 2062  ;;  %v3387_v1 = vmul.f32 %v3131_v53, %v3131_v53  ;;  %v2109_v4 = vsub.f32 %v1597_v54, %v1853_v55  ;;  %v1604_v48 = vld [vmem:[%s4456_s18 + $0x170] sm:$0xff] }
 0x2d0   : > { %v3637_v34 = vadd.f32 %v3636_v26, %v3381_v17  ;;  %v2625_v6 = vadd.s32 %v5000_v5, %v2368_v52  ;;  %v3133_v7 = vsel %vm2877_vm5, %v2107_v51, 0.0  ;;  %v2370_v10 = vadd.s32 344, %v4995_v3  ;;  %v1856_v17 = vld [vmem:[%s4462_s26 + $0x150] sm:$0xff] }
 0x2d1   : > { %vm2879_vm7 = vcmp.lt.s32.totalorder %v2623_v56, 2062  ;;  %v3388_v11 = vmul.f32 %v3132_v61, %v3132_v61  ;;  %v2110_v13 = vsub.f32 %v1598_v62, %v1854_v63  ;;  %v2626_v14 = vadd.s32 %v5000_v5, %v2369_v60  ;;  %v1605_v56 = vld [vmem:[%s4456_s18 + $0x178] sm:$0xff] }
 0x2d2   : > { %v3638_v42 = vadd.f32 %v3637_v34, %v3382_v25  ;;  %v3134_v15 = vsel %vm2878_vm6, %v2108_v59, 0.0  ;;  %v2371_v18 = vadd.s32 352, %v4995_v3  ;;  %vm2880_vm8 = vcmp.lt.s32.totalorder %v2624_v0, 2062  ;;  %v1606_v0 = vld [vmem:[%s4456_s18 + $0x180] sm:$0xff] }
 0x2d3   : > { %v3389_v19 = vmul.f32 %v3133_v7, %v3133_v7  ;;  %v2111_v21 = vsub.f32 %v1599_v8, %v1855_v9  ;;  %vm2881_vm9 = vcmp.lt.s32.totalorder %v2625_v6, 2062  ;;  %v3135_v22 = vsel %vm2879_vm7, %v2109_v4, 0.0 }
 0x2d4   : > { %v3639_v50 = vadd.f32 %v3638_v42, %v3383_v33  ;;  %v2372_v25 = vadd.s32 360, %v4995_v3  ;;  %v2627_v26 = vadd.s32 %v5000_v5, %v2370_v10  ;;  %v3390_v27 = vmul.f32 %v3134_v15, %v3134_v15  ;;  %v1607_v10 = vld [vmem:[%s4456_s18 + $0x188] sm:$0xff] }
 0x2d5   : > { %v2112_v29 = vsub.f32 %v1600_v16, %v1856_v17  ;;  %vm2882_vm10 = vcmp.lt.s32.totalorder %v2626_v14, 2062  ;;  %v3136_v30 = vsel %vm2880_vm8, %v2110_v13, 0.0  ;;  %v2373_v33 = vadd.s32 368, %v4995_v3 }
 0x2d6   : > { %v3640_v58 = vadd.f32 %v3639_v50, %v3384_v41  ;;  %v2628_v34 = vadd.s32 %v5000_v5, %v2371_v18  ;;  %v3391_v35 = vmul.f32 %v3135_v22, %v3135_v22  ;;  %v2113_v37 = vsub.f32 %v1601_v23, %v1857_v24  ;;  %v1859_v41 = vld [vmem:[%s4462_s26 + $0x168] sm:$0xff]  ;;  %v1608_v18 = vld [vmem:[%s4456_s18 + $0x190] sm:$0xff] }
 0x2d7   : > { %v2374_v38 = vadd.s32 376, %v4995_v3  ;;  %v3137_v39 = vsel %vm2881_vm9, %v2111_v21, 0.0  ;;  %v2629_v42 = vadd.s32 %v5000_v5, %v2372_v25  ;;  %vm2883_vm11 = vcmp.lt.s32.totalorder %v2627_v26, 2062  ;;  %v1609_v26 = vld [vmem:[%s4456_s18 + $0x198] sm:$0xff] }
 0x2d8   : > { %v3641_v2 = vadd.f32 %v3640_v58, %v3385_v49  ;;  %v3392_v43 = vmul.f32 %v3136_v30, %v3136_v30  ;;  %v2114_v45 = vsub.f32 %v1602_v31, %v1858_v32  ;;  %v2375_v46 = vadd.s32 384, %v4995_v3  ;;  %v1860_v49 = vld [vmem:[%s4462_s26 + $0x170] sm:$0xff] }
 0x2d9   : > { %v3138_v47 = vsel %vm2882_vm10, %v2112_v29, 0.0  ;;  %v2630_v50 = vadd.s32 %v5000_v5, %v2373_v33  ;;  %vm2884_vm12 = vcmp.lt.s32.totalorder %v2628_v34, 2062  ;;  %v3393_v51 = vmul.f32 %v3137_v39, %v3137_v39  ;;  %v1610_v34 = vld [vmem:[%s4456_s18 + $0x1a0] sm:$0xff] }
 0x2da   : > { %v3642_v12 = vadd.f32 %v3641_v2, %v3386_v57  ;;  %v2115_v53 = vsub.f32 %v1603_v40, %v1859_v41  ;;  %v2376_v54 = vadd.s32 392, %v4995_v3  ;;  %v3139_v55 = vsel %vm2883_vm11, %v2113_v37, 0.0  ;;  %v1861_v57 = vld [vmem:[%s4462_s26 + $0x178] sm:$0xff] }
 0x2db   : > { %v2631_v58 = vadd.s32 %v5000_v5, %v2374_v38  ;;  %vm2885_vm13 = vcmp.lt.s32.totalorder %v2629_v42, 2062  ;;  %v3394_v59 = vmul.f32 %v3138_v47, %v3138_v47  ;;  %v2116_v61 = vsub.f32 %v1604_v48, %v1860_v49  ;;  %v1611_v42 = vld [vmem:[%s4456_s18 + $0x1a8] sm:$0xff] }
 0x2dc   : > { %v3643_v20 = vadd.f32 %v3642_v12, %v3387_v1  ;;  %v2377_v62 = vadd.s32 400, %v4995_v3  ;;  %v3140_v63 = vsel %vm2884_vm12, %v2114_v45, 0.0  ;;  %v1862_v1 = vld [vmem:[%s4462_s26 + $0x180] sm:$0xff]  ;;  %v2632_v2 = vadd.s32 %v5000_v5, %v2375_v46 }
 0x2dd   : > { %vm2886_vm14 = vcmp.lt.s32.totalorder %v2630_v50, 2062  ;;  %v3395_v4 = vmul.f32 %v3139_v55, %v3139_v55  ;;  %v2117_v7 = vsub.f32 %v1605_v56, %v1861_v57  ;;  %v2378_v8 = vadd.s32 408, %v4995_v3  ;;  %v1612_v50 = vld [vmem:[%s4456_s18 + $0x1b0] sm:$0xff] }
 0x2de   : > { %v3644_v28 = vadd.f32 %v3643_v20, %v3388_v11  ;;  %v3141_v9 = vsel %vm2885_vm13, %v2115_v53, 0.0  ;;  %v1863_v11 = vld [vmem:[%s4462_s26 + $0x188] sm:$0xff]  ;;  %v2633_v12 = vadd.s32 %v5000_v5, %v2376_v54  ;;  %vm2887_vm15 = vcmp.lt.s32.totalorder %v2631_v58, 2062  ;;  %v1613_v58 = vld [vmem:[%s4456_s18 + $0x1b8] sm:$0xff] }
 0x2df   : > { %v3396_v13 = vmul.f32 %v3140_v63, %v3140_v63  ;;  %v2118_v15 = vsub.f32 %v1606_v0, %v1862_v1  ;;  %v2379_v16 = vadd.s32 416, %v4995_v3  ;;  %v3142_v17 = vsel %vm2886_vm14, %v2116_v61, 0.0 }
 0x2e0   : > { %v3645_v36 = vadd.f32 %v3644_v28, %v3389_v19  ;;  %v1864_v19 = vld [vmem:[%s4462_s26 + $0x190] sm:$0xff]  ;;  %v2634_v20 = vadd.s32 %v5000_v5, %v2377_v62  ;;  %vm2888_vm0 = vcmp.lt.s32.totalorder %v2632_v2, 2062  ;;  %v3397_v21 = vmul.f32 %v3141_v9, %v3141_v9  ;;  %v1614_v2 = vld [vmem:[%s4456_s18 + $0x1c0] sm:$0xff] }
 0x2e1   : > { %v2119_v23 = vsub.f32 %v1607_v10, %v1863_v11  ;;  %v2380_v24 = vadd.s32 424, %v4995_v3  ;;  %v3143_v25 = vsel %vm2887_vm15, %v2117_v7, 0.0  ;;  %v2635_v28 = vadd.s32 %v5000_v5, %v2378_v8 }
 0x2e2   : > { %v3646_v44 = vadd.f32 %v3645_v36, %v3390_v27  ;;  %v1865_v27 = vld [vmem:[%s4462_s26 + $0x198] sm:$0xff]  ;;  %vm2889_vm1 = vcmp.lt.s32.totalorder %v2633_v12, 2062  ;;  %v3398_v29 = vmul.f32 %v3142_v17, %v3142_v17  ;;  %v2120_v31 = vsub.f32 %v1608_v18, %v1864_v19  ;;  %v1615_v12 = vld [vmem:[%s4456_s18 + $0x1c8] sm:$0xff] }
 0x2e3   : > { %v2381_v32 = vadd.s32 432, %v4995_v3  ;;  %v3144_v33 = vsel %vm2888_vm0, %v2118_v15, 0.0  ;;  %v2636_v36 = vadd.s32 %v5000_v5, %v2379_v16  ;;  %vm2890_vm2 = vcmp.lt.s32.totalorder %v2634_v20, 2062  ;;  %v1616_v20 = vld [vmem:[%s4456_s18 + $0x1d0] sm:$0xff] }
 0x2e4   : > { %v3647_v52 = vadd.f32 %v3646_v44, %v3391_v35  ;;  %v1866_v35 = vld [vmem:[%s4462_s26 + $0x1a0] sm:$0xff]  ;;  %v3399_v37 = vmul.f32 %v3143_v25, %v3143_v25  ;;  %v2121_v39 = vsub.f32 %v1609_v26, %v1865_v27  ;;  %v2382_v40 = vadd.s32 440, %v4995_v3 }
 0x2e5   : > { %v3145_v41 = vsel %vm2889_vm1, %v2119_v23, 0.0  ;;  %v2637_v44 = vadd.s32 %v5000_v5, %v2380_v24  ;;  %vm2891_vm3 = vcmp.lt.s32.totalorder %v2635_v28, 2062  ;;  %v3400_v45 = vmul.f32 %v3144_v33, %v3144_v33  ;;  %v1617_v28 = vld [vmem:[%s4456_s18 + $0x1d8] sm:$0xff] }
 0x2e6   : > { %v3648_v60 = vadd.f32 %v3647_v52, %v3392_v43  ;;  %v1867_v43 = vld [vmem:[%s4462_s26 + $0x1a8] sm:$0xff]  ;;  %v2122_v47 = vsub.f32 %v1610_v34, %v1866_v35  ;;  %v2383_v48 = vadd.s32 448, %v4995_v3  ;;  %v3146_v49 = vsel %vm2890_vm2, %v2120_v31, 0.0 }
 0x2e7   : > { %v2638_v52 = vadd.s32 %v5000_v5, %v2381_v32  ;;  %vm2892_vm4 = vcmp.lt.s32.totalorder %v2636_v36, 2062  ;;  %v3401_v53 = vmul.f32 %v3145_v41, %v3145_v41  ;;  %v2123_v55 = vsub.f32 %v1611_v42, %v1867_v43  ;;  %v1618_v36 = vld [vmem:[%s4456_s18 + $0x1e0] sm:$0xff] }
 0x2e8   : > { %v3649_v6 = vadd.f32 %v3648_v60, %v3393_v51  ;;  %v1868_v51 = vld [vmem:[%s4462_s26 + $0x1b0] sm:$0xff]  ;;  %v2384_v56 = vadd.s32 456, %v4995_v3  ;;  %v3147_v57 = vsel %vm2891_vm3, %v2121_v39, 0.0  ;;  %v2639_v60 = vadd.s32 %v5000_v5, %v2382_v40 }
 0x2e9   : > { %vm2893_vm5 = vcmp.lt.s32.totalorder %v2637_v44, 2062  ;;  %v3402_v61 = vmul.f32 %v3146_v49, %v3146_v49  ;;  %v2124_v63 = vsub.f32 %v1612_v50, %v1868_v51  ;;  %v2385_v0 = vadd.s32 464, %v4995_v3  ;;  %v1619_v44 = vld [vmem:[%s4456_s18 + $0x1e8] sm:$0xff] }
 0x2ea   : > { %v3650_v14 = vadd.f32 %v3649_v6, %v3394_v59  ;;  %v1869_v59 = vld [vmem:[%s4462_s26 + $0x1b8] sm:$0xff]  ;;  %v3148_v1 = vsel %vm2892_vm4, %v2122_v47, 0.0  ;;  %v2640_v6 = vadd.s32 %v5000_v5, %v2383_v48  ;;  %vm2894_vm6 = vcmp.lt.s32.totalorder %v2638_v52, 2062  ;;  %v1620_v52 = vld [vmem:[%s4456_s18 + $0x1f0] sm:$0xff] }
 0x2eb   : > { %v3403_v7 = vmul.f32 %v3147_v57, %v3147_v57  ;;  %v2125_v9 = vsub.f32 %v1613_v58, %v1869_v59  ;;  %v2386_v10 = vadd.s32 472, %v4995_v3  ;;  %v3149_v11 = vsel %vm2893_vm5, %v2123_v55, 0.0 }
 0x2ec   : > { %v3651_v22 = vadd.f32 %v3650_v14, %v3395_v4  ;;  %v1870_v4 = vld [vmem:[%s4462_s26 + $0x1c0] sm:$0xff]  ;;  %v2641_v14 = vadd.s32 %v5000_v5, %v2384_v56  ;;  %vm2895_vm7 = vcmp.lt.s32.totalorder %v2639_v60, 2062  ;;  %v3404_v15 = vmul.f32 %v3148_v1, %v3148_v1  ;;  %v1621_v60 = vld [vmem:[%s4456_s18 + $0x1f8] sm:$0xff] }
 0x2ed   : > { %v2126_v17 = vsub.f32 %v1614_v2, %v1870_v4  ;;  %v2387_v18 = vadd.s32 480, %v4995_v3  ;;  %v3150_v19 = vsel %vm2894_vm6, %v2124_v63, 0.0  ;;  %vm2896_vm8 = vcmp.lt.s32.totalorder %v2640_v6, 2062  ;;  %v1622_v6 = vld [vmem:[%s4456_s18 + $0x200] sm:$0xff] }
 0x2ee   : > { %v3652_v30 = vadd.f32 %v3651_v22, %v3396_v13  ;;  %v1871_v13 = vld [vmem:[%s4462_s26 + $0x1c8] sm:$0xff]  ;;  %v2642_v22 = vadd.s32 %v5000_v5, %v2385_v0  ;;  %v3405_v23 = vmul.f32 %v3149_v11, %v3149_v11  ;;  %v2388_v26 = vadd.s32 488, %v4995_v3 }
 0x2ef   : > { %v2127_v25 = vsub.f32 %v1615_v12, %v1871_v13  ;;  %v3151_v27 = vsel %vm2895_vm7, %v2125_v9, 0.0  ;;  %vm2897_vm9 = vcmp.lt.s32.totalorder %v2641_v14, 2062  ;;  %v3406_v31 = vmul.f32 %v3150_v19, %v3150_v19  ;;  %v1623_v14 = vld [vmem:[%s4456_s18 + $0x208] sm:$0xff] }
 0x2f0   : > { %v3653_v38 = vadd.f32 %v3652_v30, %v3397_v21  ;;  %v1872_v21 = vld [vmem:[%s4462_s26 + $0x1d0] sm:$0xff]  ;;  %v2643_v30 = vadd.s32 %v5000_v5, %v2386_v10  ;;  %v2389_v34 = vadd.s32 496, %v4995_v3  ;;  %v3152_v35 = vsel %vm2896_vm8, %v2126_v17, 0.0 }
 0x2f1   : > { %v2128_v33 = vsub.f32 %v1616_v20, %v1872_v21  ;;  %vm2898_vm10 = vcmp.lt.s32.totalorder %v2642_v22, 2062  ;;  %v3407_v39 = vmul.f32 %v3151_v27, %v3151_v27  ;;  %v2390_v42 = vadd.s32 504, %v4995_v3  ;;  %v1624_v22 = vld [vmem:[%s4456_s18 + $0x210] sm:$0xff] }
 0x2f2   : > { %v3654_v46 = vadd.f32 %v3653_v38, %v3398_v29  ;;  %v1873_v29 = vld [vmem:[%s4462_s26 + $0x1d8] sm:$0xff]  ;;  %v2644_v38 = vadd.s32 %v5000_v5, %v2387_v18  ;;  %v3153_v43 = vsel %vm2897_vm9, %v2127_v25, 0.0  ;;  %vm2899_vm11 = vcmp.lt.s32.totalorder %v2643_v30, 2062 }
 0x2f3   : > { %v2129_v41 = vsub.f32 %v1617_v28, %v1873_v29  ;;  %v3408_v47 = vmul.f32 %v3152_v35, %v3152_v35  ;;  %v2391_v50 = vadd.s32 512, %v4995_v3  ;;  %v3154_v51 = vsel %vm2898_vm10, %v2128_v33, 0.0  ;;  %v1625_v30 = vld [vmem:[%s4456_s18 + $0x218] sm:$0xff] }
 0x2f4   : > { %v3655_v54 = vadd.f32 %v3654_v46, %v3399_v37  ;;  %v1874_v37 = vld [vmem:[%s4462_s26 + $0x1e0] sm:$0xff]  ;;  %v2645_v46 = vadd.s32 %v5000_v5, %v2388_v26  ;;  %vm2900_vm12 = vcmp.lt.s32.totalorder %v2644_v38, 2062  ;;  %v3409_v55 = vmul.f32 %v3153_v43, %v3153_v43 }
 0x2f5   : > { %v2130_v49 = vsub.f32 %v1618_v36, %v1874_v37  ;;  %v2392_v58 = vadd.s32 520, %v4995_v3  ;;  %v3155_v59 = vsel %vm2899_vm11, %v2129_v41, 0.0  ;;  %v3410_v63 = vmul.f32 %v3154_v51, %v3154_v51  ;;  %v1626_v38 = vld [vmem:[%s4456_s18 + $0x220] sm:$0xff] }
 0x2f6   : > { %v3656_v62 = vadd.f32 %v3655_v54, %v3400_v45  ;;  %v1875_v45 = vld [vmem:[%s4462_s26 + $0x1e8] sm:$0xff]  ;;  %v2646_v54 = vadd.s32 %v5000_v5, %v2389_v34  ;;  %vm2901_vm13 = vcmp.lt.s32.totalorder %v2645_v46, 2062  ;;  %v2393_v2 = vadd.s32 528, %v4995_v3 }
 0x2f7   : > { %v2131_v57 = vsub.f32 %v1619_v44, %v1875_v45  ;;  %v3156_v4 = vsel %vm2900_vm12, %v2130_v49, 0.0  ;;  %v3411_v9 = vmul.f32 %v3155_v59, %v3155_v59  ;;  %v2394_v12 = vadd.s32 536, %v4995_v3  ;;  %v1627_v46 = vld [vmem:[%s4456_s18 + $0x228] sm:$0xff] }
 0x2f8   : > { %v3657_v8 = vadd.f32 %v3656_v62, %v3401_v53  ;;  %v1876_v53 = vld [vmem:[%s4462_s26 + $0x1f0] sm:$0xff]  ;;  %v2647_v62 = vadd.s32 %v5000_v5, %v2390_v42  ;;  %vm2902_vm14 = vcmp.lt.s32.totalorder %v2646_v54, 2062  ;;  %v3412_v17 = vmul.f32 %v3156_v4, %v3156_v4 }
 0x2f9   : > { %v2132_v1 = vsub.f32 %v1620_v52, %v1876_v53  ;;  %v3157_v13 = vsel %vm2901_vm13, %v2131_v57, 0.0  ;;  %v2395_v20 = vadd.s32 544, %v4995_v3  ;;  %v2396_v28 = vadd.s32 552, %v4995_v3  ;;  %v1628_v54 = vld [vmem:[%s4456_s18 + $0x230] sm:$0xff] }
 0x2fa   : > { %v3658_v16 = vadd.f32 %v3657_v8, %v3402_v61  ;;  %v1877_v61 = vld [vmem:[%s4462_s26 + $0x1f8] sm:$0xff]  ;;  %v2648_v8 = vadd.s32 %v5000_v5, %v2391_v50  ;;  %vm2903_vm15 = vcmp.lt.s32.totalorder %v2647_v62, 2062  ;;  %v3413_v25 = vmul.f32 %v3157_v13, %v3157_v13 }
 0x2fb   : > { %v2133_v11 = vsub.f32 %v1621_v60, %v1877_v61  ;;  %v3158_v21 = vsel %vm2902_vm14, %v2132_v1, 0.0  ;;  %v2397_v36 = vadd.s32 560, %v4995_v3  ;;  %v2398_v44 = vadd.s32 568, %v4995_v3  ;;  %v1629_v62 = vld [vmem:[%s4456_s18 + $0x238] sm:$0xff] }
 0x2fc   : > { %v3659_v24 = vadd.f32 %v3658_v16, %v3403_v7  ;;  %v1878_v7 = vld [vmem:[%s4462_s26 + $0x200] sm:$0xff]  ;;  %v2649_v16 = vadd.s32 %v5000_v5, %v2392_v58  ;;  %vm2904_vm0 = vcmp.lt.s32.totalorder %v2648_v8, 2062  ;;  %v3414_v33 = vmul.f32 %v3158_v21, %v3158_v21 }
 0x2fd   : > { %v2134_v19 = vsub.f32 %v1622_v6, %v1878_v7  ;;  %v3159_v29 = vsel %vm2903_vm15, %v2133_v11, 0.0  ;;  %v2399_v52 = vadd.s32 576, %v4995_v3  ;;  %v2400_v60 = vadd.s32 584, %v4995_v3  ;;  %v1630_v8 = vld [vmem:[%s4456_s18 + $0x240] sm:$0xff] }
 0x2fe   : > { %v3660_v32 = vadd.f32 %v3659_v24, %v3404_v15  ;;  %v1879_v15 = vld [vmem:[%s4462_s26 + $0x208] sm:$0xff]  ;;  %v2650_v24 = vadd.s32 %v5000_v5, %v2393_v2  ;;  %vm2905_vm1 = vcmp.lt.s32.totalorder %v2649_v16, 2062  ;;  %v3415_v41 = vmul.f32 %v3159_v29, %v3159_v29 }
 0x2ff   : > { %v2135_v27 = vsub.f32 %v1623_v14, %v1879_v15  ;;  %v3160_v37 = vsel %vm2904_vm0, %v2134_v19, 0.0  ;;  %v2401_v6 = vadd.s32 592, %v4995_v3  ;;  %v2402_v14 = vadd.s32 600, %v4995_v3  ;;  %v1631_v16 = vld [vmem:[%s4456_s18 + $0x248] sm:$0xff] }
 0x300   : > { %v3661_v40 = vadd.f32 %v3660_v32, %v3405_v23  ;;  %v1880_v23 = vld [vmem:[%s4462_s26 + $0x210] sm:$0xff]  ;;  %v2651_v32 = vadd.s32 %v5000_v5, %v2394_v12  ;;  %vm2906_vm2 = vcmp.lt.s32.totalorder %v2650_v24, 2062  ;;  %v3416_v49 = vmul.f32 %v3160_v37, %v3160_v37 }
 0x301   : > { %v2136_v35 = vsub.f32 %v1624_v22, %v1880_v23  ;;  %v3161_v45 = vsel %vm2905_vm1, %v2135_v27, 0.0  ;;  %v2403_v22 = vadd.s32 608, %v4995_v3  ;;  %v1632_v24 = vld [vmem:[%s4456_s18 + $0x250] sm:$0xff] }
 0x302   : > { %v3662_v48 = vadd.f32 %v3661_v40, %v3406_v31  ;;  %v1881_v31 = vld [vmem:[%s4462_s26 + $0x218] sm:$0xff]  ;;  %v2652_v40 = vadd.s32 %v5000_v5, %v2395_v20  ;;  %vm2907_vm3 = vcmp.lt.s32.totalorder %v2651_v32, 2062  ;;  %v3417_v57 = vmul.f32 %v3161_v45, %v3161_v45 }
 0x303   : > { %v2137_v43 = vsub.f32 %v1625_v30, %v1881_v31  ;;  %v3162_v53 = vsel %vm2906_vm2, %v2136_v35, 0.0  ;;  %v2404_v30 = vadd.s32 616, %v4995_v3  ;;  %v1633_v32 = vld [vmem:[%s4456_s18 + $0x258] sm:$0xff] }
 0x304   : > { %v3663_v56 = vadd.f32 %v3662_v48, %v3407_v39  ;;  %v1882_v39 = vld [vmem:[%s4462_s26 + $0x220] sm:$0xff]  ;;  %v2653_v48 = vadd.s32 %v5000_v5, %v2396_v28  ;;  %vm2908_vm4 = vcmp.lt.s32.totalorder %v2652_v40, 2062  ;;  %v3418_v1 = vmul.f32 %v3162_v53, %v3162_v53 }
 0x305   : > { %v2138_v51 = vsub.f32 %v1626_v38, %v1882_v39  ;;  %v3163_v61 = vsel %vm2907_vm3, %v2137_v43, 0.0  ;;  %v2405_v38 = vadd.s32 624, %v4995_v3  ;;  %v1634_v40 = vld [vmem:[%s4456_s18 + $0x260] sm:$0xff] }
 0x306   : > { %v3664_v0 = vadd.f32 %v3663_v56, %v3408_v47  ;;  %v1883_v47 = vld [vmem:[%s4462_s26 + $0x228] sm:$0xff]  ;;  %v2654_v56 = vadd.s32 %v5000_v5, %v2397_v36  ;;  %vm2909_vm5 = vcmp.lt.s32.totalorder %v2653_v48, 2062  ;;  %v3419_v11 = vmul.f32 %v3163_v61, %v3163_v61 }
 0x307   : > { %v2139_v59 = vsub.f32 %v1627_v46, %v1883_v47  ;;  %v3164_v7 = vsel %vm2908_vm4, %v2138_v51, 0.0  ;;  %v2406_v46 = vadd.s32 632, %v4995_v3  ;;  %v1635_v48 = vld [vmem:[%s4456_s18 + $0x268] sm:$0xff] }
 0x308   : > { %v3665_v10 = vadd.f32 %v3664_v0, %v3409_v55  ;;  %v1884_v55 = vld [vmem:[%s4462_s26 + $0x230] sm:$0xff]  ;;  %v2655_v0 = vadd.s32 %v5000_v5, %v2398_v44  ;;  %vm2910_vm6 = vcmp.lt.s32.totalorder %v2654_v56, 2062  ;;  %v3420_v19 = vmul.f32 %v3164_v7, %v3164_v7 }
 0x309   : > { %v2140_v4 = vsub.f32 %v1628_v54, %v1884_v55  ;;  %v3165_v15 = vsel %vm2909_vm5, %v2139_v59, 0.0  ;;  %v2407_v54 = vadd.s32 640, %v4995_v3  ;;  %v1636_v56 = vld [vmem:[%s4456_s18 + $0x270] sm:$0xff] }
 0x30a   : > { %v3666_v18 = vadd.f32 %v3665_v10, %v3410_v63  ;;  %v1885_v63 = vld [vmem:[%s4462_s26 + $0x238] sm:$0xff]  ;;  %v2656_v10 = vadd.s32 %v5000_v5, %v2399_v52  ;;  %vm2911_vm7 = vcmp.lt.s32.totalorder %v2655_v0, 2062  ;;  %v3421_v27 = vmul.f32 %v3165_v15, %v3165_v15 }
 0x30b   : > { %v2141_v13 = vsub.f32 %v1629_v62, %v1885_v63  ;;  %v3166_v23 = vsel %vm2910_vm6, %v2140_v4, 0.0  ;;  %v2408_v62 = vadd.s32 648, %v4995_v3  ;;  %v1637_v0 = vld [vmem:[%s4456_s18 + $0x278] sm:$0xff] }
 0x30c   : > { %v3667_v26 = vadd.f32 %v3666_v18, %v3411_v9  ;;  %v1886_v9 = vld [vmem:[%s4462_s26 + $0x240] sm:$0xff]  ;;  %v2657_v18 = vadd.s32 %v5000_v5, %v2400_v60  ;;  %vm2912_vm8 = vcmp.lt.s32.totalorder %v2656_v10, 2062  ;;  %v3422_v35 = vmul.f32 %v3166_v23, %v3166_v23 }
 0x30d   : > { %v2142_v21 = vsub.f32 %v1630_v8, %v1886_v9  ;;  %v3167_v31 = vsel %vm2911_vm7, %v2141_v13, 0.0  ;;  %v2409_v8 = vadd.s32 656, %v4995_v3  ;;  %v1638_v10 = vld [vmem:[%s4456_s18 + $0x280] sm:$0xff] }
 0x30e   : > { %v3668_v34 = vadd.f32 %v3667_v26, %v3412_v17  ;;  %v1887_v17 = vld [vmem:[%s4462_s26 + $0x248] sm:$0xff]  ;;  %v2658_v26 = vadd.s32 %v5000_v5, %v2401_v6  ;;  %vm2913_vm9 = vcmp.lt.s32.totalorder %v2657_v18, 2062  ;;  %v3423_v43 = vmul.f32 %v3167_v31, %v3167_v31 }
 0x30f   : > { %v2143_v29 = vsub.f32 %v1631_v16, %v1887_v17  ;;  %v3168_v39 = vsel %vm2912_vm8, %v2142_v21, 0.0  ;;  %v2410_v16 = vadd.s32 664, %v4995_v3  ;;  %v1639_v18 = vld [vmem:[%s4456_s18 + $0x288] sm:$0xff] }
 0x310   : > { %v3669_v42 = vadd.f32 %v3668_v34, %v3413_v25  ;;  %v1888_v25 = vld [vmem:[%s4462_s26 + $0x250] sm:$0xff]  ;;  %v2659_v34 = vadd.s32 %v5000_v5, %v2402_v14  ;;  %vm2914_vm10 = vcmp.lt.s32.totalorder %v2658_v26, 2062  ;;  %v3424_v51 = vmul.f32 %v3168_v39, %v3168_v39 }
 0x311   : > { %v2144_v37 = vsub.f32 %v1632_v24, %v1888_v25  ;;  %v3169_v47 = vsel %vm2913_vm9, %v2143_v29, 0.0  ;;  %v2411_v24 = vadd.s32 672, %v4995_v3  ;;  %v1640_v26 = vld [vmem:[%s4456_s18 + $0x290] sm:$0xff] }
 0x312   : > { %v3670_v50 = vadd.f32 %v3669_v42, %v3414_v33  ;;  %v1889_v33 = vld [vmem:[%s4462_s26 + $0x258] sm:$0xff]  ;;  %v2660_v42 = vadd.s32 %v5000_v5, %v2403_v22  ;;  %vm2915_vm11 = vcmp.lt.s32.totalorder %v2659_v34, 2062  ;;  %v3425_v59 = vmul.f32 %v3169_v47, %v3169_v47 }
 0x313   : > { %v2145_v45 = vsub.f32 %v1633_v32, %v1889_v33  ;;  %v3170_v55 = vsel %vm2914_vm10, %v2144_v37, 0.0  ;;  %v2412_v32 = vadd.s32 680, %v4995_v3  ;;  %v1641_v34 = vld [vmem:[%s4456_s18 + $0x298] sm:$0xff] }
 0x314   : > { %v3671_v58 = vadd.f32 %v3670_v50, %v3415_v41  ;;  %v1890_v41 = vld [vmem:[%s4462_s26 + $0x260] sm:$0xff]  ;;  %v2661_v50 = vadd.s32 %v5000_v5, %v2404_v30  ;;  %vm2916_vm12 = vcmp.lt.s32.totalorder %v2660_v42, 2062  ;;  %v3426_v4 = vmul.f32 %v3170_v55, %v3170_v55 }
 0x315   : > { %v2146_v53 = vsub.f32 %v1634_v40, %v1890_v41  ;;  %v3171_v63 = vsel %vm2915_vm11, %v2145_v45, 0.0  ;;  %v2413_v40 = vadd.s32 688, %v4995_v3  ;;  %v1642_v42 = vld [vmem:[%s4456_s18 + $0x2a0] sm:$0xff] }
 0x316   : > { %v3672_v2 = vadd.f32 %v3671_v58, %v3416_v49  ;;  %v1891_v49 = vld [vmem:[%s4462_s26 + $0x268] sm:$0xff]  ;;  %v2662_v58 = vadd.s32 %v5000_v5, %v2405_v38  ;;  %vm2917_vm13 = vcmp.lt.s32.totalorder %v2661_v50, 2062  ;;  %v3427_v13 = vmul.f32 %v3171_v63, %v3171_v63 }
 0x317   : > { %v2147_v61 = vsub.f32 %v1635_v48, %v1891_v49  ;;  %v3172_v9 = vsel %vm2916_vm12, %v2146_v53, 0.0  ;;  %v2414_v48 = vadd.s32 696, %v4995_v3  ;;  %v1643_v50 = vld [vmem:[%s4456_s18 + $0x2a8] sm:$0xff] }
 0x318   : > { %v3673_v12 = vadd.f32 %v3672_v2, %v3417_v57  ;;  %v1892_v57 = vld [vmem:[%s4462_s26 + $0x270] sm:$0xff]  ;;  %v2663_v2 = vadd.s32 %v5000_v5, %v2406_v46  ;;  %vm2918_vm14 = vcmp.lt.s32.totalorder %v2662_v58, 2062  ;;  %v3428_v21 = vmul.f32 %v3172_v9, %v3172_v9 }
 0x319   : > { %v2148_v7 = vsub.f32 %v1636_v56, %v1892_v57  ;;  %v3173_v17 = vsel %vm2917_vm13, %v2147_v61, 0.0  ;;  %v2415_v56 = vadd.s32 704, %v4995_v3  ;;  %v1644_v58 = vld [vmem:[%s4456_s18 + $0x2b0] sm:$0xff] }
 0x31a   : > { %v3674_v20 = vadd.f32 %v3673_v12, %v3418_v1  ;;  %v1893_v1 = vld [vmem:[%s4462_s26 + $0x278] sm:$0xff]  ;;  %v2664_v12 = vadd.s32 %v5000_v5, %v2407_v54  ;;  %vm2919_vm15 = vcmp.lt.s32.totalorder %v2663_v2, 2062  ;;  %v3429_v29 = vmul.f32 %v3173_v17, %v3173_v17 }
 0x31b   : > { %v2149_v15 = vsub.f32 %v1637_v0, %v1893_v1  ;;  %v3174_v25 = vsel %vm2918_vm14, %v2148_v7, 0.0  ;;  %v2416_v0 = vadd.s32 712, %v4995_v3  ;;  %v1645_v2 = vld [vmem:[%s4456_s18 + $0x2b8] sm:$0xff] }
 0x31c   : > { %v3675_v28 = vadd.f32 %v3674_v20, %v3419_v11  ;;  %v1894_v11 = vld [vmem:[%s4462_s26 + $0x280] sm:$0xff]  ;;  %v2665_v20 = vadd.s32 %v5000_v5, %v2408_v62  ;;  %vm2920_vm0 = vcmp.lt.s32.totalorder %v2664_v12, 2062  ;;  %v3430_v37 = vmul.f32 %v3174_v25, %v3174_v25 }
 0x31d   : > { %v2150_v23 = vsub.f32 %v1638_v10, %v1894_v11  ;;  %v3175_v33 = vsel %vm2919_vm15, %v2149_v15, 0.0  ;;  %v2417_v10 = vadd.s32 720, %v4995_v3  ;;  %v1646_v12 = vld [vmem:[%s4456_s18 + $0x2c0] sm:$0xff] }
 0x31e   : > { %v3676_v36 = vadd.f32 %v3675_v28, %v3420_v19  ;;  %v1895_v19 = vld [vmem:[%s4462_s26 + $0x288] sm:$0xff]  ;;  %v2666_v28 = vadd.s32 %v5000_v5, %v2409_v8  ;;  %vm2921_vm1 = vcmp.lt.s32.totalorder %v2665_v20, 2062  ;;  %v3431_v45 = vmul.f32 %v3175_v33, %v3175_v33 }
 0x31f   : > { %v2151_v31 = vsub.f32 %v1639_v18, %v1895_v19  ;;  %v3176_v41 = vsel %vm2920_vm0, %v2150_v23, 0.0  ;;  %v2418_v18 = vadd.s32 728, %v4995_v3  ;;  %v1647_v20 = vld [vmem:[%s4456_s18 + $0x2c8] sm:$0xff] }
 0x320   : > { %v3677_v44 = vadd.f32 %v3676_v36, %v3421_v27  ;;  %v1896_v27 = vld [vmem:[%s4462_s26 + $0x290] sm:$0xff]  ;;  %v2667_v36 = vadd.s32 %v5000_v5, %v2410_v16  ;;  %vm2922_vm2 = vcmp.lt.s32.totalorder %v2666_v28, 2062  ;;  %v3432_v53 = vmul.f32 %v3176_v41, %v3176_v41 }
 0x321   : > { %v2152_v39 = vsub.f32 %v1640_v26, %v1896_v27  ;;  %v3177_v49 = vsel %vm2921_vm1, %v2151_v31, 0.0  ;;  %v2419_v26 = vadd.s32 736, %v4995_v3  ;;  %v1648_v28 = vld [vmem:[%s4456_s18 + $0x2d0] sm:$0xff] }
 0x322   : > { %v3678_v52 = vadd.f32 %v3677_v44, %v3422_v35  ;;  %v1897_v35 = vld [vmem:[%s4462_s26 + $0x298] sm:$0xff]  ;;  %v2668_v44 = vadd.s32 %v5000_v5, %v2411_v24  ;;  %vm2923_vm3 = vcmp.lt.s32.totalorder %v2667_v36, 2062  ;;  %v3433_v61 = vmul.f32 %v3177_v49, %v3177_v49 }
 0x323   : > { %v2153_v47 = vsub.f32 %v1641_v34, %v1897_v35  ;;  %v3178_v57 = vsel %vm2922_vm2, %v2152_v39, 0.0  ;;  %v2420_v34 = vadd.s32 744, %v4995_v3  ;;  %v1649_v36 = vld [vmem:[%s4456_s18 + $0x2d8] sm:$0xff] }
 0x324   : > { %v3679_v60 = vadd.f32 %v3678_v52, %v3423_v43  ;;  %v1898_v43 = vld [vmem:[%s4462_s26 + $0x2a0] sm:$0xff]  ;;  %v2669_v52 = vadd.s32 %v5000_v5, %v2412_v32  ;;  %vm2924_vm4 = vcmp.lt.s32.totalorder %v2668_v44, 2062  ;;  %v3434_v7 = vmul.f32 %v3178_v57, %v3178_v57 }
 0x325   : > { %v2154_v55 = vsub.f32 %v1642_v42, %v1898_v43  ;;  %v3179_v1 = vsel %vm2923_vm3, %v2153_v47, 0.0  ;;  %v2421_v42 = vadd.s32 752, %v4995_v3  ;;  %v1650_v44 = vld [vmem:[%s4456_s18 + $0x2e0] sm:$0xff] }
 0x326   : > { %v3680_v6 = vadd.f32 %v3679_v60, %v3424_v51  ;;  %v1899_v51 = vld [vmem:[%s4462_s26 + $0x2a8] sm:$0xff]  ;;  %v2670_v60 = vadd.s32 %v5000_v5, %v2413_v40  ;;  %vm2925_vm5 = vcmp.lt.s32.totalorder %v2669_v52, 2062  ;;  %v3435_v15 = vmul.f32 %v3179_v1, %v3179_v1 }
 0x327   : > { %v2155_v63 = vsub.f32 %v1643_v50, %v1899_v51  ;;  %v3180_v11 = vsel %vm2924_vm4, %v2154_v55, 0.0  ;;  %v2422_v50 = vadd.s32 760, %v4995_v3  ;;  %v1651_v52 = vld [vmem:[%s4456_s18 + $0x2e8] sm:$0xff] }
 0x328   : > { %v3681_v14 = vadd.f32 %v3680_v6, %v3425_v59  ;;  %v1900_v59 = vld [vmem:[%s4462_s26 + $0x2b0] sm:$0xff]  ;;  %v2671_v6 = vadd.s32 %v5000_v5, %v2414_v48  ;;  %vm2926_vm6 = vcmp.lt.s32.totalorder %v2670_v60, 2062  ;;  %v3436_v23 = vmul.f32 %v3180_v11, %v3180_v11 }
 0x329   : > { %v2156_v9 = vsub.f32 %v1644_v58, %v1900_v59  ;;  %v3181_v19 = vsel %vm2925_vm5, %v2155_v63, 0.0  ;;  %v2423_v58 = vadd.s32 768, %v4995_v3  ;;  %v1652_v60 = vld [vmem:[%s4456_s18 + $0x2f0] sm:$0xff] }
 0x32a   : > { %v3682_v22 = vadd.f32 %v3681_v14, %v3426_v4  ;;  %v1901_v4 = vld [vmem:[%s4462_s26 + $0x2b8] sm:$0xff]  ;;  %v2672_v14 = vadd.s32 %v5000_v5, %v2415_v56  ;;  %vm2927_vm7 = vcmp.lt.s32.totalorder %v2671_v6, 2062  ;;  %v3437_v31 = vmul.f32 %v3181_v19, %v3181_v19 }
 0x32b   : > { %v2157_v17 = vsub.f32 %v1645_v2, %v1901_v4  ;;  %v3182_v27 = vsel %vm2926_vm6, %v2156_v9, 0.0  ;;  %v2424_v2 = vadd.s32 776, %v4995_v3  ;;  %v1653_v6 = vld [vmem:[%s4456_s18 + $0x2f8] sm:$0xff] }
 0x32c   : > { %v3683_v30 = vadd.f32 %v3682_v22, %v3427_v13  ;;  %v1902_v13 = vld [vmem:[%s4462_s26 + $0x2c0] sm:$0xff]  ;;  %v2673_v22 = vadd.s32 %v5000_v5, %v2416_v0  ;;  %vm2928_vm8 = vcmp.lt.s32.totalorder %v2672_v14, 2062  ;;  %v3438_v39 = vmul.f32 %v3182_v27, %v3182_v27 }
 0x32d   : > { %v2158_v25 = vsub.f32 %v1646_v12, %v1902_v13  ;;  %v3183_v35 = vsel %vm2927_vm7, %v2157_v17, 0.0  ;;  %v2425_v12 = vadd.s32 784, %v4995_v3  ;;  %v1654_v14 = vld [vmem:[%s4456_s18 + $0x300] sm:$0xff] }
 0x32e   : > { %v3684_v38 = vadd.f32 %v3683_v30, %v3428_v21  ;;  %v1903_v21 = vld [vmem:[%s4462_s26 + $0x2c8] sm:$0xff]  ;;  %v2674_v30 = vadd.s32 %v5000_v5, %v2417_v10  ;;  %vm2929_vm9 = vcmp.lt.s32.totalorder %v2673_v22, 2062  ;;  %v3439_v47 = vmul.f32 %v3183_v35, %v3183_v35 }
 0x32f   : > { %v2159_v33 = vsub.f32 %v1647_v20, %v1903_v21  ;;  %v3184_v43 = vsel %vm2928_vm8, %v2158_v25, 0.0  ;;  %v2426_v20 = vadd.s32 792, %v4995_v3  ;;  %v1655_v22 = vld [vmem:[%s4456_s18 + $0x308] sm:$0xff] }
 0x330   : > { %v3685_v46 = vadd.f32 %v3684_v38, %v3429_v29  ;;  %v1904_v29 = vld [vmem:[%s4462_s26 + $0x2d0] sm:$0xff]  ;;  %v2675_v38 = vadd.s32 %v5000_v5, %v2418_v18  ;;  %vm2930_vm10 = vcmp.lt.s32.totalorder %v2674_v30, 2062  ;;  %v3440_v55 = vmul.f32 %v3184_v43, %v3184_v43 }
 0x331   : > { %v2160_v41 = vsub.f32 %v1648_v28, %v1904_v29  ;;  %v3185_v51 = vsel %vm2929_vm9, %v2159_v33, 0.0  ;;  %v2427_v28 = vadd.s32 800, %v4995_v3  ;;  %v1656_v30 = vld [vmem:[%s4456_s18 + $0x310] sm:$0xff] }
 0x332   : > { %v3686_v54 = vadd.f32 %v3685_v46, %v3430_v37  ;;  %v1905_v37 = vld [vmem:[%s4462_s26 + $0x2d8] sm:$0xff]  ;;  %v2676_v46 = vadd.s32 %v5000_v5, %v2419_v26  ;;  %vm2931_vm11 = vcmp.lt.s32.totalorder %v2675_v38, 2062  ;;  %v3441_v63 = vmul.f32 %v3185_v51, %v3185_v51 }
 0x333   : > { %v2161_v49 = vsub.f32 %v1649_v36, %v1905_v37  ;;  %v3186_v59 = vsel %vm2930_vm10, %v2160_v41, 0.0  ;;  %v2428_v36 = vadd.s32 808, %v4995_v3  ;;  %v1657_v38 = vld [vmem:[%s4456_s18 + $0x318] sm:$0xff] }
 0x334   : > { %v3687_v62 = vadd.f32 %v3686_v54, %v3431_v45  ;;  %v1906_v45 = vld [vmem:[%s4462_s26 + $0x2e0] sm:$0xff]  ;;  %v2677_v54 = vadd.s32 %v5000_v5, %v2420_v34  ;;  %vm2932_vm12 = vcmp.lt.s32.totalorder %v2676_v46, 2062  ;;  %v3442_v9 = vmul.f32 %v3186_v59, %v3186_v59 }
 0x335   : > { %v2162_v57 = vsub.f32 %v1650_v44, %v1906_v45  ;;  %v3187_v4 = vsel %vm2931_vm11, %v2161_v49, 0.0  ;;  %v2429_v44 = vadd.s32 816, %v4995_v3  ;;  %v1658_v46 = vld [vmem:[%s4456_s18 + $0x320] sm:$0xff] }
 0x336   : > { %v3688_v8 = vadd.f32 %v3687_v62, %v3432_v53  ;;  %v1907_v53 = vld [vmem:[%s4462_s26 + $0x2e8] sm:$0xff]  ;;  %v2678_v62 = vadd.s32 %v5000_v5, %v2421_v42  ;;  %vm2933_vm13 = vcmp.lt.s32.totalorder %v2677_v54, 2062  ;;  %v3443_v17 = vmul.f32 %v3187_v4, %v3187_v4 }
 0x337   : > { %v2163_v1 = vsub.f32 %v1651_v52, %v1907_v53  ;;  %v3188_v13 = vsel %vm2932_vm12, %v2162_v57, 0.0  ;;  %v2430_v52 = vadd.s32 824, %v4995_v3  ;;  %v1659_v54 = vld [vmem:[%s4456_s18 + $0x328] sm:$0xff] }
 0x338   : > { %v3689_v16 = vadd.f32 %v3688_v8, %v3433_v61  ;;  %v1908_v61 = vld [vmem:[%s4462_s26 + $0x2f0] sm:$0xff]  ;;  %v2679_v8 = vadd.s32 %v5000_v5, %v2422_v50  ;;  %vm2934_vm14 = vcmp.lt.s32.totalorder %v2678_v62, 2062  ;;  %v3444_v25 = vmul.f32 %v3188_v13, %v3188_v13 }
 0x339   : > { %v2164_v11 = vsub.f32 %v1652_v60, %v1908_v61  ;;  %v3189_v21 = vsel %vm2933_vm13, %v2163_v1, 0.0  ;;  %v2431_v60 = vadd.s32 832, %v4995_v3  ;;  %v1660_v62 = vld [vmem:[%s4456_s18 + $0x330] sm:$0xff] }
 0x33a   : > { %v3690_v24 = vadd.f32 %v3689_v16, %v3434_v7  ;;  %v1909_v7 = vld [vmem:[%s4462_s26 + $0x2f8] sm:$0xff]  ;;  %v2680_v16 = vadd.s32 %v5000_v5, %v2423_v58  ;;  %vm2935_vm15 = vcmp.lt.s32.totalorder %v2679_v8, 2062  ;;  %v3445_v33 = vmul.f32 %v3189_v21, %v3189_v21 }
 0x33b   : > { %v2165_v19 = vsub.f32 %v1653_v6, %v1909_v7  ;;  %v3190_v29 = vsel %vm2934_vm14, %v2164_v11, 0.0  ;;  %v2432_v6 = vadd.s32 840, %v4995_v3  ;;  %v1661_v8 = vld [vmem:[%s4456_s18 + $0x338] sm:$0xff] }
 0x33c   : > { %v3691_v32 = vadd.f32 %v3690_v24, %v3435_v15  ;;  %v1910_v15 = vld [vmem:[%s4462_s26 + $0x300] sm:$0xff]  ;;  %v2681_v24 = vadd.s32 %v5000_v5, %v2424_v2  ;;  %vm2936_vm0 = vcmp.lt.s32.totalorder %v2680_v16, 2062  ;;  %v3446_v41 = vmul.f32 %v3190_v29, %v3190_v29 }
 0x33d   : > { %v2166_v27 = vsub.f32 %v1654_v14, %v1910_v15  ;;  %v3191_v37 = vsel %vm2935_vm15, %v2165_v19, 0.0  ;;  %v2433_v14 = vadd.s32 848, %v4995_v3  ;;  %v1662_v16 = vld [vmem:[%s4456_s18 + $0x340] sm:$0xff] }
 0x33e   : > { %v3692_v40 = vadd.f32 %v3691_v32, %v3436_v23  ;;  %v1911_v23 = vld [vmem:[%s4462_s26 + $0x308] sm:$0xff]  ;;  %v2682_v32 = vadd.s32 %v5000_v5, %v2425_v12  ;;  %vm2937_vm1 = vcmp.lt.s32.totalorder %v2681_v24, 2062  ;;  %v3447_v49 = vmul.f32 %v3191_v37, %v3191_v37 }
 0x33f   : > { %v2167_v35 = vsub.f32 %v1655_v22, %v1911_v23  ;;  %v3192_v45 = vsel %vm2936_vm0, %v2166_v27, 0.0  ;;  %v2434_v22 = vadd.s32 856, %v4995_v3  ;;  %v1663_v24 = vld [vmem:[%s4456_s18 + $0x348] sm:$0xff] }
 0x340   : > { %v3693_v48 = vadd.f32 %v3692_v40, %v3437_v31  ;;  %v1912_v31 = vld [vmem:[%s4462_s26 + $0x310] sm:$0xff]  ;;  %v2683_v40 = vadd.s32 %v5000_v5, %v2426_v20  ;;  %vm2938_vm2 = vcmp.lt.s32.totalorder %v2682_v32, 2062  ;;  %v3448_v57 = vmul.f32 %v3192_v45, %v3192_v45 }
 0x341   : > { %v2168_v43 = vsub.f32 %v1656_v30, %v1912_v31  ;;  %v3193_v53 = vsel %vm2937_vm1, %v2167_v35, 0.0  ;;  %v2435_v30 = vadd.s32 864, %v4995_v3  ;;  %v1664_v32 = vld [vmem:[%s4456_s18 + $0x350] sm:$0xff] }
 0x342   : > { %v3694_v56 = vadd.f32 %v3693_v48, %v3438_v39  ;;  %v1913_v39 = vld [vmem:[%s4462_s26 + $0x318] sm:$0xff]  ;;  %v2684_v48 = vadd.s32 %v5000_v5, %v2427_v28  ;;  %vm2939_vm3 = vcmp.lt.s32.totalorder %v2683_v40, 2062  ;;  %v3449_v1 = vmul.f32 %v3193_v53, %v3193_v53 }
 0x343   : > { %v2169_v51 = vsub.f32 %v1657_v38, %v1913_v39  ;;  %v3194_v61 = vsel %vm2938_vm2, %v2168_v43, 0.0  ;;  %v2436_v38 = vadd.s32 872, %v4995_v3  ;;  %v1665_v40 = vld [vmem:[%s4456_s18 + $0x358] sm:$0xff] }
 0x344   : > { %v3695_v0 = vadd.f32 %v3694_v56, %v3439_v47  ;;  %v1914_v47 = vld [vmem:[%s4462_s26 + $0x320] sm:$0xff]  ;;  %v2685_v56 = vadd.s32 %v5000_v5, %v2428_v36  ;;  %vm2940_vm4 = vcmp.lt.s32.totalorder %v2684_v48, 2062  ;;  %v3450_v11 = vmul.f32 %v3194_v61, %v3194_v61 }
 0x345   : > { %v2170_v59 = vsub.f32 %v1658_v46, %v1914_v47  ;;  %v3195_v7 = vsel %vm2939_vm3, %v2169_v51, 0.0  ;;  %v2437_v46 = vadd.s32 880, %v4995_v3  ;;  %v1666_v48 = vld [vmem:[%s4456_s18 + $0x360] sm:$0xff] }
 0x346   : > { %v3696_v10 = vadd.f32 %v3695_v0, %v3440_v55  ;;  %v1915_v55 = vld [vmem:[%s4462_s26 + $0x328] sm:$0xff]  ;;  %v2686_v0 = vadd.s32 %v5000_v5, %v2429_v44  ;;  %vm2941_vm5 = vcmp.lt.s32.totalorder %v2685_v56, 2062  ;;  %v3451_v19 = vmul.f32 %v3195_v7, %v3195_v7 }
 0x347   : > { %v2171_v4 = vsub.f32 %v1659_v54, %v1915_v55  ;;  %v3196_v15 = vsel %vm2940_vm4, %v2170_v59, 0.0  ;;  %v2438_v54 = vadd.s32 888, %v4995_v3  ;;  %v1667_v56 = vld [vmem:[%s4456_s18 + $0x368] sm:$0xff] }
 0x348   : > { %v3697_v18 = vadd.f32 %v3696_v10, %v3441_v63  ;;  %v1916_v63 = vld [vmem:[%s4462_s26 + $0x330] sm:$0xff]  ;;  %v2687_v10 = vadd.s32 %v5000_v5, %v2430_v52  ;;  %vm2942_vm6 = vcmp.lt.s32.totalorder %v2686_v0, 2062  ;;  %v3452_v27 = vmul.f32 %v3196_v15, %v3196_v15 }
 0x349   : > { %v2172_v13 = vsub.f32 %v1660_v62, %v1916_v63  ;;  %v3197_v23 = vsel %vm2941_vm5, %v2171_v4, 0.0  ;;  %v2439_v62 = vadd.s32 896, %v4995_v3  ;;  %v1668_v0 = vld [vmem:[%s4456_s18 + $0x370] sm:$0xff] }
 0x34a   : > { %v3698_v26 = vadd.f32 %v3697_v18, %v3442_v9  ;;  %v1917_v9 = vld [vmem:[%s4462_s26 + $0x338] sm:$0xff]  ;;  %v2688_v18 = vadd.s32 %v5000_v5, %v2431_v60  ;;  %vm2943_vm7 = vcmp.lt.s32.totalorder %v2687_v10, 2062  ;;  %v3453_v35 = vmul.f32 %v3197_v23, %v3197_v23 }
 0x34b   : > { %v2173_v21 = vsub.f32 %v1661_v8, %v1917_v9  ;;  %v3198_v31 = vsel %vm2942_vm6, %v2172_v13, 0.0  ;;  %v2440_v8 = vadd.s32 904, %v4995_v3  ;;  %v1669_v10 = vld [vmem:[%s4456_s18 + $0x378] sm:$0xff] }
 0x34c   : > { %v3699_v34 = vadd.f32 %v3698_v26, %v3443_v17  ;;  %v1918_v17 = vld [vmem:[%s4462_s26 + $0x340] sm:$0xff]  ;;  %v2689_v26 = vadd.s32 %v5000_v5, %v2432_v6  ;;  %vm2944_vm8 = vcmp.lt.s32.totalorder %v2688_v18, 2062  ;;  %v3454_v43 = vmul.f32 %v3198_v31, %v3198_v31 }
 0x34d   : > { %v2174_v29 = vsub.f32 %v1662_v16, %v1918_v17  ;;  %v3199_v39 = vsel %vm2943_vm7, %v2173_v21, 0.0  ;;  %v2441_v16 = vadd.s32 912, %v4995_v3  ;;  %v1670_v18 = vld [vmem:[%s4456_s18 + $0x380] sm:$0xff] }
 0x34e   : > { %v3700_v42 = vadd.f32 %v3699_v34, %v3444_v25  ;;  %v1919_v25 = vld [vmem:[%s4462_s26 + $0x348] sm:$0xff]  ;;  %v2690_v34 = vadd.s32 %v5000_v5, %v2433_v14  ;;  %vm2945_vm9 = vcmp.lt.s32.totalorder %v2689_v26, 2062  ;;  %v3455_v51 = vmul.f32 %v3199_v39, %v3199_v39 }
 0x34f   : > { %v2175_v37 = vsub.f32 %v1663_v24, %v1919_v25  ;;  %v3200_v47 = vsel %vm2944_vm8, %v2174_v29, 0.0  ;;  %v2442_v24 = vadd.s32 920, %v4995_v3  ;;  %v1671_v26 = vld [vmem:[%s4456_s18 + $0x388] sm:$0xff] }
 0x350   : > { %v3701_v50 = vadd.f32 %v3700_v42, %v3445_v33  ;;  %v1920_v33 = vld [vmem:[%s4462_s26 + $0x350] sm:$0xff]  ;;  %v2691_v42 = vadd.s32 %v5000_v5, %v2434_v22  ;;  %vm2946_vm10 = vcmp.lt.s32.totalorder %v2690_v34, 2062  ;;  %v3456_v59 = vmul.f32 %v3200_v47, %v3200_v47 }
 0x351   : > { %v2176_v45 = vsub.f32 %v1664_v32, %v1920_v33  ;;  %v3201_v55 = vsel %vm2945_vm9, %v2175_v37, 0.0  ;;  %v2443_v32 = vadd.s32 928, %v4995_v3  ;;  %v1672_v34 = vld [vmem:[%s4456_s18 + $0x390] sm:$0xff] }
 0x352   : > { %v3702_v58 = vadd.f32 %v3701_v50, %v3446_v41  ;;  %v1921_v41 = vld [vmem:[%s4462_s26 + $0x358] sm:$0xff]  ;;  %v2692_v50 = vadd.s32 %v5000_v5, %v2435_v30  ;;  %vm2947_vm11 = vcmp.lt.s32.totalorder %v2691_v42, 2062  ;;  %v3457_v4 = vmul.f32 %v3201_v55, %v3201_v55 }
 0x353   : > { %v2177_v53 = vsub.f32 %v1665_v40, %v1921_v41  ;;  %v3202_v63 = vsel %vm2946_vm10, %v2176_v45, 0.0  ;;  %v2444_v40 = vadd.s32 936, %v4995_v3  ;;  %v1673_v42 = vld [vmem:[%s4456_s18 + $0x398] sm:$0xff] }
 0x354   : > { %v3703_v2 = vadd.f32 %v3702_v58, %v3447_v49  ;;  %v1922_v49 = vld [vmem:[%s4462_s26 + $0x360] sm:$0xff]  ;;  %v2693_v58 = vadd.s32 %v5000_v5, %v2436_v38  ;;  %vm2948_vm12 = vcmp.lt.s32.totalorder %v2692_v50, 2062  ;;  %v3458_v13 = vmul.f32 %v3202_v63, %v3202_v63 }
 0x355   : > { %v2178_v61 = vsub.f32 %v1666_v48, %v1922_v49  ;;  %v3203_v9 = vsel %vm2947_vm11, %v2177_v53, 0.0  ;;  %v2445_v48 = vadd.s32 944, %v4995_v3  ;;  %v1674_v50 = vld [vmem:[%s4456_s18 + $0x3a0] sm:$0xff] }
 0x356   : > { %v3704_v12 = vadd.f32 %v3703_v2, %v3448_v57  ;;  %v1923_v57 = vld [vmem:[%s4462_s26 + $0x368] sm:$0xff]  ;;  %v2694_v2 = vadd.s32 %v5000_v5, %v2437_v46  ;;  %vm2949_vm13 = vcmp.lt.s32.totalorder %v2693_v58, 2062  ;;  %v3459_v21 = vmul.f32 %v3203_v9, %v3203_v9 }
 0x357   : > { %v2179_v7 = vsub.f32 %v1667_v56, %v1923_v57  ;;  %v3204_v17 = vsel %vm2948_vm12, %v2178_v61, 0.0  ;;  %v2446_v56 = vadd.s32 952, %v4995_v3  ;;  %v1675_v58 = vld [vmem:[%s4456_s18 + $0x3a8] sm:$0xff] }
 0x358   : > { %v3705_v20 = vadd.f32 %v3704_v12, %v3449_v1  ;;  %v1924_v1 = vld [vmem:[%s4462_s26 + $0x370] sm:$0xff]  ;;  %v2695_v12 = vadd.s32 %v5000_v5, %v2438_v54  ;;  %vm2950_vm14 = vcmp.lt.s32.totalorder %v2694_v2, 2062  ;;  %v3460_v29 = vmul.f32 %v3204_v17, %v3204_v17 }
 0x359   : > { %v2180_v15 = vsub.f32 %v1668_v0, %v1924_v1  ;;  %v3205_v25 = vsel %vm2949_vm13, %v2179_v7, 0.0  ;;  %v2447_v0 = vadd.s32 960, %v4995_v3  ;;  %v1676_v2 = vld [vmem:[%s4456_s18 + $0x3b0] sm:$0xff] }
 0x35a   : > { %v3706_v28 = vadd.f32 %v3705_v20, %v3450_v11  ;;  %v1925_v11 = vld [vmem:[%s4462_s26 + $0x378] sm:$0xff]  ;;  %v2696_v20 = vadd.s32 %v5000_v5, %v2439_v62  ;;  %vm2951_vm15 = vcmp.lt.s32.totalorder %v2695_v12, 2062  ;;  %v3461_v37 = vmul.f32 %v3205_v25, %v3205_v25 }
 0x35b   : > { %v2181_v23 = vsub.f32 %v1669_v10, %v1925_v11  ;;  %v3206_v33 = vsel %vm2950_vm14, %v2180_v15, 0.0  ;;  %v2448_v10 = vadd.s32 968, %v4995_v3  ;;  %v1677_v12 = vld [vmem:[%s4456_s18 + $0x3b8] sm:$0xff] }
 0x35c   : > { %v3707_v36 = vadd.f32 %v3706_v28, %v3451_v19  ;;  %v1926_v19 = vld [vmem:[%s4462_s26 + $0x380] sm:$0xff]  ;;  %v2697_v28 = vadd.s32 %v5000_v5, %v2440_v8  ;;  %vm2952_vm0 = vcmp.lt.s32.totalorder %v2696_v20, 2062  ;;  %v3462_v45 = vmul.f32 %v3206_v33, %v3206_v33 }
 0x35d   : > { %v2182_v31 = vsub.f32 %v1670_v18, %v1926_v19  ;;  %v3207_v41 = vsel %vm2951_vm15, %v2181_v23, 0.0  ;;  %v2449_v18 = vadd.s32 976, %v4995_v3  ;;  %v1678_v20 = vld [vmem:[%s4456_s18 + $0x3c0] sm:$0xff] }
 0x35e   : > { %v3708_v44 = vadd.f32 %v3707_v36, %v3452_v27  ;;  %v1927_v27 = vld [vmem:[%s4462_s26 + $0x388] sm:$0xff]  ;;  %v2698_v36 = vadd.s32 %v5000_v5, %v2441_v16  ;;  %vm2953_vm1 = vcmp.lt.s32.totalorder %v2697_v28, 2062  ;;  %v3463_v53 = vmul.f32 %v3207_v41, %v3207_v41 }
 0x35f   : > { %v2183_v39 = vsub.f32 %v1671_v26, %v1927_v27  ;;  %v3208_v49 = vsel %vm2952_vm0, %v2182_v31, 0.0  ;;  %v2450_v26 = vadd.s32 984, %v4995_v3  ;;  %v1679_v28 = vld [vmem:[%s4456_s18 + $0x3c8] sm:$0xff] }
 0x360   : > { %v3709_v52 = vadd.f32 %v3708_v44, %v3453_v35  ;;  %v1928_v35 = vld [vmem:[%s4462_s26 + $0x390] sm:$0xff]  ;;  %v2699_v44 = vadd.s32 %v5000_v5, %v2442_v24  ;;  %vm2954_vm2 = vcmp.lt.s32.totalorder %v2698_v36, 2062  ;;  %v3464_v61 = vmul.f32 %v3208_v49, %v3208_v49 }
 0x361   : > { %v2184_v47 = vsub.f32 %v1672_v34, %v1928_v35  ;;  %v3209_v57 = vsel %vm2953_vm1, %v2183_v39, 0.0  ;;  %v2451_v34 = vadd.s32 992, %v4995_v3  ;;  %v1680_v36 = vld [vmem:[%s4456_s18 + $0x3d0] sm:$0xff] }
 0x362   : > { %v3710_v60 = vadd.f32 %v3709_v52, %v3454_v43  ;;  %v1929_v43 = vld [vmem:[%s4462_s26 + $0x398] sm:$0xff]  ;;  %v2700_v52 = vadd.s32 %v5000_v5, %v2443_v32  ;;  %vm2955_vm3 = vcmp.lt.s32.totalorder %v2699_v44, 2062  ;;  %v3465_v7 = vmul.f32 %v3209_v57, %v3209_v57 }
 0x363   : > { %v2185_v55 = vsub.f32 %v1673_v42, %v1929_v43  ;;  %v3210_v1 = vsel %vm2954_vm2, %v2184_v47, 0.0  ;;  %v2452_v42 = vadd.s32 1000, %v4995_v3  ;;  %v1681_v44 = vld [vmem:[%s4456_s18 + $0x3d8] sm:$0xff] }
 0x364   : > { %v3711_v6 = vadd.f32 %v3710_v60, %v3455_v51  ;;  %v1930_v51 = vld [vmem:[%s4462_s26 + $0x3a0] sm:$0xff]  ;;  %v2701_v60 = vadd.s32 %v5000_v5, %v2444_v40  ;;  %vm2956_vm4 = vcmp.lt.s32.totalorder %v2700_v52, 2062  ;;  %v3466_v15 = vmul.f32 %v3210_v1, %v3210_v1 }
 0x365   : > { %v2186_v63 = vsub.f32 %v1674_v50, %v1930_v51  ;;  %v3211_v11 = vsel %vm2955_vm3, %v2185_v55, 0.0  ;;  %v2453_v50 = vadd.s32 1008, %v4995_v3  ;;  %v1682_v52 = vld [vmem:[%s4456_s18 + $0x3e0] sm:$0xff] }
 0x366   : > { %v3712_v14 = vadd.f32 %v3711_v6, %v3456_v59  ;;  %v1931_v59 = vld [vmem:[%s4462_s26 + $0x3a8] sm:$0xff]  ;;  %v2702_v6 = vadd.s32 %v5000_v5, %v2445_v48  ;;  %vm2957_vm5 = vcmp.lt.s32.totalorder %v2701_v60, 2062  ;;  %v3467_v23 = vmul.f32 %v3211_v11, %v3211_v11 }
 0x367   : > { %v2187_v9 = vsub.f32 %v1675_v58, %v1931_v59  ;;  %v3212_v19 = vsel %vm2956_vm4, %v2186_v63, 0.0  ;;  %v2454_v58 = vadd.s32 1016, %v4995_v3  ;;  %v1683_v60 = vld [vmem:[%s4456_s18 + $0x3e8] sm:$0xff] }
 0x368   : > { %v3713_v22 = vadd.f32 %v3712_v14, %v3457_v4  ;;  %v1932_v4 = vld [vmem:[%s4462_s26 + $0x3b0] sm:$0xff]  ;;  %v2703_v14 = vadd.s32 %v5000_v5, %v2446_v56  ;;  %vm2958_vm6 = vcmp.lt.s32.totalorder %v2702_v6, 2062  ;;  %v3468_v31 = vmul.f32 %v3212_v19, %v3212_v19 }
 0x369   : > { %v2188_v17 = vsub.f32 %v1676_v2, %v1932_v4  ;;  %v3213_v27 = vsel %vm2957_vm5, %v2187_v9, 0.0  ;;  %v2455_v2 = vadd.s32 1024, %v4995_v3  ;;  %v1684_v6 = vld [vmem:[%s4456_s18 + $0x3f0] sm:$0xff] }
 0x36a   : > { %v3714_v30 = vadd.f32 %v3713_v22, %v3458_v13  ;;  %v1933_v13 = vld [vmem:[%s4462_s26 + $0x3b8] sm:$0xff]  ;;  %v2704_v22 = vadd.s32 %v5000_v5, %v2447_v0  ;;  %vm2959_vm7 = vcmp.lt.s32.totalorder %v2703_v14, 2062  ;;  %v3469_v39 = vmul.f32 %v3213_v27, %v3213_v27 }
 0x36b   : > { %v2189_v25 = vsub.f32 %v1677_v12, %v1933_v13  ;;  %v3214_v35 = vsel %vm2958_vm6, %v2188_v17, 0.0  ;;  %v2456_v12 = vadd.s32 1032, %v4995_v3  ;;  %v1685_v14 = vld [vmem:[%s4456_s18 + $0x3f8] sm:$0xff] }
 0x36c   : > { %v3715_v38 = vadd.f32 %v3714_v30, %v3459_v21  ;;  %v1934_v21 = vld [vmem:[%s4462_s26 + $0x3c0] sm:$0xff]  ;;  %v2705_v30 = vadd.s32 %v5000_v5, %v2448_v10  ;;  %vm2960_vm8 = vcmp.lt.s32.totalorder %v2704_v22, 2062  ;;  %v3470_v47 = vmul.f32 %v3214_v35, %v3214_v35 }
 0x36d   : > { %v2190_v33 = vsub.f32 %v1678_v20, %v1934_v21  ;;  %v3215_v43 = vsel %vm2959_vm7, %v2189_v25, 0.0  ;;  %v2457_v20 = vadd.s32 1040, %v4995_v3  ;;  %v1686_v22 = vld [vmem:[%s4456_s18 + $0x400] sm:$0xff] }
 0x36e   : > { %v3716_v46 = vadd.f32 %v3715_v38, %v3460_v29  ;;  %v1935_v29 = vld [vmem:[%s4462_s26 + $0x3c8] sm:$0xff]  ;;  %v2706_v38 = vadd.s32 %v5000_v5, %v2449_v18  ;;  %vm2961_vm9 = vcmp.lt.s32.totalorder %v2705_v30, 2062  ;;  %v3471_v55 = vmul.f32 %v3215_v43, %v3215_v43 }
 0x36f   : > { %v2191_v41 = vsub.f32 %v1679_v28, %v1935_v29  ;;  %v3216_v51 = vsel %vm2960_vm8, %v2190_v33, 0.0  ;;  %v2458_v28 = vadd.s32 1048, %v4995_v3  ;;  %v1687_v30 = vld [vmem:[%s4456_s18 + $0x408] sm:$0xff] }
 0x370   : > { %v3717_v54 = vadd.f32 %v3716_v46, %v3461_v37  ;;  %v1936_v37 = vld [vmem:[%s4462_s26 + $0x3d0] sm:$0xff]  ;;  %v2707_v46 = vadd.s32 %v5000_v5, %v2450_v26  ;;  %vm2962_vm10 = vcmp.lt.s32.totalorder %v2706_v38, 2062  ;;  %v3472_v63 = vmul.f32 %v3216_v51, %v3216_v51 }
 0x371   : > { %v2192_v49 = vsub.f32 %v1680_v36, %v1936_v37  ;;  %v3217_v59 = vsel %vm2961_vm9, %v2191_v41, 0.0  ;;  %v2459_v36 = vadd.s32 1056, %v4995_v3  ;;  %v1688_v38 = vld [vmem:[%s4456_s18 + $0x410] sm:$0xff] }
 0x372   : > { %v3718_v62 = vadd.f32 %v3717_v54, %v3462_v45  ;;  %v1937_v45 = vld [vmem:[%s4462_s26 + $0x3d8] sm:$0xff]  ;;  %v2708_v54 = vadd.s32 %v5000_v5, %v2451_v34  ;;  %vm2963_vm11 = vcmp.lt.s32.totalorder %v2707_v46, 2062  ;;  %v3473_v9 = vmul.f32 %v3217_v59, %v3217_v59 }
 0x373   : > { %v2193_v57 = vsub.f32 %v1681_v44, %v1937_v45  ;;  %v3218_v4 = vsel %vm2962_vm10, %v2192_v49, 0.0  ;;  %v2460_v44 = vadd.s32 1064, %v4995_v3  ;;  %v1689_v46 = vld [vmem:[%s4456_s18 + $0x418] sm:$0xff] }
 0x374   : > { %v3719_v8 = vadd.f32 %v3718_v62, %v3463_v53  ;;  %v1938_v53 = vld [vmem:[%s4462_s26 + $0x3e0] sm:$0xff]  ;;  %v2709_v62 = vadd.s32 %v5000_v5, %v2452_v42  ;;  %vm2964_vm12 = vcmp.lt.s32.totalorder %v2708_v54, 2062  ;;  %v3474_v17 = vmul.f32 %v3218_v4, %v3218_v4 }
 0x375   : > { %v2194_v1 = vsub.f32 %v1682_v52, %v1938_v53  ;;  %v3219_v13 = vsel %vm2963_vm11, %v2193_v57, 0.0  ;;  %v2461_v52 = vadd.s32 1072, %v4995_v3  ;;  %v1690_v54 = vld [vmem:[%s4456_s18 + $0x420] sm:$0xff] }
 0x376   : > { %v3720_v16 = vadd.f32 %v3719_v8, %v3464_v61  ;;  %v1939_v61 = vld [vmem:[%s4462_s26 + $0x3e8] sm:$0xff]  ;;  %v2710_v8 = vadd.s32 %v5000_v5, %v2453_v50  ;;  %vm2965_vm13 = vcmp.lt.s32.totalorder %v2709_v62, 2062  ;;  %v3475_v25 = vmul.f32 %v3219_v13, %v3219_v13 }
 0x377   : > { %v2195_v11 = vsub.f32 %v1683_v60, %v1939_v61  ;;  %v3220_v21 = vsel %vm2964_vm12, %v2194_v1, 0.0  ;;  %v2462_v60 = vadd.s32 1080, %v4995_v3  ;;  %v1691_v62 = vld [vmem:[%s4456_s18 + $0x428] sm:$0xff] }
 0x378   : > { %v3721_v24 = vadd.f32 %v3720_v16, %v3465_v7  ;;  %v1940_v7 = vld [vmem:[%s4462_s26 + $0x3f0] sm:$0xff]  ;;  %v2711_v16 = vadd.s32 %v5000_v5, %v2454_v58  ;;  %vm2966_vm14 = vcmp.lt.s32.totalorder %v2710_v8, 2062  ;;  %v3476_v33 = vmul.f32 %v3220_v21, %v3220_v21 }
 0x379   : > { %v2196_v19 = vsub.f32 %v1684_v6, %v1940_v7  ;;  %v3221_v29 = vsel %vm2965_vm13, %v2195_v11, 0.0  ;;  %v2463_v6 = vadd.s32 1088, %v4995_v3  ;;  %v1692_v8 = vld [vmem:[%s4456_s18 + $0x430] sm:$0xff] }
 0x37a   : > { %v3722_v32 = vadd.f32 %v3721_v24, %v3466_v15  ;;  %v1941_v15 = vld [vmem:[%s4462_s26 + $0x3f8] sm:$0xff]  ;;  %v2712_v24 = vadd.s32 %v5000_v5, %v2455_v2  ;;  %vm2967_vm15 = vcmp.lt.s32.totalorder %v2711_v16, 2062  ;;  %v3477_v41 = vmul.f32 %v3221_v29, %v3221_v29 }
 0x37b   : > { %v2197_v27 = vsub.f32 %v1685_v14, %v1941_v15  ;;  %v3222_v37 = vsel %vm2966_vm14, %v2196_v19, 0.0  ;;  %v2464_v14 = vadd.s32 1096, %v4995_v3  ;;  %v1693_v16 = vld [vmem:[%s4456_s18 + $0x438] sm:$0xff] }
 0x37c   : > { %v3723_v40 = vadd.f32 %v3722_v32, %v3467_v23  ;;  %v1942_v23 = vld [vmem:[%s4462_s26 + $0x400] sm:$0xff]  ;;  %v2713_v32 = vadd.s32 %v5000_v5, %v2456_v12  ;;  %vm2968_vm0 = vcmp.lt.s32.totalorder %v2712_v24, 2062  ;;  %v3478_v49 = vmul.f32 %v3222_v37, %v3222_v37 }
 0x37d   : > { %v2198_v35 = vsub.f32 %v1686_v22, %v1942_v23  ;;  %v3223_v45 = vsel %vm2967_vm15, %v2197_v27, 0.0  ;;  %v2465_v22 = vadd.s32 1104, %v4995_v3  ;;  %v1694_v24 = vld [vmem:[%s4456_s18 + $0x440] sm:$0xff] }
 0x37e   : > { %v3724_v48 = vadd.f32 %v3723_v40, %v3468_v31  ;;  %v1943_v31 = vld [vmem:[%s4462_s26 + $0x408] sm:$0xff]  ;;  %v2714_v40 = vadd.s32 %v5000_v5, %v2457_v20  ;;  %vm2969_vm1 = vcmp.lt.s32.totalorder %v2713_v32, 2062  ;;  %v3479_v57 = vmul.f32 %v3223_v45, %v3223_v45 }
 0x37f   : > { %v2199_v43 = vsub.f32 %v1687_v30, %v1943_v31  ;;  %v3224_v53 = vsel %vm2968_vm0, %v2198_v35, 0.0  ;;  %v2466_v30 = vadd.s32 1112, %v4995_v3  ;;  %v1695_v32 = vld [vmem:[%s4456_s18 + $0x448] sm:$0xff] }
 0x380   : > { %v3725_v56 = vadd.f32 %v3724_v48, %v3469_v39  ;;  %v1944_v39 = vld [vmem:[%s4462_s26 + $0x410] sm:$0xff]  ;;  %v2715_v48 = vadd.s32 %v5000_v5, %v2458_v28  ;;  %vm2970_vm2 = vcmp.lt.s32.totalorder %v2714_v40, 2062  ;;  %v3480_v1 = vmul.f32 %v3224_v53, %v3224_v53 }
 0x381   : > { %v2200_v51 = vsub.f32 %v1688_v38, %v1944_v39  ;;  %v3225_v61 = vsel %vm2969_vm1, %v2199_v43, 0.0  ;;  %v2467_v38 = vadd.s32 1120, %v4995_v3  ;;  %v1696_v40 = vld [vmem:[%s4456_s18 + $0x450] sm:$0xff] }
 0x382   : > { %v3726_v0 = vadd.f32 %v3725_v56, %v3470_v47  ;;  %v1945_v47 = vld [vmem:[%s4462_s26 + $0x418] sm:$0xff]  ;;  %v2716_v56 = vadd.s32 %v5000_v5, %v2459_v36  ;;  %vm2971_vm3 = vcmp.lt.s32.totalorder %v2715_v48, 2062  ;;  %v3481_v11 = vmul.f32 %v3225_v61, %v3225_v61 }
 0x383   : > { %v2201_v59 = vsub.f32 %v1689_v46, %v1945_v47  ;;  %v3226_v7 = vsel %vm2970_vm2, %v2200_v51, 0.0  ;;  %v2468_v46 = vadd.s32 1128, %v4995_v3  ;;  %v1697_v48 = vld [vmem:[%s4456_s18 + $0x458] sm:$0xff] }
 0x384   : > { %v3727_v10 = vadd.f32 %v3726_v0, %v3471_v55  ;;  %v1946_v55 = vld [vmem:[%s4462_s26 + $0x420] sm:$0xff]  ;;  %v2717_v0 = vadd.s32 %v5000_v5, %v2460_v44  ;;  %vm2972_vm4 = vcmp.lt.s32.totalorder %v2716_v56, 2062  ;;  %v3482_v19 = vmul.f32 %v3226_v7, %v3226_v7 }
 0x385   : > { %v2202_v4 = vsub.f32 %v1690_v54, %v1946_v55  ;;  %v3227_v15 = vsel %vm2971_vm3, %v2201_v59, 0.0  ;;  %v2469_v54 = vadd.s32 1136, %v4995_v3  ;;  %v1698_v56 = vld [vmem:[%s4456_s18 + $0x460] sm:$0xff] }
 0x386   : > { %v3728_v18 = vadd.f32 %v3727_v10, %v3472_v63  ;;  %v1947_v63 = vld [vmem:[%s4462_s26 + $0x428] sm:$0xff]  ;;  %v2718_v10 = vadd.s32 %v5000_v5, %v2461_v52  ;;  %vm2973_vm5 = vcmp.lt.s32.totalorder %v2717_v0, 2062  ;;  %v3483_v27 = vmul.f32 %v3227_v15, %v3227_v15 }
 0x387   : > { %v2203_v13 = vsub.f32 %v1691_v62, %v1947_v63  ;;  %v3228_v23 = vsel %vm2972_vm4, %v2202_v4, 0.0  ;;  %v2470_v62 = vadd.s32 1144, %v4995_v3  ;;  %v1699_v0 = vld [vmem:[%s4456_s18 + $0x468] sm:$0xff] }
 0x388   : > { %v3729_v26 = vadd.f32 %v3728_v18, %v3473_v9  ;;  %v1948_v9 = vld [vmem:[%s4462_s26 + $0x430] sm:$0xff]  ;;  %v2719_v18 = vadd.s32 %v5000_v5, %v2462_v60  ;;  %vm2974_vm6 = vcmp.lt.s32.totalorder %v2718_v10, 2062  ;;  %v3484_v35 = vmul.f32 %v3228_v23, %v3228_v23 }
 0x389   : > { %v2204_v21 = vsub.f32 %v1692_v8, %v1948_v9  ;;  %v3229_v31 = vsel %vm2973_vm5, %v2203_v13, 0.0  ;;  %v2471_v8 = vadd.s32 1152, %v4995_v3  ;;  %v1700_v10 = vld [vmem:[%s4456_s18 + $0x470] sm:$0xff] }
 0x38a   : > { %v3730_v34 = vadd.f32 %v3729_v26, %v3474_v17  ;;  %v1949_v17 = vld [vmem:[%s4462_s26 + $0x438] sm:$0xff]  ;;  %v2720_v26 = vadd.s32 %v5000_v5, %v2463_v6  ;;  %vm2975_vm7 = vcmp.lt.s32.totalorder %v2719_v18, 2062  ;;  %v3485_v43 = vmul.f32 %v3229_v31, %v3229_v31 }
 0x38b   : > { %v2205_v29 = vsub.f32 %v1693_v16, %v1949_v17  ;;  %v3230_v39 = vsel %vm2974_vm6, %v2204_v21, 0.0  ;;  %v2472_v16 = vadd.s32 1160, %v4995_v3  ;;  %v1701_v18 = vld [vmem:[%s4456_s18 + $0x478] sm:$0xff] }
 0x38c   : > { %v3731_v42 = vadd.f32 %v3730_v34, %v3475_v25  ;;  %v1950_v25 = vld [vmem:[%s4462_s26 + $0x440] sm:$0xff]  ;;  %v2721_v34 = vadd.s32 %v5000_v5, %v2464_v14  ;;  %vm2976_vm8 = vcmp.lt.s32.totalorder %v2720_v26, 2062  ;;  %v3486_v51 = vmul.f32 %v3230_v39, %v3230_v39 }
 0x38d   : > { %v2206_v37 = vsub.f32 %v1694_v24, %v1950_v25  ;;  %v3231_v47 = vsel %vm2975_vm7, %v2205_v29, 0.0  ;;  %v2473_v24 = vadd.s32 1168, %v4995_v3  ;;  %v1702_v26 = vld [vmem:[%s4456_s18 + $0x480] sm:$0xff] }
 0x38e   : > { %v3732_v50 = vadd.f32 %v3731_v42, %v3476_v33  ;;  %v1951_v33 = vld [vmem:[%s4462_s26 + $0x448] sm:$0xff]  ;;  %v2722_v42 = vadd.s32 %v5000_v5, %v2465_v22  ;;  %vm2977_vm9 = vcmp.lt.s32.totalorder %v2721_v34, 2062  ;;  %v3487_v59 = vmul.f32 %v3231_v47, %v3231_v47 }
 0x38f   : > { %v2207_v45 = vsub.f32 %v1695_v32, %v1951_v33  ;;  %v3232_v55 = vsel %vm2976_vm8, %v2206_v37, 0.0  ;;  %v2474_v32 = vadd.s32 1176, %v4995_v3  ;;  %v1703_v34 = vld [vmem:[%s4456_s18 + $0x488] sm:$0xff] }
 0x390   : > { %v3733_v58 = vadd.f32 %v3732_v50, %v3477_v41  ;;  %v1952_v41 = vld [vmem:[%s4462_s26 + $0x450] sm:$0xff]  ;;  %v2723_v50 = vadd.s32 %v5000_v5, %v2466_v30  ;;  %vm2978_vm10 = vcmp.lt.s32.totalorder %v2722_v42, 2062  ;;  %v3488_v4 = vmul.f32 %v3232_v55, %v3232_v55 }
 0x391   : > { %v2208_v53 = vsub.f32 %v1696_v40, %v1952_v41  ;;  %v3233_v63 = vsel %vm2977_vm9, %v2207_v45, 0.0  ;;  %v2475_v40 = vadd.s32 1184, %v4995_v3  ;;  %v1704_v42 = vld [vmem:[%s4456_s18 + $0x490] sm:$0xff] }
 0x392   : > { %v3734_v2 = vadd.f32 %v3733_v58, %v3478_v49  ;;  %v1953_v49 = vld [vmem:[%s4462_s26 + $0x458] sm:$0xff]  ;;  %v2724_v58 = vadd.s32 %v5000_v5, %v2467_v38  ;;  %vm2979_vm11 = vcmp.lt.s32.totalorder %v2723_v50, 2062  ;;  %v3489_v13 = vmul.f32 %v3233_v63, %v3233_v63 }
 0x393   : > { %v2209_v61 = vsub.f32 %v1697_v48, %v1953_v49  ;;  %v3234_v9 = vsel %vm2978_vm10, %v2208_v53, 0.0  ;;  %v2476_v48 = vadd.s32 1192, %v4995_v3  ;;  %v1705_v50 = vld [vmem:[%s4456_s18 + $0x498] sm:$0xff] }
 0x394   : > { %v3735_v12 = vadd.f32 %v3734_v2, %v3479_v57  ;;  %v1954_v57 = vld [vmem:[%s4462_s26 + $0x460] sm:$0xff]  ;;  %v2725_v2 = vadd.s32 %v5000_v5, %v2468_v46  ;;  %vm2980_vm12 = vcmp.lt.s32.totalorder %v2724_v58, 2062  ;;  %v3490_v21 = vmul.f32 %v3234_v9, %v3234_v9 }
 0x395   : > { %v2210_v7 = vsub.f32 %v1698_v56, %v1954_v57  ;;  %v3235_v17 = vsel %vm2979_vm11, %v2209_v61, 0.0  ;;  %v2477_v56 = vadd.s32 1200, %v4995_v3  ;;  %v1706_v58 = vld [vmem:[%s4456_s18 + $0x4a0] sm:$0xff] }
 0x396   : > { %v3736_v20 = vadd.f32 %v3735_v12, %v3480_v1  ;;  %v1955_v1 = vld [vmem:[%s4462_s26 + $0x468] sm:$0xff]  ;;  %v2726_v12 = vadd.s32 %v5000_v5, %v2469_v54  ;;  %vm2981_vm13 = vcmp.lt.s32.totalorder %v2725_v2, 2062  ;;  %v3491_v29 = vmul.f32 %v3235_v17, %v3235_v17 }
 0x397   : > { %v2211_v15 = vsub.f32 %v1699_v0, %v1955_v1  ;;  %v3236_v25 = vsel %vm2980_vm12, %v2210_v7, 0.0  ;;  %v2478_v0 = vadd.s32 1208, %v4995_v3  ;;  %v1707_v2 = vld [vmem:[%s4456_s18 + $0x4a8] sm:$0xff] }
 0x398   : > { %v3737_v28 = vadd.f32 %v3736_v20, %v3481_v11  ;;  %v1956_v11 = vld [vmem:[%s4462_s26 + $0x470] sm:$0xff]  ;;  %v2727_v20 = vadd.s32 %v5000_v5, %v2470_v62  ;;  %vm2982_vm14 = vcmp.lt.s32.totalorder %v2726_v12, 2062  ;;  %v3492_v37 = vmul.f32 %v3236_v25, %v3236_v25 }
 0x399   : > { %v2212_v23 = vsub.f32 %v1700_v10, %v1956_v11  ;;  %v3237_v33 = vsel %vm2981_vm13, %v2211_v15, 0.0  ;;  %v2479_v10 = vadd.s32 1216, %v4995_v3  ;;  %v1708_v12 = vld [vmem:[%s4456_s18 + $0x4b0] sm:$0xff] }
 0x39a   : > { %v3738_v36 = vadd.f32 %v3737_v28, %v3482_v19  ;;  %v1957_v19 = vld [vmem:[%s4462_s26 + $0x478] sm:$0xff]  ;;  %v2728_v28 = vadd.s32 %v5000_v5, %v2471_v8  ;;  %vm2983_vm15 = vcmp.lt.s32.totalorder %v2727_v20, 2062  ;;  %v3493_v45 = vmul.f32 %v3237_v33, %v3237_v33 }
 0x39b   : > { %v2213_v31 = vsub.f32 %v1701_v18, %v1957_v19  ;;  %v3238_v41 = vsel %vm2982_vm14, %v2212_v23, 0.0  ;;  %v2480_v18 = vadd.s32 1224, %v4995_v3  ;;  %v1709_v20 = vld [vmem:[%s4456_s18 + $0x4b8] sm:$0xff] }
 0x39c   : > { %v3739_v44 = vadd.f32 %v3738_v36, %v3483_v27  ;;  %v1958_v27 = vld [vmem:[%s4462_s26 + $0x480] sm:$0xff]  ;;  %v2729_v36 = vadd.s32 %v5000_v5, %v2472_v16  ;;  %vm2984_vm0 = vcmp.lt.s32.totalorder %v2728_v28, 2062  ;;  %v3494_v53 = vmul.f32 %v3238_v41, %v3238_v41 }
 0x39d   : > { %v2214_v39 = vsub.f32 %v1702_v26, %v1958_v27  ;;  %v3239_v49 = vsel %vm2983_vm15, %v2213_v31, 0.0  ;;  %v2481_v26 = vadd.s32 1232, %v4995_v3  ;;  %v1710_v28 = vld [vmem:[%s4456_s18 + $0x4c0] sm:$0xff] }
 0x39e   : > { %v3740_v52 = vadd.f32 %v3739_v44, %v3484_v35  ;;  %v1959_v35 = vld [vmem:[%s4462_s26 + $0x488] sm:$0xff]  ;;  %v2730_v44 = vadd.s32 %v5000_v5, %v2473_v24  ;;  %vm2985_vm1 = vcmp.lt.s32.totalorder %v2729_v36, 2062  ;;  %v3495_v61 = vmul.f32 %v3239_v49, %v3239_v49 }
 0x39f   : > { %v2215_v47 = vsub.f32 %v1703_v34, %v1959_v35  ;;  %v3240_v57 = vsel %vm2984_vm0, %v2214_v39, 0.0  ;;  %v2482_v34 = vadd.s32 1240, %v4995_v3  ;;  %v1711_v36 = vld [vmem:[%s4456_s18 + $0x4c8] sm:$0xff] }
 0x3a0   : > { %v3741_v60 = vadd.f32 %v3740_v52, %v3485_v43  ;;  %v1960_v43 = vld [vmem:[%s4462_s26 + $0x490] sm:$0xff]  ;;  %v2731_v52 = vadd.s32 %v5000_v5, %v2474_v32  ;;  %vm2986_vm2 = vcmp.lt.s32.totalorder %v2730_v44, 2062  ;;  %v3496_v7 = vmul.f32 %v3240_v57, %v3240_v57 }
 0x3a1   : > { %v2216_v55 = vsub.f32 %v1704_v42, %v1960_v43  ;;  %v3241_v1 = vsel %vm2985_vm1, %v2215_v47, 0.0  ;;  %v2483_v42 = vadd.s32 1248, %v4995_v3  ;;  %v1712_v44 = vld [vmem:[%s4456_s18 + $0x4d0] sm:$0xff] }
 0x3a2   : > { %v3742_v6 = vadd.f32 %v3741_v60, %v3486_v51  ;;  %v1961_v51 = vld [vmem:[%s4462_s26 + $0x498] sm:$0xff]  ;;  %v2732_v60 = vadd.s32 %v5000_v5, %v2475_v40  ;;  %vm2987_vm3 = vcmp.lt.s32.totalorder %v2731_v52, 2062  ;;  %v3497_v15 = vmul.f32 %v3241_v1, %v3241_v1 }
 0x3a3   : > { %v2217_v63 = vsub.f32 %v1705_v50, %v1961_v51  ;;  %v3242_v11 = vsel %vm2986_vm2, %v2216_v55, 0.0  ;;  %v2484_v50 = vadd.s32 1256, %v4995_v3  ;;  %v1713_v52 = vld [vmem:[%s4456_s18 + $0x4d8] sm:$0xff] }
 0x3a4   : > { %v3743_v14 = vadd.f32 %v3742_v6, %v3487_v59  ;;  %v1962_v59 = vld [vmem:[%s4462_s26 + $0x4a0] sm:$0xff]  ;;  %v2733_v6 = vadd.s32 %v5000_v5, %v2476_v48  ;;  %vm2988_vm4 = vcmp.lt.s32.totalorder %v2732_v60, 2062  ;;  %v3498_v23 = vmul.f32 %v3242_v11, %v3242_v11 }
 0x3a5   : > { %v2218_v9 = vsub.f32 %v1706_v58, %v1962_v59  ;;  %v3243_v19 = vsel %vm2987_vm3, %v2217_v63, 0.0  ;;  %v2485_v58 = vadd.s32 1264, %v4995_v3  ;;  %v1714_v60 = vld [vmem:[%s4456_s18 + $0x4e0] sm:$0xff] }
 0x3a6   : > { %v3744_v22 = vadd.f32 %v3743_v14, %v3488_v4  ;;  %v1963_v4 = vld [vmem:[%s4462_s26 + $0x4a8] sm:$0xff]  ;;  %v2734_v14 = vadd.s32 %v5000_v5, %v2477_v56  ;;  %vm2989_vm5 = vcmp.lt.s32.totalorder %v2733_v6, 2062  ;;  %v3499_v31 = vmul.f32 %v3243_v19, %v3243_v19 }
 0x3a7   : > { %v2219_v17 = vsub.f32 %v1707_v2, %v1963_v4  ;;  %v3244_v27 = vsel %vm2988_vm4, %v2218_v9, 0.0  ;;  %v2486_v2 = vadd.s32 1272, %v4995_v3  ;;  %v1715_v6 = vld [vmem:[%s4456_s18 + $0x4e8] sm:$0xff] }
 0x3a8   : > { %v3745_v30 = vadd.f32 %v3744_v22, %v3489_v13  ;;  %v1964_v13 = vld [vmem:[%s4462_s26 + $0x4b0] sm:$0xff]  ;;  %v2735_v22 = vadd.s32 %v5000_v5, %v2478_v0  ;;  %vm2990_vm6 = vcmp.lt.s32.totalorder %v2734_v14, 2062  ;;  %v3500_v39 = vmul.f32 %v3244_v27, %v3244_v27 }
 0x3a9   : > { %v2220_v25 = vsub.f32 %v1708_v12, %v1964_v13  ;;  %v3245_v35 = vsel %vm2989_vm5, %v2219_v17, 0.0  ;;  %v2487_v12 = vadd.s32 1280, %v4995_v3  ;;  %v1716_v14 = vld [vmem:[%s4456_s18 + $0x4f0] sm:$0xff] }
 0x3aa   : > { %v3746_v38 = vadd.f32 %v3745_v30, %v3490_v21  ;;  %v1965_v21 = vld [vmem:[%s4462_s26 + $0x4b8] sm:$0xff]  ;;  %v2736_v30 = vadd.s32 %v5000_v5, %v2479_v10  ;;  %vm2991_vm7 = vcmp.lt.s32.totalorder %v2735_v22, 2062  ;;  %v3501_v47 = vmul.f32 %v3245_v35, %v3245_v35 }
 0x3ab   : > { %v2221_v33 = vsub.f32 %v1709_v20, %v1965_v21  ;;  %v3246_v43 = vsel %vm2990_vm6, %v2220_v25, 0.0  ;;  %v2488_v20 = vadd.s32 1288, %v4995_v3  ;;  %v1717_v22 = vld [vmem:[%s4456_s18 + $0x4f8] sm:$0xff] }
 0x3ac   : > { %v3747_v46 = vadd.f32 %v3746_v38, %v3491_v29  ;;  %v1966_v29 = vld [vmem:[%s4462_s26 + $0x4c0] sm:$0xff]  ;;  %v2737_v38 = vadd.s32 %v5000_v5, %v2480_v18  ;;  %vm2992_vm8 = vcmp.lt.s32.totalorder %v2736_v30, 2062  ;;  %v3502_v55 = vmul.f32 %v3246_v43, %v3246_v43 }
 0x3ad   : > { %v2222_v41 = vsub.f32 %v1710_v28, %v1966_v29  ;;  %v3247_v51 = vsel %vm2991_vm7, %v2221_v33, 0.0  ;;  %v2489_v28 = vadd.s32 1296, %v4995_v3  ;;  %v1718_v30 = vld [vmem:[%s4456_s18 + $0x500] sm:$0xff] }
 0x3ae   : > { %v3748_v54 = vadd.f32 %v3747_v46, %v3492_v37  ;;  %v1967_v37 = vld [vmem:[%s4462_s26 + $0x4c8] sm:$0xff]  ;;  %v2738_v46 = vadd.s32 %v5000_v5, %v2481_v26  ;;  %vm2993_vm9 = vcmp.lt.s32.totalorder %v2737_v38, 2062  ;;  %v3503_v63 = vmul.f32 %v3247_v51, %v3247_v51 }
 0x3af   : > { %v2223_v49 = vsub.f32 %v1711_v36, %v1967_v37  ;;  %v3248_v59 = vsel %vm2992_vm8, %v2222_v41, 0.0  ;;  %v2490_v36 = vadd.s32 1304, %v4995_v3  ;;  %v1719_v38 = vld [vmem:[%s4456_s18 + $0x508] sm:$0xff] }
 0x3b0   : > { %v3749_v62 = vadd.f32 %v3748_v54, %v3493_v45  ;;  %v1968_v45 = vld [vmem:[%s4462_s26 + $0x4d0] sm:$0xff]  ;;  %v2739_v54 = vadd.s32 %v5000_v5, %v2482_v34  ;;  %vm2994_vm10 = vcmp.lt.s32.totalorder %v2738_v46, 2062  ;;  %v3504_v9 = vmul.f32 %v3248_v59, %v3248_v59 }
 0x3b1   : > { %v2224_v57 = vsub.f32 %v1712_v44, %v1968_v45  ;;  %v3249_v4 = vsel %vm2993_vm9, %v2223_v49, 0.0  ;;  %v2491_v44 = vadd.s32 1312, %v4995_v3  ;;  %v1720_v46 = vld [vmem:[%s4456_s18 + $0x510] sm:$0xff] }
 0x3b2   : > { %v3750_v8 = vadd.f32 %v3749_v62, %v3494_v53  ;;  %v1969_v53 = vld [vmem:[%s4462_s26 + $0x4d8] sm:$0xff]  ;;  %v2740_v62 = vadd.s32 %v5000_v5, %v2483_v42  ;;  %vm2995_vm11 = vcmp.lt.s32.totalorder %v2739_v54, 2062  ;;  %v3505_v17 = vmul.f32 %v3249_v4, %v3249_v4 }
 0x3b3   : > { %v2225_v1 = vsub.f32 %v1713_v52, %v1969_v53  ;;  %v3250_v13 = vsel %vm2994_vm10, %v2224_v57, 0.0  ;;  %v2492_v52 = vadd.s32 1320, %v4995_v3  ;;  %v1721_v54 = vld [vmem:[%s4456_s18 + $0x518] sm:$0xff] }
 0x3b4   : > { %v3751_v16 = vadd.f32 %v3750_v8, %v3495_v61  ;;  %v1970_v61 = vld [vmem:[%s4462_s26 + $0x4e0] sm:$0xff]  ;;  %v2741_v8 = vadd.s32 %v5000_v5, %v2484_v50  ;;  %vm2996_vm12 = vcmp.lt.s32.totalorder %v2740_v62, 2062  ;;  %v3506_v25 = vmul.f32 %v3250_v13, %v3250_v13 }
 0x3b5   : > { %v2226_v11 = vsub.f32 %v1714_v60, %v1970_v61  ;;  %v3251_v21 = vsel %vm2995_vm11, %v2225_v1, 0.0  ;;  %v2493_v60 = vadd.s32 1328, %v4995_v3  ;;  %v1722_v62 = vld [vmem:[%s4456_s18 + $0x520] sm:$0xff] }
 0x3b6   : > { %v3752_v24 = vadd.f32 %v3751_v16, %v3496_v7  ;;  %v1971_v7 = vld [vmem:[%s4462_s26 + $0x4e8] sm:$0xff]  ;;  %v2742_v16 = vadd.s32 %v5000_v5, %v2485_v58  ;;  %vm2997_vm13 = vcmp.lt.s32.totalorder %v2741_v8, 2062  ;;  %v3507_v33 = vmul.f32 %v3251_v21, %v3251_v21 }
 0x3b7   : > { %v2227_v19 = vsub.f32 %v1715_v6, %v1971_v7  ;;  %v3252_v29 = vsel %vm2996_vm12, %v2226_v11, 0.0  ;;  %v2494_v6 = vadd.s32 1336, %v4995_v3  ;;  %v1723_v8 = vld [vmem:[%s4456_s18 + $0x528] sm:$0xff] }
 0x3b8   : > { %v3753_v32 = vadd.f32 %v3752_v24, %v3497_v15  ;;  %v1972_v15 = vld [vmem:[%s4462_s26 + $0x4f0] sm:$0xff]  ;;  %v2743_v24 = vadd.s32 %v5000_v5, %v2486_v2  ;;  %vm2998_vm14 = vcmp.lt.s32.totalorder %v2742_v16, 2062  ;;  %v3508_v41 = vmul.f32 %v3252_v29, %v3252_v29 }
 0x3b9   : > { %v2228_v27 = vsub.f32 %v1716_v14, %v1972_v15  ;;  %v3253_v37 = vsel %vm2997_vm13, %v2227_v19, 0.0  ;;  %v2495_v14 = vadd.s32 1344, %v4995_v3  ;;  %v1724_v16 = vld [vmem:[%s4456_s18 + $0x530] sm:$0xff] }
 0x3ba   : > { %v3754_v40 = vadd.f32 %v3753_v32, %v3498_v23  ;;  %v1973_v23 = vld [vmem:[%s4462_s26 + $0x4f8] sm:$0xff]  ;;  %v2744_v32 = vadd.s32 %v5000_v5, %v2487_v12  ;;  %vm2999_vm15 = vcmp.lt.s32.totalorder %v2743_v24, 2062  ;;  %v3509_v49 = vmul.f32 %v3253_v37, %v3253_v37 }
 0x3bb   : > { %v2229_v35 = vsub.f32 %v1717_v22, %v1973_v23  ;;  %v3254_v45 = vsel %vm2998_vm14, %v2228_v27, 0.0  ;;  %v2496_v22 = vadd.s32 1352, %v4995_v3  ;;  %v1725_v24 = vld [vmem:[%s4456_s18 + $0x538] sm:$0xff] }
 0x3bc   : > { %v3755_v48 = vadd.f32 %v3754_v40, %v3499_v31  ;;  %v1974_v31 = vld [vmem:[%s4462_s26 + $0x500] sm:$0xff]  ;;  %v2745_v40 = vadd.s32 %v5000_v5, %v2488_v20  ;;  %vm3000_vm0 = vcmp.lt.s32.totalorder %v2744_v32, 2062  ;;  %v3510_v57 = vmul.f32 %v3254_v45, %v3254_v45 }
 0x3bd   : > { %v2230_v43 = vsub.f32 %v1718_v30, %v1974_v31  ;;  %v3255_v53 = vsel %vm2999_vm15, %v2229_v35, 0.0  ;;  %v2497_v30 = vadd.s32 1360, %v4995_v3  ;;  %v1726_v32 = vld [vmem:[%s4456_s18 + $0x540] sm:$0xff] }
 0x3be   : > { %v3756_v56 = vadd.f32 %v3755_v48, %v3500_v39  ;;  %v1975_v39 = vld [vmem:[%s4462_s26 + $0x508] sm:$0xff]  ;;  %v2746_v48 = vadd.s32 %v5000_v5, %v2489_v28  ;;  %vm3001_vm1 = vcmp.lt.s32.totalorder %v2745_v40, 2062  ;;  %v3511_v1 = vmul.f32 %v3255_v53, %v3255_v53 }
 0x3bf   : > { %v2231_v51 = vsub.f32 %v1719_v38, %v1975_v39  ;;  %v3256_v61 = vsel %vm3000_vm0, %v2230_v43, 0.0  ;;  %v2498_v38 = vadd.s32 1368, %v4995_v3  ;;  %v1727_v40 = vld [vmem:[%s4456_s18 + $0x548] sm:$0xff] }
 0x3c0   : > { %v3757_v0 = vadd.f32 %v3756_v56, %v3501_v47  ;;  %v1976_v47 = vld [vmem:[%s4462_s26 + $0x510] sm:$0xff]  ;;  %v2747_v56 = vadd.s32 %v5000_v5, %v2490_v36  ;;  %vm3002_vm2 = vcmp.lt.s32.totalorder %v2746_v48, 2062  ;;  %v3512_v11 = vmul.f32 %v3256_v61, %v3256_v61 }
 0x3c1   : > { %v2232_v59 = vsub.f32 %v1720_v46, %v1976_v47  ;;  %v3257_v7 = vsel %vm3001_vm1, %v2231_v51, 0.0  ;;  %v2499_v46 = vadd.s32 1376, %v4995_v3  ;;  %v1728_v48 = vld [vmem:[%s4456_s18 + $0x550] sm:$0xff] }
 0x3c2   : > { %v3758_v10 = vadd.f32 %v3757_v0, %v3502_v55  ;;  %v1977_v55 = vld [vmem:[%s4462_s26 + $0x518] sm:$0xff]  ;;  %v2748_v0 = vadd.s32 %v5000_v5, %v2491_v44  ;;  %vm3003_vm3 = vcmp.lt.s32.totalorder %v2747_v56, 2062  ;;  %v3513_v19 = vmul.f32 %v3257_v7, %v3257_v7 }
 0x3c3   : > { %v2233_v4 = vsub.f32 %v1721_v54, %v1977_v55  ;;  %v3258_v15 = vsel %vm3002_vm2, %v2232_v59, 0.0  ;;  %v2500_v54 = vadd.s32 1384, %v4995_v3  ;;  %v1729_v56 = vld [vmem:[%s4456_s18 + $0x558] sm:$0xff] }
 0x3c4   : > { %v3759_v18 = vadd.f32 %v3758_v10, %v3503_v63  ;;  %v1978_v63 = vld [vmem:[%s4462_s26 + $0x520] sm:$0xff]  ;;  %v2749_v10 = vadd.s32 %v5000_v5, %v2492_v52  ;;  %vm3004_vm4 = vcmp.lt.s32.totalorder %v2748_v0, 2062  ;;  %v3514_v27 = vmul.f32 %v3258_v15, %v3258_v15 }
 0x3c5   : > { %v2234_v13 = vsub.f32 %v1722_v62, %v1978_v63  ;;  %v3259_v23 = vsel %vm3003_vm3, %v2233_v4, 0.0  ;;  %v2501_v62 = vadd.s32 1392, %v4995_v3  ;;  %v1730_v0 = vld [vmem:[%s4456_s18 + $0x560] sm:$0xff] }
 0x3c6   : > { %v3760_v26 = vadd.f32 %v3759_v18, %v3504_v9  ;;  %v1979_v9 = vld [vmem:[%s4462_s26 + $0x528] sm:$0xff]  ;;  %v2750_v18 = vadd.s32 %v5000_v5, %v2493_v60  ;;  %vm3005_vm5 = vcmp.lt.s32.totalorder %v2749_v10, 2062  ;;  %v3515_v35 = vmul.f32 %v3259_v23, %v3259_v23 }
 0x3c7   : > { %v2235_v21 = vsub.f32 %v1723_v8, %v1979_v9  ;;  %v3260_v31 = vsel %vm3004_vm4, %v2234_v13, 0.0  ;;  %v2502_v8 = vadd.s32 1400, %v4995_v3  ;;  %v1731_v10 = vld [vmem:[%s4456_s18 + $0x568] sm:$0xff] }
 0x3c8   : > { %v3761_v34 = vadd.f32 %v3760_v26, %v3505_v17  ;;  %v1980_v17 = vld [vmem:[%s4462_s26 + $0x530] sm:$0xff]  ;;  %v2751_v26 = vadd.s32 %v5000_v5, %v2494_v6  ;;  %vm3006_vm6 = vcmp.lt.s32.totalorder %v2750_v18, 2062  ;;  %v3516_v43 = vmul.f32 %v3260_v31, %v3260_v31 }
 0x3c9   : > { %v2236_v29 = vsub.f32 %v1724_v16, %v1980_v17  ;;  %v3261_v39 = vsel %vm3005_vm5, %v2235_v21, 0.0  ;;  %v2503_v16 = vadd.s32 1408, %v4995_v3  ;;  %v1732_v18 = vld [vmem:[%s4456_s18 + $0x570] sm:$0xff] }
 0x3ca   : > { %v3762_v42 = vadd.f32 %v3761_v34, %v3506_v25  ;;  %v1981_v25 = vld [vmem:[%s4462_s26 + $0x538] sm:$0xff]  ;;  %v2752_v34 = vadd.s32 %v5000_v5, %v2495_v14  ;;  %vm3007_vm7 = vcmp.lt.s32.totalorder %v2751_v26, 2062  ;;  %v3517_v51 = vmul.f32 %v3261_v39, %v3261_v39 }
 0x3cb   : > { %v2237_v37 = vsub.f32 %v1725_v24, %v1981_v25  ;;  %v3262_v47 = vsel %vm3006_vm6, %v2236_v29, 0.0  ;;  %v2504_v24 = vadd.s32 1416, %v4995_v3  ;;  %v1733_v26 = vld [vmem:[%s4456_s18 + $0x578] sm:$0xff] }
 0x3cc   : > { %v3763_v50 = vadd.f32 %v3762_v42, %v3507_v33  ;;  %v1982_v33 = vld [vmem:[%s4462_s26 + $0x540] sm:$0xff]  ;;  %v2753_v42 = vadd.s32 %v5000_v5, %v2496_v22  ;;  %vm3008_vm8 = vcmp.lt.s32.totalorder %v2752_v34, 2062  ;;  %v3518_v59 = vmul.f32 %v3262_v47, %v3262_v47 }
 0x3cd   : > { %v2238_v45 = vsub.f32 %v1726_v32, %v1982_v33  ;;  %v3263_v55 = vsel %vm3007_vm7, %v2237_v37, 0.0  ;;  %v2505_v32 = vadd.s32 1424, %v4995_v3  ;;  %v1734_v34 = vld [vmem:[%s4456_s18 + $0x580] sm:$0xff] }
 0x3ce   : > { %v3764_v58 = vadd.f32 %v3763_v50, %v3508_v41  ;;  %v1983_v41 = vld [vmem:[%s4462_s26 + $0x548] sm:$0xff]  ;;  %v2754_v50 = vadd.s32 %v5000_v5, %v2497_v30  ;;  %vm3009_vm9 = vcmp.lt.s32.totalorder %v2753_v42, 2062  ;;  %v3519_v4 = vmul.f32 %v3263_v55, %v3263_v55 }
 0x3cf   : > { %v2239_v53 = vsub.f32 %v1727_v40, %v1983_v41  ;;  %v3264_v63 = vsel %vm3008_vm8, %v2238_v45, 0.0  ;;  %v2506_v40 = vadd.s32 1432, %v4995_v3  ;;  %v1735_v42 = vld [vmem:[%s4456_s18 + $0x588] sm:$0xff] }
 0x3d0   : > { %v3765_v2 = vadd.f32 %v3764_v58, %v3509_v49  ;;  %v1984_v49 = vld [vmem:[%s4462_s26 + $0x550] sm:$0xff]  ;;  %v2755_v58 = vadd.s32 %v5000_v5, %v2498_v38  ;;  %vm3010_vm10 = vcmp.lt.s32.totalorder %v2754_v50, 2062  ;;  %v3520_v13 = vmul.f32 %v3264_v63, %v3264_v63 }
 0x3d1   : > { %v2240_v61 = vsub.f32 %v1728_v48, %v1984_v49  ;;  %v3265_v9 = vsel %vm3009_vm9, %v2239_v53, 0.0  ;;  %v2507_v48 = vadd.s32 1440, %v4995_v3  ;;  %v1736_v50 = vld [vmem:[%s4456_s18 + $0x590] sm:$0xff] }
 0x3d2   : > { %v3766_v12 = vadd.f32 %v3765_v2, %v3510_v57  ;;  %v1985_v57 = vld [vmem:[%s4462_s26 + $0x558] sm:$0xff]  ;;  %v2756_v2 = vadd.s32 %v5000_v5, %v2499_v46  ;;  %vm3011_vm11 = vcmp.lt.s32.totalorder %v2755_v58, 2062  ;;  %v3521_v21 = vmul.f32 %v3265_v9, %v3265_v9 }
 0x3d3   : > { %v2241_v7 = vsub.f32 %v1729_v56, %v1985_v57  ;;  %v3266_v17 = vsel %vm3010_vm10, %v2240_v61, 0.0  ;;  %v2508_v56 = vadd.s32 1448, %v4995_v3  ;;  %v1737_v58 = vld [vmem:[%s4456_s18 + $0x598] sm:$0xff] }
 0x3d4   : > { %v3767_v20 = vadd.f32 %v3766_v12, %v3511_v1  ;;  %v1986_v1 = vld [vmem:[%s4462_s26 + $0x560] sm:$0xff]  ;;  %v2757_v12 = vadd.s32 %v5000_v5, %v2500_v54  ;;  %vm3012_vm12 = vcmp.lt.s32.totalorder %v2756_v2, 2062  ;;  %v3522_v29 = vmul.f32 %v3266_v17, %v3266_v17 }
 0x3d5   : > { %v2242_v15 = vsub.f32 %v1730_v0, %v1986_v1  ;;  %v3267_v25 = vsel %vm3011_vm11, %v2241_v7, 0.0  ;;  %v2509_v0 = vadd.s32 1456, %v4995_v3  ;;  %v1738_v2 = vld [vmem:[%s4456_s18 + $0x5a0] sm:$0xff] }
 0x3d6   : > { %v3768_v28 = vadd.f32 %v3767_v20, %v3512_v11  ;;  %v1987_v11 = vld [vmem:[%s4462_s26 + $0x568] sm:$0xff]  ;;  %v2758_v20 = vadd.s32 %v5000_v5, %v2501_v62  ;;  %vm3013_vm13 = vcmp.lt.s32.totalorder %v2757_v12, 2062  ;;  %v3523_v37 = vmul.f32 %v3267_v25, %v3267_v25 }
 0x3d7   : > { %v2243_v23 = vsub.f32 %v1731_v10, %v1987_v11  ;;  %v3268_v33 = vsel %vm3012_vm12, %v2242_v15, 0.0  ;;  %v2510_v10 = vadd.s32 1464, %v4995_v3  ;;  %v1739_v12 = vld [vmem:[%s4456_s18 + $0x5a8] sm:$0xff] }
 0x3d8   : > { %v3769_v36 = vadd.f32 %v3768_v28, %v3513_v19  ;;  %v1988_v19 = vld [vmem:[%s4462_s26 + $0x570] sm:$0xff]  ;;  %v2759_v28 = vadd.s32 %v5000_v5, %v2502_v8  ;;  %vm3014_vm14 = vcmp.lt.s32.totalorder %v2758_v20, 2062  ;;  %v3524_v45 = vmul.f32 %v3268_v33, %v3268_v33 }
 0x3d9   : > { %v2244_v31 = vsub.f32 %v1732_v18, %v1988_v19  ;;  %v3269_v41 = vsel %vm3013_vm13, %v2243_v23, 0.0  ;;  %v2511_v18 = vadd.s32 1472, %v4995_v3  ;;  %v1740_v20 = vld [vmem:[%s4456_s18 + $0x5b0] sm:$0xff] }
 0x3da   : > { %v3770_v44 = vadd.f32 %v3769_v36, %v3514_v27  ;;  %v1989_v27 = vld [vmem:[%s4462_s26 + $0x578] sm:$0xff]  ;;  %v2760_v36 = vadd.s32 %v5000_v5, %v2503_v16  ;;  %vm3015_vm15 = vcmp.lt.s32.totalorder %v2759_v28, 2062  ;;  %v3525_v53 = vmul.f32 %v3269_v41, %v3269_v41 }
 0x3db   : > { %v2245_v39 = vsub.f32 %v1733_v26, %v1989_v27  ;;  %v3270_v49 = vsel %vm3014_vm14, %v2244_v31, 0.0  ;;  %v2512_v26 = vadd.s32 1480, %v4995_v3  ;;  %v1741_v28 = vld [vmem:[%s4456_s18 + $0x5b8] sm:$0xff] }
 0x3dc   : > { %v3771_v52 = vadd.f32 %v3770_v44, %v3515_v35  ;;  %v1990_v35 = vld [vmem:[%s4462_s26 + $0x580] sm:$0xff]  ;;  %v2761_v44 = vadd.s32 %v5000_v5, %v2504_v24  ;;  %vm3016_vm0 = vcmp.lt.s32.totalorder %v2760_v36, 2062  ;;  %v3526_v61 = vmul.f32 %v3270_v49, %v3270_v49 }
 0x3dd   : > { %v2246_v47 = vsub.f32 %v1734_v34, %v1990_v35  ;;  %v3271_v57 = vsel %vm3015_vm15, %v2245_v39, 0.0  ;;  %v2513_v34 = vadd.s32 1488, %v4995_v3  ;;  %v1742_v36 = vld [vmem:[%s4456_s18 + $0x5c0] sm:$0xff] }
 0x3de   : > { %v3772_v60 = vadd.f32 %v3771_v52, %v3516_v43  ;;  %v1991_v43 = vld [vmem:[%s4462_s26 + $0x588] sm:$0xff]  ;;  %v2762_v52 = vadd.s32 %v5000_v5, %v2505_v32  ;;  %vm3017_vm1 = vcmp.lt.s32.totalorder %v2761_v44, 2062  ;;  %v3527_v7 = vmul.f32 %v3271_v57, %v3271_v57 }
 0x3df   : > { %v2247_v55 = vsub.f32 %v1735_v42, %v1991_v43  ;;  %v3272_v1 = vsel %vm3016_vm0, %v2246_v47, 0.0  ;;  %v2514_v42 = vadd.s32 1496, %v4995_v3  ;;  %v1743_v44 = vld [vmem:[%s4456_s18 + $0x5c8] sm:$0xff] }
 0x3e0   : > { %v3773_v6 = vadd.f32 %v3772_v60, %v3517_v51  ;;  %v1992_v51 = vld [vmem:[%s4462_s26 + $0x590] sm:$0xff]  ;;  %v2763_v60 = vadd.s32 %v5000_v5, %v2506_v40  ;;  %vm3018_vm2 = vcmp.lt.s32.totalorder %v2762_v52, 2062  ;;  %v3528_v15 = vmul.f32 %v3272_v1, %v3272_v1 }
 0x3e1   : > { %v2248_v63 = vsub.f32 %v1736_v50, %v1992_v51  ;;  %v3273_v11 = vsel %vm3017_vm1, %v2247_v55, 0.0  ;;  %v2515_v50 = vadd.s32 1504, %v4995_v3  ;;  %v1744_v52 = vld [vmem:[%s4456_s18 + $0x5d0] sm:$0xff] }
 0x3e2   : > { %v3774_v14 = vadd.f32 %v3773_v6, %v3518_v59  ;;  %v1993_v59 = vld [vmem:[%s4462_s26 + $0x598] sm:$0xff]  ;;  %v2764_v6 = vadd.s32 %v5000_v5, %v2507_v48  ;;  %vm3019_vm3 = vcmp.lt.s32.totalorder %v2763_v60, 2062  ;;  %v3529_v23 = vmul.f32 %v3273_v11, %v3273_v11 }
 0x3e3   : > { %v2249_v9 = vsub.f32 %v1737_v58, %v1993_v59  ;;  %v3274_v19 = vsel %vm3018_vm2, %v2248_v63, 0.0  ;;  %v2516_v58 = vadd.s32 1512, %v4995_v3  ;;  %v1745_v60 = vld [vmem:[%s4456_s18 + $0x5d8] sm:$0xff] }
 0x3e4   : > { %v3775_v22 = vadd.f32 %v3774_v14, %v3519_v4  ;;  %v1994_v4 = vld [vmem:[%s4462_s26 + $0x5a0] sm:$0xff]  ;;  %v2765_v14 = vadd.s32 %v5000_v5, %v2508_v56  ;;  %vm3020_vm4 = vcmp.lt.s32.totalorder %v2764_v6, 2062  ;;  %v3530_v31 = vmul.f32 %v3274_v19, %v3274_v19 }
 0x3e5   : > { %v2250_v17 = vsub.f32 %v1738_v2, %v1994_v4  ;;  %v3275_v27 = vsel %vm3019_vm3, %v2249_v9, 0.0  ;;  %v2517_v2 = vadd.s32 1520, %v4995_v3  ;;  %v1746_v6 = vld [vmem:[%s4456_s18 + $0x5e0] sm:$0xff] }
 0x3e6   : > { %v3776_v30 = vadd.f32 %v3775_v22, %v3520_v13  ;;  %v1995_v13 = vld [vmem:[%s4462_s26 + $0x5a8] sm:$0xff]  ;;  %v2766_v22 = vadd.s32 %v5000_v5, %v2509_v0  ;;  %vm3021_vm5 = vcmp.lt.s32.totalorder %v2765_v14, 2062  ;;  %v3531_v39 = vmul.f32 %v3275_v27, %v3275_v27 }
 0x3e7   : > { %v2251_v25 = vsub.f32 %v1739_v12, %v1995_v13  ;;  %v3276_v35 = vsel %vm3020_vm4, %v2250_v17, 0.0  ;;  %v2518_v12 = vadd.s32 1528, %v4995_v3  ;;  %v1747_v14 = vld [vmem:[%s4456_s18 + $0x5e8] sm:$0xff] }
 0x3e8   : > { %v3777_v38 = vadd.f32 %v3776_v30, %v3521_v21  ;;  %v1996_v21 = vld [vmem:[%s4462_s26 + $0x5b0] sm:$0xff]  ;;  %v2767_v30 = vadd.s32 %v5000_v5, %v2510_v10  ;;  %vm3022_vm6 = vcmp.lt.s32.totalorder %v2766_v22, 2062  ;;  %v3532_v47 = vmul.f32 %v3276_v35, %v3276_v35 }
 0x3e9   : > { %v2252_v33 = vsub.f32 %v1740_v20, %v1996_v21  ;;  %v3277_v43 = vsel %vm3021_vm5, %v2251_v25, 0.0  ;;  %v2519_v20 = vadd.s32 1536, %v4995_v3  ;;  %v1748_v22 = vld [vmem:[%s4456_s18 + $0x5f0] sm:$0xff] }
 0x3ea   : > { %v3778_v46 = vadd.f32 %v3777_v38, %v3522_v29  ;;  %v1997_v29 = vld [vmem:[%s4462_s26 + $0x5b8] sm:$0xff]  ;;  %v2768_v38 = vadd.s32 %v5000_v5, %v2511_v18  ;;  %vm3023_vm7 = vcmp.lt.s32.totalorder %v2767_v30, 2062  ;;  %v3533_v55 = vmul.f32 %v3277_v43, %v3277_v43 }
 0x3eb   : > { %v2253_v41 = vsub.f32 %v1741_v28, %v1997_v29  ;;  %v3278_v51 = vsel %vm3022_vm6, %v2252_v33, 0.0  ;;  %v2520_v28 = vadd.s32 1544, %v4995_v3  ;;  %v1749_v30 = vld [vmem:[%s4456_s18 + $0x5f8] sm:$0xff] }
 0x3ec   : > { %v3779_v54 = vadd.f32 %v3778_v46, %v3523_v37  ;;  %v1998_v37 = vld [vmem:[%s4462_s26 + $0x5c0] sm:$0xff]  ;;  %v2769_v46 = vadd.s32 %v5000_v5, %v2512_v26  ;;  %vm3024_vm8 = vcmp.lt.s32.totalorder %v2768_v38, 2062  ;;  %v3534_v63 = vmul.f32 %v3278_v51, %v3278_v51 }
 0x3ed   : > { %v2254_v49 = vsub.f32 %v1742_v36, %v1998_v37  ;;  %v3279_v59 = vsel %vm3023_vm7, %v2253_v41, 0.0  ;;  %v2521_v36 = vadd.s32 1552, %v4995_v3  ;;  %v1750_v38 = vld [vmem:[%s4456_s18 + $0x600] sm:$0xff] }
 0x3ee   : > { %v3780_v62 = vadd.f32 %v3779_v54, %v3524_v45  ;;  %v1999_v45 = vld [vmem:[%s4462_s26 + $0x5c8] sm:$0xff]  ;;  %v2770_v54 = vadd.s32 %v5000_v5, %v2513_v34  ;;  %vm3025_vm9 = vcmp.lt.s32.totalorder %v2769_v46, 2062  ;;  %v3535_v9 = vmul.f32 %v3279_v59, %v3279_v59 }
 0x3ef   : > { %v2255_v57 = vsub.f32 %v1743_v44, %v1999_v45  ;;  %v3280_v4 = vsel %vm3024_vm8, %v2254_v49, 0.0  ;;  %v2522_v44 = vadd.s32 1560, %v4995_v3  ;;  %v1751_v46 = vld [vmem:[%s4456_s18 + $0x608] sm:$0xff] }
 0x3f0   : > { %v3781_v8 = vadd.f32 %v3780_v62, %v3525_v53  ;;  %v2000_v53 = vld [vmem:[%s4462_s26 + $0x5d0] sm:$0xff]  ;;  %v2771_v62 = vadd.s32 %v5000_v5, %v2514_v42  ;;  %vm3026_vm10 = vcmp.lt.s32.totalorder %v2770_v54, 2062  ;;  %v3536_v17 = vmul.f32 %v3280_v4, %v3280_v4 }
 0x3f1   : > { %v2256_v1 = vsub.f32 %v1744_v52, %v2000_v53  ;;  %v3281_v13 = vsel %vm3025_vm9, %v2255_v57, 0.0  ;;  %v2523_v52 = vadd.s32 1568, %v4995_v3  ;;  %v1752_v54 = vld [vmem:[%s4456_s18 + $0x610] sm:$0xff] }
 0x3f2   : > { %v3782_v16 = vadd.f32 %v3781_v8, %v3526_v61  ;;  %v2001_v61 = vld [vmem:[%s4462_s26 + $0x5d8] sm:$0xff]  ;;  %v2772_v8 = vadd.s32 %v5000_v5, %v2515_v50  ;;  %vm3027_vm11 = vcmp.lt.s32.totalorder %v2771_v62, 2062  ;;  %v3537_v25 = vmul.f32 %v3281_v13, %v3281_v13 }
 0x3f3   : > { %v2257_v11 = vsub.f32 %v1745_v60, %v2001_v61  ;;  %v3282_v21 = vsel %vm3026_vm10, %v2256_v1, 0.0  ;;  %v2524_v60 = vadd.s32 1576, %v4995_v3  ;;  %v1753_v62 = vld [vmem:[%s4456_s18 + $0x618] sm:$0xff] }
 0x3f4   : > { %v3783_v24 = vadd.f32 %v3782_v16, %v3527_v7  ;;  %v2002_v7 = vld [vmem:[%s4462_s26 + $0x5e0] sm:$0xff]  ;;  %v2773_v16 = vadd.s32 %v5000_v5, %v2516_v58  ;;  %vm3028_vm12 = vcmp.lt.s32.totalorder %v2772_v8, 2062  ;;  %v3538_v33 = vmul.f32 %v3282_v21, %v3282_v21 }
 0x3f5   : > { %v2258_v19 = vsub.f32 %v1746_v6, %v2002_v7  ;;  %v3283_v29 = vsel %vm3027_vm11, %v2257_v11, 0.0  ;;  %v2525_v6 = vadd.s32 1584, %v4995_v3  ;;  %v1754_v8 = vld [vmem:[%s4456_s18 + $0x620] sm:$0xff] }
 0x3f6   : > { %v3784_v32 = vadd.f32 %v3783_v24, %v3528_v15  ;;  %v2003_v15 = vld [vmem:[%s4462_s26 + $0x5e8] sm:$0xff]  ;;  %v2774_v24 = vadd.s32 %v5000_v5, %v2517_v2  ;;  %vm3029_vm13 = vcmp.lt.s32.totalorder %v2773_v16, 2062  ;;  %v3539_v41 = vmul.f32 %v3283_v29, %v3283_v29 }
 0x3f7   : > { %v2259_v27 = vsub.f32 %v1747_v14, %v2003_v15  ;;  %v3284_v37 = vsel %vm3028_vm12, %v2258_v19, 0.0  ;;  %v2526_v14 = vadd.s32 1592, %v4995_v3  ;;  %v1755_v16 = vld [vmem:[%s4456_s18 + $0x628] sm:$0xff] }
 0x3f8   : > { %v3785_v40 = vadd.f32 %v3784_v32, %v3529_v23  ;;  %v2004_v23 = vld [vmem:[%s4462_s26 + $0x5f0] sm:$0xff]  ;;  %v2775_v32 = vadd.s32 %v5000_v5, %v2518_v12  ;;  %vm3030_vm14 = vcmp.lt.s32.totalorder %v2774_v24, 2062  ;;  %v3540_v49 = vmul.f32 %v3284_v37, %v3284_v37 }
 0x3f9   : > { %v2260_v35 = vsub.f32 %v1748_v22, %v2004_v23  ;;  %v3285_v45 = vsel %vm3029_vm13, %v2259_v27, 0.0  ;;  %v2527_v22 = vadd.s32 1600, %v4995_v3  ;;  %v1756_v24 = vld [vmem:[%s4456_s18 + $0x630] sm:$0xff] }
 0x3fa   : > { %v3786_v48 = vadd.f32 %v3785_v40, %v3530_v31  ;;  %v2005_v31 = vld [vmem:[%s4462_s26 + $0x5f8] sm:$0xff]  ;;  %v2776_v40 = vadd.s32 %v5000_v5, %v2519_v20  ;;  %vm3031_vm15 = vcmp.lt.s32.totalorder %v2775_v32, 2062  ;;  %v3541_v57 = vmul.f32 %v3285_v45, %v3285_v45 }
 0x3fb   : > { %v2261_v43 = vsub.f32 %v1749_v30, %v2005_v31  ;;  %v3286_v53 = vsel %vm3030_vm14, %v2260_v35, 0.0  ;;  %v2528_v30 = vadd.s32 1608, %v4995_v3  ;;  %v1757_v32 = vld [vmem:[%s4456_s18 + $0x638] sm:$0xff] }
 0x3fc   : > { %v3787_v56 = vadd.f32 %v3786_v48, %v3531_v39  ;;  %v2006_v39 = vld [vmem:[%s4462_s26 + $0x600] sm:$0xff]  ;;  %v2777_v48 = vadd.s32 %v5000_v5, %v2520_v28  ;;  %vm3032_vm0 = vcmp.lt.s32.totalorder %v2776_v40, 2062  ;;  %v3542_v1 = vmul.f32 %v3286_v53, %v3286_v53 }
 0x3fd   : > { %v2262_v51 = vsub.f32 %v1750_v38, %v2006_v39  ;;  %v3287_v61 = vsel %vm3031_vm15, %v2261_v43, 0.0  ;;  %v2529_v38 = vadd.s32 1616, %v4995_v3  ;;  %v1758_v40 = vld [vmem:[%s4456_s18 + $0x640] sm:$0xff] }
 0x3fe   : > { %v3788_v0 = vadd.f32 %v3787_v56, %v3532_v47  ;;  %v2007_v47 = vld [vmem:[%s4462_s26 + $0x608] sm:$0xff]  ;;  %v2778_v56 = vadd.s32 %v5000_v5, %v2521_v36  ;;  %vm3033_vm1 = vcmp.lt.s32.totalorder %v2777_v48, 2062  ;;  %v3543_v11 = vmul.f32 %v3287_v61, %v3287_v61 }
 0x3ff   : > { %v2263_v59 = vsub.f32 %v1751_v46, %v2007_v47  ;;  %v3288_v7 = vsel %vm3032_vm0, %v2262_v51, 0.0  ;;  %v2530_v46 = vadd.s32 1624, %v4995_v3  ;;  %v1759_v48 = vld [vmem:[%s4456_s18 + $0x648] sm:$0xff] }
 0x400   : > { %v3789_v10 = vadd.f32 %v3788_v0, %v3533_v55  ;;  %v2008_v55 = vld [vmem:[%s4462_s26 + $0x610] sm:$0xff]  ;;  %v2779_v0 = vadd.s32 %v5000_v5, %v2522_v44  ;;  %vm3034_vm2 = vcmp.lt.s32.totalorder %v2778_v56, 2062  ;;  %v3544_v19 = vmul.f32 %v3288_v7, %v3288_v7 }
 0x401   : > { %v2264_v4 = vsub.f32 %v1752_v54, %v2008_v55  ;;  %v3289_v15 = vsel %vm3033_vm1, %v2263_v59, 0.0  ;;  %v2531_v54 = vadd.s32 1632, %v4995_v3  ;;  %v1760_v56 = vld [vmem:[%s4456_s18 + $0x650] sm:$0xff] }
 0x402   : > { %v3790_v18 = vadd.f32 %v3789_v10, %v3534_v63  ;;  %v2009_v63 = vld [vmem:[%s4462_s26 + $0x618] sm:$0xff]  ;;  %v2780_v10 = vadd.s32 %v5000_v5, %v2523_v52  ;;  %vm3035_vm3 = vcmp.lt.s32.totalorder %v2779_v0, 2062  ;;  %v3545_v27 = vmul.f32 %v3289_v15, %v3289_v15 }
 0x403   : > { %v2265_v13 = vsub.f32 %v1753_v62, %v2009_v63  ;;  %v3290_v23 = vsel %vm3034_vm2, %v2264_v4, 0.0  ;;  %v2532_v62 = vadd.s32 1640, %v4995_v3  ;;  %v1761_v0 = vld [vmem:[%s4456_s18 + $0x658] sm:$0xff] }
 0x404   : > { %v3791_v26 = vadd.f32 %v3790_v18, %v3535_v9  ;;  %v2010_v9 = vld [vmem:[%s4462_s26 + $0x620] sm:$0xff]  ;;  %v2781_v18 = vadd.s32 %v5000_v5, %v2524_v60  ;;  %vm3036_vm4 = vcmp.lt.s32.totalorder %v2780_v10, 2062  ;;  %v3546_v35 = vmul.f32 %v3290_v23, %v3290_v23 }
 0x405   : > { %v2266_v21 = vsub.f32 %v1754_v8, %v2010_v9  ;;  %v3291_v31 = vsel %vm3035_vm3, %v2265_v13, 0.0  ;;  %v2533_v8 = vadd.s32 1648, %v4995_v3  ;;  %v1762_v10 = vld [vmem:[%s4456_s18 + $0x660] sm:$0xff] }
 0x406   : > { %v3792_v34 = vadd.f32 %v3791_v26, %v3536_v17  ;;  %v2011_v17 = vld [vmem:[%s4462_s26 + $0x628] sm:$0xff]  ;;  %v2782_v26 = vadd.s32 %v5000_v5, %v2525_v6  ;;  %vm3037_vm5 = vcmp.lt.s32.totalorder %v2781_v18, 2062  ;;  %v3547_v43 = vmul.f32 %v3291_v31, %v3291_v31 }
 0x407   : > { %v2267_v29 = vsub.f32 %v1755_v16, %v2011_v17  ;;  %v3292_v39 = vsel %vm3036_vm4, %v2266_v21, 0.0  ;;  %v2534_v16 = vadd.s32 1656, %v4995_v3  ;;  %v1763_v18 = vld [vmem:[%s4456_s18 + $0x668] sm:$0xff] }
 0x408   : > { %v3793_v42 = vadd.f32 %v3792_v34, %v3537_v25  ;;  %v2012_v25 = vld [vmem:[%s4462_s26 + $0x630] sm:$0xff]  ;;  %v2783_v34 = vadd.s32 %v5000_v5, %v2526_v14  ;;  %vm3038_vm6 = vcmp.lt.s32.totalorder %v2782_v26, 2062  ;;  %v3548_v51 = vmul.f32 %v3292_v39, %v3292_v39 }
 0x409   : > { %v2268_v37 = vsub.f32 %v1756_v24, %v2012_v25  ;;  %v3293_v47 = vsel %vm3037_vm5, %v2267_v29, 0.0  ;;  %v2535_v24 = vadd.s32 1664, %v4995_v3  ;;  %v1764_v26 = vld [vmem:[%s4456_s18 + $0x670] sm:$0xff] }
 0x40a   : > { %v3794_v50 = vadd.f32 %v3793_v42, %v3538_v33  ;;  %v2013_v33 = vld [vmem:[%s4462_s26 + $0x638] sm:$0xff]  ;;  %v2784_v42 = vadd.s32 %v5000_v5, %v2527_v22  ;;  %vm3039_vm7 = vcmp.lt.s32.totalorder %v2783_v34, 2062  ;;  %v3549_v59 = vmul.f32 %v3293_v47, %v3293_v47 }
 0x40b   : > { %v2269_v45 = vsub.f32 %v1757_v32, %v2013_v33  ;;  %v3294_v55 = vsel %vm3038_vm6, %v2268_v37, 0.0  ;;  %v2536_v32 = vadd.s32 1672, %v4995_v3  ;;  %v1765_v34 = vld [vmem:[%s4456_s18 + $0x678] sm:$0xff] }
 0x40c   : > { %v3795_v58 = vadd.f32 %v3794_v50, %v3539_v41  ;;  %v2014_v41 = vld [vmem:[%s4462_s26 + $0x640] sm:$0xff]  ;;  %v2785_v50 = vadd.s32 %v5000_v5, %v2528_v30  ;;  %vm3040_vm8 = vcmp.lt.s32.totalorder %v2784_v42, 2062  ;;  %v3550_v4 = vmul.f32 %v3294_v55, %v3294_v55 }
 0x40d   : > { %v2270_v53 = vsub.f32 %v1758_v40, %v2014_v41  ;;  %v3295_v63 = vsel %vm3039_vm7, %v2269_v45, 0.0  ;;  %v2537_v40 = vadd.s32 1680, %v4995_v3  ;;  %v1766_v42 = vld [vmem:[%s4456_s18 + $0x680] sm:$0xff] }
 0x40e   : > { %v3796_v2 = vadd.f32 %v3795_v58, %v3540_v49  ;;  %v2015_v49 = vld [vmem:[%s4462_s26 + $0x648] sm:$0xff]  ;;  %v2786_v58 = vadd.s32 %v5000_v5, %v2529_v38  ;;  %vm3041_vm9 = vcmp.lt.s32.totalorder %v2785_v50, 2062  ;;  %v3551_v13 = vmul.f32 %v3295_v63, %v3295_v63 }
 0x40f   : > { %v2271_v61 = vsub.f32 %v1759_v48, %v2015_v49  ;;  %v3296_v9 = vsel %vm3040_vm8, %v2270_v53, 0.0  ;;  %v2538_v48 = vadd.s32 1688, %v4995_v3  ;;  %v1767_v50 = vld [vmem:[%s4456_s18 + $0x688] sm:$0xff] }
 0x410   : > { %v3797_v12 = vadd.f32 %v3796_v2, %v3541_v57  ;;  %v2016_v57 = vld [vmem:[%s4462_s26 + $0x650] sm:$0xff]  ;;  %v2787_v2 = vadd.s32 %v5000_v5, %v2530_v46  ;;  %vm3042_vm10 = vcmp.lt.s32.totalorder %v2786_v58, 2062  ;;  %v3552_v21 = vmul.f32 %v3296_v9, %v3296_v9 }
 0x411   : > { %v2272_v7 = vsub.f32 %v1760_v56, %v2016_v57  ;;  %v3297_v17 = vsel %vm3041_vm9, %v2271_v61, 0.0  ;;  %v2539_v56 = vadd.s32 1696, %v4995_v3  ;;  %v1768_v58 = vld [vmem:[%s4456_s18 + $0x690] sm:$0xff] }
 0x412   : > { %v3798_v20 = vadd.f32 %v3797_v12, %v3542_v1  ;;  %v2017_v1 = vld [vmem:[%s4462_s26 + $0x658] sm:$0xff]  ;;  %v2788_v12 = vadd.s32 %v5000_v5, %v2531_v54  ;;  %vm3043_vm11 = vcmp.lt.s32.totalorder %v2787_v2, 2062  ;;  %v3553_v29 = vmul.f32 %v3297_v17, %v3297_v17 }
 0x413   : > { %v2273_v15 = vsub.f32 %v1761_v0, %v2017_v1  ;;  %v3298_v25 = vsel %vm3042_vm10, %v2272_v7, 0.0  ;;  %v2540_v0 = vadd.s32 1704, %v4995_v3  ;;  %v1769_v2 = vld [vmem:[%s4456_s18 + $0x698] sm:$0xff] }
 0x414   : > { %v3799_v28 = vadd.f32 %v3798_v20, %v3543_v11  ;;  %v2018_v11 = vld [vmem:[%s4462_s26 + $0x660] sm:$0xff]  ;;  %v2789_v20 = vadd.s32 %v5000_v5, %v2532_v62  ;;  %vm3044_vm12 = vcmp.lt.s32.totalorder %v2788_v12, 2062  ;;  %v3554_v37 = vmul.f32 %v3298_v25, %v3298_v25 }
 0x415   : > { %v2274_v23 = vsub.f32 %v1762_v10, %v2018_v11  ;;  %v3299_v33 = vsel %vm3043_vm11, %v2273_v15, 0.0  ;;  %v2541_v10 = vadd.s32 1712, %v4995_v3  ;;  %v1770_v12 = vld [vmem:[%s4456_s18 + $0x6a0] sm:$0xff] }
 0x416   : > { %v3800_v36 = vadd.f32 %v3799_v28, %v3544_v19  ;;  %v2019_v19 = vld [vmem:[%s4462_s26 + $0x668] sm:$0xff]  ;;  %v2790_v28 = vadd.s32 %v5000_v5, %v2533_v8  ;;  %vm3045_vm13 = vcmp.lt.s32.totalorder %v2789_v20, 2062  ;;  %v3555_v45 = vmul.f32 %v3299_v33, %v3299_v33 }
 0x417   : > { %v2275_v31 = vsub.f32 %v1763_v18, %v2019_v19  ;;  %v3300_v41 = vsel %vm3044_vm12, %v2274_v23, 0.0  ;;  %v2542_v18 = vadd.s32 1720, %v4995_v3  ;;  %v1771_v20 = vld [vmem:[%s4456_s18 + $0x6a8] sm:$0xff] }
 0x418   : > { %v3801_v44 = vadd.f32 %v3800_v36, %v3545_v27  ;;  %v2020_v27 = vld [vmem:[%s4462_s26 + $0x670] sm:$0xff]  ;;  %v2791_v36 = vadd.s32 %v5000_v5, %v2534_v16  ;;  %vm3046_vm14 = vcmp.lt.s32.totalorder %v2790_v28, 2062  ;;  %v3556_v53 = vmul.f32 %v3300_v41, %v3300_v41 }
 0x419   : > { %v2276_v39 = vsub.f32 %v1764_v26, %v2020_v27  ;;  %v3301_v49 = vsel %vm3045_vm13, %v2275_v31, 0.0  ;;  %v2543_v26 = vadd.s32 1728, %v4995_v3  ;;  %v1772_v28 = vld [vmem:[%s4456_s18 + $0x6b0] sm:$0xff] }
 0x41a   : > { %v3802_v52 = vadd.f32 %v3801_v44, %v3546_v35  ;;  %v2021_v35 = vld [vmem:[%s4462_s26 + $0x678] sm:$0xff]  ;;  %v2792_v44 = vadd.s32 %v5000_v5, %v2535_v24  ;;  %vm3047_vm15 = vcmp.lt.s32.totalorder %v2791_v36, 2062  ;;  %v3557_v61 = vmul.f32 %v3301_v49, %v3301_v49 }
 0x41b   : > { %v2277_v47 = vsub.f32 %v1765_v34, %v2021_v35  ;;  %v3302_v57 = vsel %vm3046_vm14, %v2276_v39, 0.0  ;;  %v2544_v34 = vadd.s32 1736, %v4995_v3  ;;  %v1773_v36 = vld [vmem:[%s4456_s18 + $0x6b8] sm:$0xff] }
 0x41c   : > { %v3803_v60 = vadd.f32 %v3802_v52, %v3547_v43  ;;  %v2022_v43 = vld [vmem:[%s4462_s26 + $0x680] sm:$0xff]  ;;  %v2793_v52 = vadd.s32 %v5000_v5, %v2536_v32  ;;  %vm3048_vm0 = vcmp.lt.s32.totalorder %v2792_v44, 2062  ;;  %v3558_v7 = vmul.f32 %v3302_v57, %v3302_v57 }
 0x41d   : > { %v2278_v55 = vsub.f32 %v1766_v42, %v2022_v43  ;;  %v3303_v1 = vsel %vm3047_vm15, %v2277_v47, 0.0  ;;  %v2545_v42 = vadd.s32 1744, %v4995_v3  ;;  %v1774_v44 = vld [vmem:[%s4456_s18 + $0x6c0] sm:$0xff] }
 0x41e   : > { %v3804_v6 = vadd.f32 %v3803_v60, %v3548_v51  ;;  %v2023_v51 = vld [vmem:[%s4462_s26 + $0x688] sm:$0xff]  ;;  %v2794_v60 = vadd.s32 %v5000_v5, %v2537_v40  ;;  %vm3049_vm1 = vcmp.lt.s32.totalorder %v2793_v52, 2062  ;;  %v3559_v15 = vmul.f32 %v3303_v1, %v3303_v1 }
 0x41f   : > { %v2279_v63 = vsub.f32 %v1767_v50, %v2023_v51  ;;  %v3304_v11 = vsel %vm3048_vm0, %v2278_v55, 0.0  ;;  %v2546_v50 = vadd.s32 1752, %v4995_v3  ;;  %v1775_v52 = vld [vmem:[%s4456_s18 + $0x6c8] sm:$0xff] }
 0x420   : > { %v3805_v14 = vadd.f32 %v3804_v6, %v3549_v59  ;;  %v2024_v59 = vld [vmem:[%s4462_s26 + $0x690] sm:$0xff]  ;;  %v2795_v6 = vadd.s32 %v5000_v5, %v2538_v48  ;;  %vm3050_vm2 = vcmp.lt.s32.totalorder %v2794_v60, 2062  ;;  %v3560_v23 = vmul.f32 %v3304_v11, %v3304_v11 }
 0x421   : > { %v2280_v9 = vsub.f32 %v1768_v58, %v2024_v59  ;;  %v3305_v19 = vsel %vm3049_vm1, %v2279_v63, 0.0  ;;  %v2547_v58 = vadd.s32 1760, %v4995_v3  ;;  %v1776_v60 = vld [vmem:[%s4456_s18 + $0x6d0] sm:$0xff] }
 0x422   : > { %v3806_v22 = vadd.f32 %v3805_v14, %v3550_v4  ;;  %v2025_v4 = vld [vmem:[%s4462_s26 + $0x698] sm:$0xff]  ;;  %v2796_v14 = vadd.s32 %v5000_v5, %v2539_v56  ;;  %vm3051_vm3 = vcmp.lt.s32.totalorder %v2795_v6, 2062  ;;  %v3561_v31 = vmul.f32 %v3305_v19, %v3305_v19 }
 0x423   : > { %v2281_v17 = vsub.f32 %v1769_v2, %v2025_v4  ;;  %v3306_v27 = vsel %vm3050_vm2, %v2280_v9, 0.0  ;;  %v2548_v2 = vadd.s32 1768, %v4995_v3  ;;  %v1777_v6 = vld [vmem:[%s4456_s18 + $0x6d8] sm:$0xff] }
 0x424   : > { %v3807_v30 = vadd.f32 %v3806_v22, %v3551_v13  ;;  %v2026_v13 = vld [vmem:[%s4462_s26 + $0x6a0] sm:$0xff]  ;;  %v2797_v22 = vadd.s32 %v5000_v5, %v2540_v0  ;;  %vm3052_vm4 = vcmp.lt.s32.totalorder %v2796_v14, 2062  ;;  %v3562_v39 = vmul.f32 %v3306_v27, %v3306_v27 }
 0x425   : > { %v2282_v25 = vsub.f32 %v1770_v12, %v2026_v13  ;;  %v3307_v35 = vsel %vm3051_vm3, %v2281_v17, 0.0  ;;  %v2549_v12 = vadd.s32 1776, %v4995_v3  ;;  %v1778_v14 = vld [vmem:[%s4456_s18 + $0x6e0] sm:$0xff] }
 0x426   : > { %v3808_v38 = vadd.f32 %v3807_v30, %v3552_v21  ;;  %v2027_v21 = vld [vmem:[%s4462_s26 + $0x6a8] sm:$0xff]  ;;  %v2798_v30 = vadd.s32 %v5000_v5, %v2541_v10  ;;  %vm3053_vm5 = vcmp.lt.s32.totalorder %v2797_v22, 2062  ;;  %v3563_v47 = vmul.f32 %v3307_v35, %v3307_v35 }
 0x427   : > { %v2283_v33 = vsub.f32 %v1771_v20, %v2027_v21  ;;  %v3308_v43 = vsel %vm3052_vm4, %v2282_v25, 0.0  ;;  %v2550_v20 = vadd.s32 1784, %v4995_v3  ;;  %v1779_v22 = vld [vmem:[%s4456_s18 + $0x6e8] sm:$0xff] }
 0x428   : > { %v3809_v46 = vadd.f32 %v3808_v38, %v3553_v29  ;;  %v2028_v29 = vld [vmem:[%s4462_s26 + $0x6b0] sm:$0xff]  ;;  %v2799_v38 = vadd.s32 %v5000_v5, %v2542_v18  ;;  %vm3054_vm6 = vcmp.lt.s32.totalorder %v2798_v30, 2062  ;;  %v3564_v55 = vmul.f32 %v3308_v43, %v3308_v43 }
 0x429   : > { %v2284_v41 = vsub.f32 %v1772_v28, %v2028_v29  ;;  %v3309_v51 = vsel %vm3053_vm5, %v2283_v33, 0.0  ;;  %v2551_v28 = vadd.s32 1792, %v4995_v3  ;;  %v1780_v30 = vld [vmem:[%s4456_s18 + $0x6f0] sm:$0xff] }
 0x42a   : > { %v3810_v54 = vadd.f32 %v3809_v46, %v3554_v37  ;;  %v2029_v37 = vld [vmem:[%s4462_s26 + $0x6b8] sm:$0xff]  ;;  %v2800_v46 = vadd.s32 %v5000_v5, %v2543_v26  ;;  %vm3055_vm7 = vcmp.lt.s32.totalorder %v2799_v38, 2062  ;;  %v3565_v63 = vmul.f32 %v3309_v51, %v3309_v51 }
 0x42b   : > { %v2285_v49 = vsub.f32 %v1773_v36, %v2029_v37  ;;  %v3310_v59 = vsel %vm3054_vm6, %v2284_v41, 0.0  ;;  %v2552_v36 = vadd.s32 1800, %v4995_v3  ;;  %v1781_v38 = vld [vmem:[%s4456_s18 + $0x6f8] sm:$0xff] }
 0x42c   : > { %v3811_v62 = vadd.f32 %v3810_v54, %v3555_v45  ;;  %v2030_v45 = vld [vmem:[%s4462_s26 + $0x6c0] sm:$0xff]  ;;  %v2801_v54 = vadd.s32 %v5000_v5, %v2544_v34  ;;  %vm3056_vm8 = vcmp.lt.s32.totalorder %v2800_v46, 2062  ;;  %v3566_v9 = vmul.f32 %v3310_v59, %v3310_v59 }
 0x42d   : > { %v2286_v57 = vsub.f32 %v1774_v44, %v2030_v45  ;;  %v3311_v4 = vsel %vm3055_vm7, %v2285_v49, 0.0  ;;  %v2553_v44 = vadd.s32 1808, %v4995_v3  ;;  %v1782_v46 = vld [vmem:[%s4456_s18 + $0x700] sm:$0xff] }
 0x42e   : > { %v3812_v8 = vadd.f32 %v3811_v62, %v3556_v53  ;;  %v2031_v53 = vld [vmem:[%s4462_s26 + $0x6c8] sm:$0xff]  ;;  %v2802_v62 = vadd.s32 %v5000_v5, %v2545_v42  ;;  %vm3057_vm9 = vcmp.lt.s32.totalorder %v2801_v54, 2062  ;;  %v3567_v17 = vmul.f32 %v3311_v4, %v3311_v4 }
 0x42f   : > { %v2287_v1 = vsub.f32 %v1775_v52, %v2031_v53  ;;  %v3312_v13 = vsel %vm3056_vm8, %v2286_v57, 0.0  ;;  %v2554_v52 = vadd.s32 1816, %v4995_v3  ;;  %v1783_v54 = vld [vmem:[%s4456_s18 + $0x708] sm:$0xff] }
 0x430   : > { %v3813_v16 = vadd.f32 %v3812_v8, %v3557_v61  ;;  %v2032_v61 = vld [vmem:[%s4462_s26 + $0x6d0] sm:$0xff]  ;;  %v2803_v8 = vadd.s32 %v5000_v5, %v2546_v50  ;;  %vm3058_vm10 = vcmp.lt.s32.totalorder %v2802_v62, 2062  ;;  %v3568_v25 = vmul.f32 %v3312_v13, %v3312_v13 }
 0x431   : > { %v2288_v11 = vsub.f32 %v1776_v60, %v2032_v61  ;;  %v3313_v21 = vsel %vm3057_vm9, %v2287_v1, 0.0  ;;  %v2555_v60 = vadd.s32 1824, %v4995_v3  ;;  %v1784_v62 = vld [vmem:[%s4456_s18 + $0x710] sm:$0xff] }
 0x432   : > { %v3814_v24 = vadd.f32 %v3813_v16, %v3558_v7  ;;  %v2033_v7 = vld [vmem:[%s4462_s26 + $0x6d8] sm:$0xff]  ;;  %v2804_v16 = vadd.s32 %v5000_v5, %v2547_v58  ;;  %vm3059_vm11 = vcmp.lt.s32.totalorder %v2803_v8, 2062  ;;  %v3569_v33 = vmul.f32 %v3313_v21, %v3313_v21 }
 0x433   : > { %v2289_v19 = vsub.f32 %v1777_v6, %v2033_v7  ;;  %v3314_v29 = vsel %vm3058_vm10, %v2288_v11, 0.0  ;;  %v2556_v6 = vadd.s32 1832, %v4995_v3  ;;  %v1785_v8 = vld [vmem:[%s4456_s18 + $0x718] sm:$0xff] }
 0x434   : > { %v3815_v32 = vadd.f32 %v3814_v24, %v3559_v15  ;;  %v2034_v15 = vld [vmem:[%s4462_s26 + $0x6e0] sm:$0xff]  ;;  %v2805_v24 = vadd.s32 %v5000_v5, %v2548_v2  ;;  %vm3060_vm12 = vcmp.lt.s32.totalorder %v2804_v16, 2062  ;;  %v3570_v41 = vmul.f32 %v3314_v29, %v3314_v29 }
 0x435   : > { %v2290_v27 = vsub.f32 %v1778_v14, %v2034_v15  ;;  %v3315_v37 = vsel %vm3059_vm11, %v2289_v19, 0.0  ;;  %v2557_v14 = vadd.s32 1840, %v4995_v3  ;;  %v1786_v16 = vld [vmem:[%s4456_s18 + $0x720] sm:$0xff] }
 0x436   : > { %v3816_v40 = vadd.f32 %v3815_v32, %v3560_v23  ;;  %v2035_v23 = vld [vmem:[%s4462_s26 + $0x6e8] sm:$0xff]  ;;  %v2806_v32 = vadd.s32 %v5000_v5, %v2549_v12  ;;  %vm3061_vm13 = vcmp.lt.s32.totalorder %v2805_v24, 2062  ;;  %v3571_v49 = vmul.f32 %v3315_v37, %v3315_v37 }
 0x437   : > { %v2291_v35 = vsub.f32 %v1779_v22, %v2035_v23  ;;  %v3316_v45 = vsel %vm3060_vm12, %v2290_v27, 0.0  ;;  %v2558_v22 = vadd.s32 1848, %v4995_v3  ;;  %v1787_v24 = vld [vmem:[%s4456_s18 + $0x728] sm:$0xff] }
 0x438   : > { %v3817_v48 = vadd.f32 %v3816_v40, %v3561_v31  ;;  %v2036_v31 = vld [vmem:[%s4462_s26 + $0x6f0] sm:$0xff]  ;;  %v2807_v40 = vadd.s32 %v5000_v5, %v2550_v20  ;;  %vm3062_vm14 = vcmp.lt.s32.totalorder %v2806_v32, 2062  ;;  %v3572_v57 = vmul.f32 %v3316_v45, %v3316_v45 }
 0x439   : > { %v2292_v43 = vsub.f32 %v1780_v30, %v2036_v31  ;;  %v3317_v53 = vsel %vm3061_vm13, %v2291_v35, 0.0  ;;  %v2559_v30 = vadd.s32 1856, %v4995_v3  ;;  %v1788_v32 = vld [vmem:[%s4456_s18 + $0x730] sm:$0xff] }
 0x43a   : > { %v3818_v56 = vadd.f32 %v3817_v48, %v3562_v39  ;;  %v2037_v39 = vld [vmem:[%s4462_s26 + $0x6f8] sm:$0xff]  ;;  %v2808_v48 = vadd.s32 %v5000_v5, %v2551_v28  ;;  %vm3063_vm15 = vcmp.lt.s32.totalorder %v2807_v40, 2062  ;;  %v3573_v1 = vmul.f32 %v3317_v53, %v3317_v53 }
 0x43b   : > { %v2293_v51 = vsub.f32 %v1781_v38, %v2037_v39  ;;  %v3318_v61 = vsel %vm3062_vm14, %v2292_v43, 0.0  ;;  %v2560_v38 = vadd.s32 1864, %v4995_v3  ;;  %v1789_v40 = vld [vmem:[%s4456_s18 + $0x738] sm:$0xff] }
 0x43c   : > { %v3819_v0 = vadd.f32 %v3818_v56, %v3563_v47  ;;  %v2038_v47 = vld [vmem:[%s4462_s26 + $0x700] sm:$0xff]  ;;  %v2809_v56 = vadd.s32 %v5000_v5, %v2552_v36  ;;  %vm3064_vm0 = vcmp.lt.s32.totalorder %v2808_v48, 2062  ;;  %v3574_v11 = vmul.f32 %v3318_v61, %v3318_v61 }
 0x43d   : > { %v2294_v59 = vsub.f32 %v1782_v46, %v2038_v47  ;;  %v3319_v7 = vsel %vm3063_vm15, %v2293_v51, 0.0  ;;  %v2561_v46 = vadd.s32 1872, %v4995_v3  ;;  %v1790_v48 = vld [vmem:[%s4456_s18 + $0x740] sm:$0xff] }
 0x43e   : > { %v3820_v10 = vadd.f32 %v3819_v0, %v3564_v55  ;;  %v2039_v55 = vld [vmem:[%s4462_s26 + $0x708] sm:$0xff]  ;;  %v2810_v0 = vadd.s32 %v5000_v5, %v2553_v44  ;;  %vm3065_vm1 = vcmp.lt.s32.totalorder %v2809_v56, 2062  ;;  %v3575_v19 = vmul.f32 %v3319_v7, %v3319_v7 }
 0x43f   : > { %v2295_v4 = vsub.f32 %v1783_v54, %v2039_v55  ;;  %v3320_v15 = vsel %vm3064_vm0, %v2294_v59, 0.0  ;;  %v2562_v54 = vadd.s32 1880, %v4995_v3  ;;  %v1791_v56 = vld [vmem:[%s4456_s18 + $0x748] sm:$0xff] }
 0x440   : > { %v3821_v18 = vadd.f32 %v3820_v10, %v3565_v63  ;;  %v2040_v63 = vld [vmem:[%s4462_s26 + $0x710] sm:$0xff]  ;;  %v2811_v10 = vadd.s32 %v5000_v5, %v2554_v52  ;;  %vm3066_vm2 = vcmp.lt.s32.totalorder %v2810_v0, 2062  ;;  %v3576_v27 = vmul.f32 %v3320_v15, %v3320_v15 }
 0x441   : > { %v2296_v13 = vsub.f32 %v1784_v62, %v2040_v63  ;;  %v3321_v23 = vsel %vm3065_vm1, %v2295_v4, 0.0  ;;  %v2563_v62 = vadd.s32 1888, %v4995_v3  ;;  %v1792_v0 = vld [vmem:[%s4456_s18 + $0x750] sm:$0xff] }
 0x442   : > { %v3822_v26 = vadd.f32 %v3821_v18, %v3566_v9  ;;  %v2041_v9 = vld [vmem:[%s4462_s26 + $0x718] sm:$0xff]  ;;  %v2812_v18 = vadd.s32 %v5000_v5, %v2555_v60  ;;  %vm3067_vm3 = vcmp.lt.s32.totalorder %v2811_v10, 2062  ;;  %v3577_v35 = vmul.f32 %v3321_v23, %v3321_v23 }
 0x443   : > { %v2297_v21 = vsub.f32 %v1785_v8, %v2041_v9  ;;  %v3322_v31 = vsel %vm3066_vm2, %v2296_v13, 0.0  ;;  %v2564_v8 = vadd.s32 1896, %v4995_v3  ;;  %v1793_v10 = vld [vmem:[%s4456_s18 + $0x758] sm:$0xff] }
 0x444   : > { %v3823_v34 = vadd.f32 %v3822_v26, %v3567_v17  ;;  %v2042_v17 = vld [vmem:[%s4462_s26 + $0x720] sm:$0xff]  ;;  %v2813_v26 = vadd.s32 %v5000_v5, %v2556_v6  ;;  %vm3068_vm4 = vcmp.lt.s32.totalorder %v2812_v18, 2062  ;;  %v3578_v43 = vmul.f32 %v3322_v31, %v3322_v31 }
 0x445   : > { %v2298_v29 = vsub.f32 %v1786_v16, %v2042_v17  ;;  %v3323_v39 = vsel %vm3067_vm3, %v2297_v21, 0.0  ;;  %v2565_v16 = vadd.s32 1904, %v4995_v3  ;;  %v1794_v18 = vld [vmem:[%s4456_s18 + $0x760] sm:$0xff] }
 0x446   : > { %v3824_v42 = vadd.f32 %v3823_v34, %v3568_v25  ;;  %v2043_v25 = vld [vmem:[%s4462_s26 + $0x728] sm:$0xff]  ;;  %v2814_v34 = vadd.s32 %v5000_v5, %v2557_v14  ;;  %vm3069_vm5 = vcmp.lt.s32.totalorder %v2813_v26, 2062  ;;  %v3579_v51 = vmul.f32 %v3323_v39, %v3323_v39 }
 0x447   : > { %v2299_v37 = vsub.f32 %v1787_v24, %v2043_v25  ;;  %v3324_v47 = vsel %vm3068_vm4, %v2298_v29, 0.0  ;;  %v2566_v24 = vadd.s32 1912, %v4995_v3  ;;  %v1795_v26 = vld [vmem:[%s4456_s18 + $0x768] sm:$0xff] }
 0x448   : > { %v3825_v50 = vadd.f32 %v3824_v42, %v3569_v33  ;;  %v2044_v33 = vld [vmem:[%s4462_s26 + $0x730] sm:$0xff]  ;;  %v2815_v42 = vadd.s32 %v5000_v5, %v2558_v22  ;;  %vm3070_vm6 = vcmp.lt.s32.totalorder %v2814_v34, 2062  ;;  %v3580_v59 = vmul.f32 %v3324_v47, %v3324_v47 }
 0x449   : > { %v2300_v45 = vsub.f32 %v1788_v32, %v2044_v33  ;;  %v3325_v55 = vsel %vm3069_vm5, %v2299_v37, 0.0  ;;  %v2567_v32 = vadd.s32 1920, %v4995_v3  ;;  %v1796_v34 = vld [vmem:[%s4456_s18 + $0x770] sm:$0xff] }
 0x44a   : > { %v3826_v58 = vadd.f32 %v3825_v50, %v3570_v41  ;;  %v2045_v41 = vld [vmem:[%s4462_s26 + $0x738] sm:$0xff]  ;;  %v2816_v50 = vadd.s32 %v5000_v5, %v2559_v30  ;;  %vm3071_vm7 = vcmp.lt.s32.totalorder %v2815_v42, 2062  ;;  %v3581_v4 = vmul.f32 %v3325_v55, %v3325_v55 }
 0x44b   : > { %v2301_v53 = vsub.f32 %v1789_v40, %v2045_v41  ;;  %v3326_v63 = vsel %vm3070_vm6, %v2300_v45, 0.0  ;;  %v2568_v40 = vadd.s32 1928, %v4995_v3  ;;  %v1797_v42 = vld [vmem:[%s4456_s18 + $0x778] sm:$0xff] }
 0x44c   : > { %v3827_v2 = vadd.f32 %v3826_v58, %v3571_v49  ;;  %v2046_v49 = vld [vmem:[%s4462_s26 + $0x740] sm:$0xff]  ;;  %v2817_v58 = vadd.s32 %v5000_v5, %v2560_v38  ;;  %vm3072_vm8 = vcmp.lt.s32.totalorder %v2816_v50, 2062  ;;  %v3582_v13 = vmul.f32 %v3326_v63, %v3326_v63 }
 0x44d   : > { %v2302_v61 = vsub.f32 %v1790_v48, %v2046_v49  ;;  %v3327_v9 = vsel %vm3071_vm7, %v2301_v53, 0.0  ;;  %v2569_v48 = vadd.s32 1936, %v4995_v3  ;;  %v1798_v50 = vld [vmem:[%s4456_s18 + $0x780] sm:$0xff] }
 0x44e   : > { %v3828_v12 = vadd.f32 %v3827_v2, %v3572_v57  ;;  %v2047_v57 = vld [vmem:[%s4462_s26 + $0x748] sm:$0xff]  ;;  %v2818_v2 = vadd.s32 %v5000_v5, %v2561_v46  ;;  %vm3073_vm9 = vcmp.lt.s32.totalorder %v2817_v58, 2062  ;;  %v3583_v21 = vmul.f32 %v3327_v9, %v3327_v9 }
 0x44f   : > { %v2303_v7 = vsub.f32 %v1791_v56, %v2047_v57  ;;  %v3328_v17 = vsel %vm3072_vm8, %v2302_v61, 0.0  ;;  %v2570_v56 = vadd.s32 1944, %v4995_v3  ;;  %v1799_v58 = vld [vmem:[%s4456_s18 + $0x788] sm:$0xff] }
 0x450   : > { %v3829_v20 = vadd.f32 %v3828_v12, %v3573_v1  ;;  %v2048_v1 = vld [vmem:[%s4462_s26 + $0x750] sm:$0xff]  ;;  %v2819_v12 = vadd.s32 %v5000_v5, %v2562_v54  ;;  %vm3074_vm10 = vcmp.lt.s32.totalorder %v2818_v2, 2062  ;;  %v3584_v29 = vmul.f32 %v3328_v17, %v3328_v17 }
 0x451   : > { %v2304_v15 = vsub.f32 %v1792_v0, %v2048_v1  ;;  %v3329_v25 = vsel %vm3073_vm9, %v2303_v7, 0.0  ;;  %v2571_v0 = vadd.s32 1952, %v4995_v3  ;;  %v1800_v2 = vld [vmem:[%s4456_s18 + $0x790] sm:$0xff] }
 0x452   : > { %v3830_v28 = vadd.f32 %v3829_v20, %v3574_v11  ;;  %v2049_v11 = vld [vmem:[%s4462_s26 + $0x758] sm:$0xff]  ;;  %v2820_v20 = vadd.s32 %v5000_v5, %v2563_v62  ;;  %vm3075_vm11 = vcmp.lt.s32.totalorder %v2819_v12, 2062  ;;  %v3585_v37 = vmul.f32 %v3329_v25, %v3329_v25 }
 0x453   : > { %v2305_v23 = vsub.f32 %v1793_v10, %v2049_v11  ;;  %v3330_v33 = vsel %vm3074_vm10, %v2304_v15, 0.0  ;;  %v2572_v10 = vadd.s32 1960, %v4995_v3  ;;  %v1801_v12 = vld [vmem:[%s4456_s18 + $0x798] sm:$0xff] }
 0x454   : > { %v3831_v36 = vadd.f32 %v3830_v28, %v3575_v19  ;;  %v2050_v19 = vld [vmem:[%s4462_s26 + $0x760] sm:$0xff]  ;;  %v2821_v28 = vadd.s32 %v5000_v5, %v2564_v8  ;;  %vm3076_vm12 = vcmp.lt.s32.totalorder %v2820_v20, 2062  ;;  %v3586_v45 = vmul.f32 %v3330_v33, %v3330_v33 }
 0x455   : > { %v2306_v31 = vsub.f32 %v1794_v18, %v2050_v19  ;;  %v3331_v41 = vsel %vm3075_vm11, %v2305_v23, 0.0  ;;  %v2573_v18 = vadd.s32 1968, %v4995_v3  ;;  %v1802_v20 = vld [vmem:[%s4456_s18 + $0x7a0] sm:$0xff] }
 0x456   : > { %v3832_v44 = vadd.f32 %v3831_v36, %v3576_v27  ;;  %v2051_v27 = vld [vmem:[%s4462_s26 + $0x768] sm:$0xff]  ;;  %v2822_v36 = vadd.s32 %v5000_v5, %v2565_v16  ;;  %vm3077_vm13 = vcmp.lt.s32.totalorder %v2821_v28, 2062  ;;  %v3587_v53 = vmul.f32 %v3331_v41, %v3331_v41 }
 0x457   : > { %v2307_v39 = vsub.f32 %v1795_v26, %v2051_v27  ;;  %v3332_v49 = vsel %vm3076_vm12, %v2306_v31, 0.0  ;;  %v2574_v26 = vadd.s32 1976, %v4995_v3  ;;  %v1803_v28 = vld [vmem:[%s4456_s18 + $0x7a8] sm:$0xff] }
 0x458   : > { %v3833_v52 = vadd.f32 %v3832_v44, %v3577_v35  ;;  %v2052_v35 = vld [vmem:[%s4462_s26 + $0x770] sm:$0xff]  ;;  %v2823_v44 = vadd.s32 %v5000_v5, %v2566_v24  ;;  %vm3078_vm14 = vcmp.lt.s32.totalorder %v2822_v36, 2062  ;;  %v3588_v61 = vmul.f32 %v3332_v49, %v3332_v49 }
 0x459   : > { %v2308_v47 = vsub.f32 %v1796_v34, %v2052_v35  ;;  %v3333_v57 = vsel %vm3077_vm13, %v2307_v39, 0.0  ;;  %v2575_v34 = vadd.s32 1984, %v4995_v3  ;;  %v1804_v36 = vld [vmem:[%s4456_s18 + $0x7b0] sm:$0xff] }
 0x45a   : > { %v3834_v60 = vadd.f32 %v3833_v52, %v3578_v43  ;;  %v2053_v43 = vld [vmem:[%s4462_s26 + $0x778] sm:$0xff]  ;;  %v2824_v52 = vadd.s32 %v5000_v5, %v2567_v32  ;;  %vm3079_vm15 = vcmp.lt.s32.totalorder %v2823_v44, 2062  ;;  %v3589_v7 = vmul.f32 %v3333_v57, %v3333_v57 }
 0x45b   : > { %v2309_v55 = vsub.f32 %v1797_v42, %v2053_v43  ;;  %v3334_v1 = vsel %vm3078_vm14, %v2308_v47, 0.0  ;;  %v2576_v42 = vadd.s32 1992, %v4995_v3  ;;  %v1805_v44 = vld [vmem:[%s4456_s18 + $0x7b8] sm:$0xff] }
 0x45c   : > { %v3835_v6 = vadd.f32 %v3834_v60, %v3579_v51  ;;  %v2054_v51 = vld [vmem:[%s4462_s26 + $0x780] sm:$0xff]  ;;  %v2825_v60 = vadd.s32 %v5000_v5, %v2568_v40  ;;  %vm3080_vm0 = vcmp.lt.s32.totalorder %v2824_v52, 2062  ;;  %v3590_v15 = vmul.f32 %v3334_v1, %v3334_v1 }
 0x45d   : > { %v2310_v63 = vsub.f32 %v1798_v50, %v2054_v51  ;;  %v3335_v11 = vsel %vm3079_vm15, %v2309_v55, 0.0  ;;  %v2577_v50 = vadd.s32 2000, %v4995_v3  ;;  %v1806_v52 = vld [vmem:[%s4456_s18 + $0x7c0] sm:$0xff] }
 0x45e   : > { %v3836_v14 = vadd.f32 %v3835_v6, %v3580_v59  ;;  %v2055_v59 = vld [vmem:[%s4462_s26 + $0x788] sm:$0xff]  ;;  %v2826_v6 = vadd.s32 %v5000_v5, %v2569_v48  ;;  %vm3081_vm1 = vcmp.lt.s32.totalorder %v2825_v60, 2062  ;;  %v3591_v23 = vmul.f32 %v3335_v11, %v3335_v11 }
 0x45f   : > { %v2311_v9 = vsub.f32 %v1799_v58, %v2055_v59  ;;  %v3336_v19 = vsel %vm3080_vm0, %v2310_v63, 0.0  ;;  %v2578_v58 = vadd.s32 2008, %v4995_v3  ;;  %v1807_v60 = vld [vmem:[%s4456_s18 + $0x7c8] sm:$0xff] }
 0x460   : > { %v3837_v22 = vadd.f32 %v3836_v14, %v3581_v4  ;;  %v2056_v4 = vld [vmem:[%s4462_s26 + $0x790] sm:$0xff]  ;;  %v2827_v14 = vadd.s32 %v5000_v5, %v2570_v56  ;;  %vm3082_vm2 = vcmp.lt.s32.totalorder %v2826_v6, 2062  ;;  %v3592_v31 = vmul.f32 %v3336_v19, %v3336_v19 }
 0x461   : > { %v2312_v17 = vsub.f32 %v1800_v2, %v2056_v4  ;;  %v3337_v27 = vsel %vm3081_vm1, %v2311_v9, 0.0  ;;  %v2579_v2 = vadd.s32 2016, %v4995_v3  ;;  %v1808_v6 = vld [vmem:[%s4456_s18 + $0x7d0] sm:$0xff] }
 0x462   : > { %v3838_v30 = vadd.f32 %v3837_v22, %v3582_v13  ;;  %v2057_v13 = vld [vmem:[%s4462_s26 + $0x798] sm:$0xff]  ;;  %v2828_v22 = vadd.s32 %v5000_v5, %v2571_v0  ;;  %vm3083_vm3 = vcmp.lt.s32.totalorder %v2827_v14, 2062  ;;  %v3593_v39 = vmul.f32 %v3337_v27, %v3337_v27 }
 0x463   : > { %v2313_v25 = vsub.f32 %v1801_v12, %v2057_v13  ;;  %v3338_v35 = vsel %vm3082_vm2, %v2312_v17, 0.0  ;;  %v2580_v12 = vadd.s32 2024, %v4995_v3  ;;  %v1809_v14 = vld [vmem:[%s4456_s18 + $0x7d8] sm:$0xff] }
 0x464   : > { %v3839_v38 = vadd.f32 %v3838_v30, %v3583_v21  ;;  %v2058_v21 = vld [vmem:[%s4462_s26 + $0x7a0] sm:$0xff]  ;;  %v2829_v30 = vadd.s32 %v5000_v5, %v2572_v10  ;;  %vm3084_vm4 = vcmp.lt.s32.totalorder %v2828_v22, 2062  ;;  %v3594_v47 = vmul.f32 %v3338_v35, %v3338_v35 }
 0x465   : > { %v2314_v33 = vsub.f32 %v1802_v20, %v2058_v21  ;;  %v3339_v43 = vsel %vm3083_vm3, %v2313_v25, 0.0  ;;  %v2581_v20 = vadd.s32 2032, %v4995_v3  ;;  %v1810_v22 = vld [vmem:[%s4456_s18 + $0x7e0] sm:$0xff] }
 0x466   : > { %v3840_v46 = vadd.f32 %v3839_v38, %v3584_v29  ;;  %v2059_v29 = vld [vmem:[%s4462_s26 + $0x7a8] sm:$0xff]  ;;  %v2830_v38 = vadd.s32 %v5000_v5, %v2573_v18  ;;  %vm3085_vm5 = vcmp.lt.s32.totalorder %v2829_v30, 2062  ;;  %v3595_v55 = vmul.f32 %v3339_v43, %v3339_v43  ;;  %v1813_v43 = vld [vmem:[%s4456_s18 + $0x7f8] sm:$0xff] }
 0x467   : > { %v2315_v41 = vsub.f32 %v1803_v28, %v2059_v29  ;;  %v3340_v51 = vsel %vm3084_vm4, %v2314_v33, 0.0  ;;  %v2582_v28 = vadd.s32 2040, %v4995_v3  ;;  %v1811_v30 = vld [vmem:[%s4456_s18 + $0x7e8] sm:$0xff] }
 0x468   : > { %v3841_v54 = vadd.f32 %v3840_v46, %v3585_v37  ;;  %v2060_v37 = vld [vmem:[%s4462_s26 + $0x7b0] sm:$0xff]  ;;  %v2831_v46 = vadd.s32 %v5000_v5, %v2574_v26  ;;  %vm3086_vm6 = vcmp.lt.s32.totalorder %v2830_v38, 2062  ;;  %v3596_v63 = vmul.f32 %v3340_v51, %v3340_v51 }
 0x469   : > { %v2316_v49 = vsub.f32 %v1804_v36, %v2060_v37  ;;  %v3341_v59 = vsel %vm3085_vm5, %v2315_v41, 0.0  ;;  %v1812_v37 = vld [vmem:[%s4456_s18 + $0x7f0] sm:$0xff] }
 0x46a   : > { %v3842_v62 = vadd.f32 %v3841_v54, %v3586_v45  ;;  %v2061_v45 = vld [vmem:[%s4462_s26 + $0x7b8] sm:$0xff]  ;;  %v2832_v54 = vadd.s32 %v5000_v5, %v2575_v34  ;;  %vm3087_vm7 = vcmp.lt.s32.totalorder %v2831_v46, 2062  ;;  %v3597_v9 = vmul.f32 %v3341_v59, %v3341_v59  ;;  %v2068_v38 = vld [vmem:[%s4462_s26 + $0x7f0] sm:$0xff] }
 0x46b   : > { %v2317_v57 = vsub.f32 %v1805_v44, %v2061_v45  ;;  %v3342_v4 = vsel %vm3086_vm6, %v2316_v49, 0.0  ;;  %v2069_v44 = vld [vmem:[%s4462_s26 + $0x7f8] sm:$0xff]  ;;  %v2839_v45 = vadd.s32 %v5000_v5, %v2582_v28 }
 0x46c   : > { %v3843_v8 = vadd.f32 %v3842_v62, %v3587_v53  ;;  %v2062_v53 = vld [vmem:[%s4462_s26 + $0x7c0] sm:$0xff]  ;;  %v2833_v62 = vadd.s32 %v5000_v5, %v2576_v42  ;;  %vm3088_vm8 = vcmp.lt.s32.totalorder %v2832_v54, 2062  ;;  %v3598_v17 = vmul.f32 %v3342_v4, %v3342_v4 }
 0x46d   : > { %v2318_v1 = vsub.f32 %v1806_v52, %v2062_v53  ;;  %v3343_v13 = vsel %vm3087_vm7, %v2317_v57, 0.0  ;;  %v2325_v52 = vsub.f32 %v1813_v43, %v2069_v44  ;;  %vm3095_vm15 = vcmp.lt.s32.totalorder %v2839_v45, 2062 }
 0x46e   : > { %v3844_v16 = vadd.f32 %v3843_v8, %v3588_v61  ;;  %v2063_v61 = vld [vmem:[%s4462_s26 + $0x7c8] sm:$0xff]  ;;  %v2834_v8 = vadd.s32 %v5000_v5, %v2577_v50  ;;  %vm3089_vm9 = vcmp.lt.s32.totalorder %v2833_v62, 2062  ;;  %v3599_v25 = vmul.f32 %v3343_v13, %v3343_v13 }
 0x46f   : > { %v2319_v11 = vsub.f32 %v1807_v60, %v2063_v61  ;;  %v3344_v21 = vsel %vm3088_vm8, %v2318_v1, 0.0  ;;  %v3351_v59 = vsel %vm3095_vm15, %v2325_v52, 0.0 }
 0x470   : > { %v3845_v24 = vadd.f32 %v3844_v16, %v3589_v7  ;;  %v2064_v7 = vld [vmem:[%s4462_s26 + $0x7d0] sm:$0xff]  ;;  %v2835_v16 = vadd.s32 %v5000_v5, %v2578_v58  ;;  %vm3090_vm10 = vcmp.lt.s32.totalorder %v2834_v8, 2062  ;;  %v3600_v33 = vmul.f32 %v3344_v21, %v3344_v21 }
 0x471   : > { %v2320_v19 = vsub.f32 %v1808_v6, %v2064_v7  ;;  %v3345_v29 = vsel %vm3089_vm9, %v2319_v11, 0.0  ;;  %v3607_v61 = vmul.f32 %v3351_v59, %v3351_v59 }
 0x472   : > { %v3846_v32 = vadd.f32 %v3845_v24, %v3590_v15  ;;  %v2065_v15 = vld [vmem:[%s4462_s26 + $0x7d8] sm:$0xff]  ;;  %v2836_v24 = vadd.s32 %v5000_v5, %v2579_v2  ;;  %vm3091_vm11 = vcmp.lt.s32.totalorder %v2835_v16, 2062 }
 0x473   : > { %v2321_v27 = vsub.f32 %v1809_v14, %v2065_v15  ;;  %v3346_v36 = vsel %vm3090_vm10, %v2320_v19, 0.0 }
 0x474   : > { %v3847_v40 = vadd.f32 %v3846_v32, %v3591_v23  ;;  %v2066_v23 = vld [vmem:[%s4462_s26 + $0x7e0] sm:$0xff]  ;;  %v2837_v32 = vadd.s32 %v5000_v5, %v2580_v12  ;;  %vm3092_vm12 = vcmp.lt.s32.totalorder %v2836_v24, 2062  ;;  %v3602_v46 = vmul.f32 %v3346_v36, %v3346_v36 }
 0x475   : > { %v2322_v35 = vsub.f32 %v1810_v22, %v2066_v23  ;;  %v3347_v42 = vsel %vm3091_vm11, %v2321_v27, 0.0 }
 0x476   : > { %v3848_v48 = vadd.f32 %v3847_v40, %v3592_v31  ;;  %v2067_v31 = vld [vmem:[%s4462_s26 + $0x7e8] sm:$0xff]  ;;  %v3601_v40 = vmul.f32 %v3345_v29, %v3345_v29  ;;  %vm3093_vm13 = vcmp.lt.s32.totalorder %v2837_v32, 2062  ;;  %v3603_v50 = vmul.f32 %v3347_v42, %v3347_v42 }
 0x477   : > { %v2323_v3 = vsub.f32 %v1811_v30, %v2067_v31  ;;  %v3348_v49 = vsel %vm3092_vm12, %v2322_v35, 0.0 }
 0x478   : > { %v3849_v56 = vadd.f32 %v3848_v48, %v3593_v39  ;;  %v2838_v39 = vadd.s32 %v5000_v5, %v2581_v20  ;;  %v2324_v48 = vsub.f32 %v1812_v37, %v2068_v38  ;;  %v3604_v54 = vmul.f32 %v3348_v49, %v3348_v49 }
 0x479   : > { %v3349_v53 = vsel %vm3093_vm13, %v2323_v3, 0.0 }
 0x47a   : > { %v3850_v0 = vadd.f32 %v3849_v56, %v3594_v47  ;;  %vm3094_vm14 = vcmp.lt.s32.totalorder %v2838_v39, 2062  ;;  %v3605_v57 = vmul.f32 %v3349_v53, %v3349_v53 }
 0x47b   : > { %v3350_v56 = vsel %vm3094_vm14, %v2324_v48, 0.0 }
 0x47c   : > { %v3851_v10 = vadd.f32 %v3850_v0, %v3595_v55  ;;  %v3606_v5 = vmul.f32 %v3350_v56, %v3350_v56  ;;  %v3608_v0 = vld [vmem:[%s4476_s24] sm:$0xff] }
 0x47e   : > { %v3852_v18 = vadd.f32 %v3851_v10, %v3596_v63 }
 0x480   : > { %v3853_v26 = vadd.f32 %v3852_v18, %v3597_v9 }
 0x482   : > { %v3854_v34 = vadd.f32 %v3853_v26, %v3598_v17 }
 0x484   : > { %v3855_v41 = vadd.f32 %v3854_v34, %v3599_v25 }
 0x486   : > { %v3856_v47 = vadd.f32 %v3855_v41, %v3600_v33 }
 0x488   : > { %v3857_v51 = vadd.f32 %v3856_v47, %v3601_v40 }
 0x48a   : > { %v3858_v55 = vadd.f32 %v3857_v51, %v3602_v46 }
 0x48c   : > { %v3859_v58 = vadd.f32 %v3858_v55, %v3603_v50 }
 0x48e   : > { %v3860_v60 = vadd.f32 %v3859_v58, %v3604_v54 }
 0x490   : > { %v3861_v62 = vadd.f32 %v3860_v60, %v3605_v57 }
 0x492   : > { %v3862_v63 = vadd.f32 %v3861_v62, %v3606_v5 }
 0x494   : > { %v3863_v1 = vadd.f32 %v3862_v63, %v3607_v61 }
 0x496   : > { %v3864_v2 = vadd.f32 %v3863_v1, %v3608_v0 }
 0x498   : > { %3865 = vst [vmem:[%s4476_s24] sm:$0xff] %v3864_v2 }
 0x499 PF: > { %s4007_s25 = sshll.u32 %s4250_s15, 7  ;;  %s3880_s19 = sshll.u32 %s4476_s24, 4  ;;  %s3881_s19 = int_to_ptr.vmem [resolvable:$true] %s3880_s19 }
 0x49a   : > { %s3878_s23 = scalar_lea.hbm %s6082_s2, %s4007_s25  ;;  %s3867_s28 = scalar_lea.sflag [#allocation4], %s241_s6 }
 0x49b   : > { %s4150_s7 = scalar_lea.vmem %s3881_s19, 128  ;;  %s4267_s8 = smov [#allocation7]  }
 0x49c   : > { %p4151_p12 = scmp.ne.s32.totalorder %s3881_s19, %s4150_s7  ;;  %s4154_s18 = sshll.u32 %s4267_s8, 4  ;;  %s4155_s18 = int_to_ptr.vmem [resolvable:$false] %s4154_s18 }
 0x49d   : > { %s4156_s0 = scalar_lea.vmem %s4155_s18, 256  ;;  %p4157_p4 = scmp.lt.s32.totalorder %s3881_s19, %s4155_s18 }
 0x49e   : > { %p4152_p13 = pnand %p4151_p12, %p4364_p1  ;;  %p4158_p7 = scmp.lt.s32.totalorder %s4156_s0, %s4150_s7 }
 0x4a0   : > { %p4153_p0 = pneg %p4152_p13  ;;  %p4159_p9 = por %p4158_p7, %p4157_p4 }
 0x4a2   : > { %p4160_p2 = pnand %p4159_p9, %p4153_p0 }
 0x4a4   : > { %4163 = shalt.err (!%p4160_p2)
}
 0x4a5   : > { %s4164_s15 = scalar_lea.hbm %s3878_s23, 128  ;;  %s4168_s5 = scalar_lea.hbm %s6082_s2, 256 }
 0x4a6   : > { %p4165_p3 = scmp.ne.s32.totalorder %s3878_s23, %s4164_s15  ;;  %p4169_p11 = scmp.lt.s32.totalorder %s3878_s23, %s6082_s2 }
 0x4a7   : > { %p4170_p6 = scmp.lt.s32.totalorder %s4168_s5, %s4164_s15 }
 0x4a8   : > { %p4166_p5 = pnand %p4165_p3, %p4364_p1 }
 0x4a9   : > { %p4171_p8 = por %p4170_p6, %p4169_p11 }
 0x4aa   : > { %p4167_p10 = pneg %p4166_p5 }
 0x4ac   : > { %p4172_p12 = pnand %p4171_p8, %p4167_p10 }
 0x4ae   : > { %4175 = shalt.err (!%p4172_p12)
}
 0x4af   : > { %4014 = dma.vmem_to_hbm [thread:$0]  (%p4364_p1), %s3881_s19, 128, %s3878_s23, %s3867_s28  }
 0x4b0 PF: > { %s3892_s24 = sand.u32 1, %s4226_s9   ;;  %p6090_p13 = scmp.ne.s32.totalorder %s6088_s4, 0 }
 0x4b1   : > { %p6091_p0 = scmp.ge.s32.totalorder %s4258_s17, 2  ;;  %s3893_s25 = scalar_lea.sflag [#allocation4], %s3892_s24 }
 0x4b3   : > { %p4017_p4 = pnand %p6091_p0, %p6090_p13 }
 0x4b5   : > { %p4018_p7 = pneg %p4017_p4 }
 0x4b7   : > { %4221 = dma.done.wait (%p4018_p7), %s3893_s25, 128  }
 0x4b8   : > { %4223 = vsyncadd (%p4018_p7), %s3893_s25, 4294967168  ;;  %s21_s17 = sadd.s32 1, %s4258_s17   ;;  %s6092_s9 = smov %s4230_s10 }
 0x4b9   : > { %p18_p9 = scmp.ge.s32.totalorder %s21_s17, 4   ;;  %s6093_s10 = smov %s4234_s11 }
 0x4ba   : > { %s6094_s11 = smov %s4355_s29  ;;  %s6095_s12 = smov %s4242_s13 }
 0x4bb   : > { %s6096_s13 = smov %s4246_s14  ;;  %s6097_s14 = smov %s4358_s30 }
 0x4bc   : > { %s6098_s15 = smov %s4254_s16  ;;  %s6099_s16 = smov %s6101_s20 }
 0x4bd   :  { %20 = sbr.rel (!%p18_p9) target bundleno = 12 (0xc), region = 98 }
 0x4c2   :  { %3898 = vsyncpa [#allocation3], 1 }
 0x4c3   :  { %3900 = vsyncpa [#allocation3 + $0x1], 1 }
 0x4c4   :  { %3901 = vsyncpa [#allocation6], 1 }
 0x4c5   :  { %3903 = vsyncpa [#allocation6 + $0x1], 1 }
 0x4c6   :  { %3904 = vsyncpa [#allocation4], 1 }
 0x4c7   :  { %3906 = vsyncpa [#allocation4 + $0x1], 1 }

</bundles_post_ra>
